<compile_context>
chip_gen: v7x
topology: tpu7x:2x2x1
jax: 0.10.0
libtpu: 0.0.40
codegen_flags: <defaults>
</compile_context>

<pallas_src>
import functools

import numpy as np
import jax
import jax.numpy as jnp
from jax.experimental import pallas as pl
from jax.experimental.pallas import tpu as pltpu


_PAR = pltpu.CompilerParams(dimension_semantics=("parallel",))


def _round_up(n, m):
    return ((n + m - 1) // m) * m


# ----------------------------- Pallas kernels -----------------------------

def _mm_kernel(x_ref, w_ref, b_ref, o_ref, *, relu):
    # x: (tm, K) bf16, w: (K, N) bf16, b: (1, N) f32 -> o: (tm, N) bf16
    acc = jnp.dot(x_ref[...], w_ref[...], preferred_element_type=jnp.float32)
    acc = acc + b_ref[...]
    if relu:
        acc = jnp.maximum(acc, 0.0)
    o_ref[...] = acc.astype(o_ref.dtype)


def _conv3x3_from_halo(pad_ref, w3_ref, b3_ref, m, h, w):
    """3x3 'same' conv as 9 shifted matmuls over a zero-halo VMEM scratch."""
    c_in = pad_ref.shape[-1]
    acc = jnp.zeros((m, w3_ref.shape[-1]), jnp.float32) + b3_ref[...]
    for ki in range(3):
        for kj in range(3):
            patch = pad_ref[:, ki:ki + h, kj:kj + w, :].reshape(m, c_in)
            acc = acc + jnp.dot(patch, w3_ref[ki * 3 + kj],
                                preferred_element_type=jnp.float32)
    return acc


def _stage2_kernel(x_ref, w2_ref, b2_ref, w3_ref, b3_ref, w4_ref, b4_ref,
                   o_ref, pad_ref, *, h, w):
    # conv2 (1x1) -> ReLU -> conv3 (3x3, in-kernel halo) -> ReLU -> conv4 (1x1) -> ReLU
    tb = x_ref.shape[0]
    m = tb * h * w
    c_mid = w2_ref.shape[1]

    x2 = x_ref[...].reshape(m, x_ref.shape[-1])
    h2 = jnp.dot(x2, w2_ref[...], preferred_element_type=jnp.float32)
    h2 = jnp.maximum(h2 + b2_ref[...], 0.0).astype(jnp.bfloat16)

    # zero-halo scratch (exact: conv3 has padding=1 with zeros)
    pad_ref[...] = jnp.zeros_like(pad_ref)
    pad_ref[:, 1:h + 1, 1:w + 1, :] = h2.reshape(tb, h, w, c_mid)

    acc = _conv3x3_from_halo(pad_ref, w3_ref, b3_ref, m, h, w)
    h3 = jnp.maximum(acc, 0.0).astype(jnp.bfloat16)

    h4 = jnp.dot(h3, w4_ref[...], preferred_element_type=jnp.float32)
    h4 = jnp.maximum(h4 + b4_ref[...], 0.0)
    o_ref[...] = h4.astype(o_ref.dtype).reshape(tb, h, w, -1)


def _head_kernel(x_ref, w5_ref, b5_ref, w6_ref, b6_ref, w7_ref, b7_ref,
                 wf_ref, bf_ref, o_ref, pad_ref, *, h, w):
    # conv5 (1x1) -> conv6 (3x3, in-kernel halo) -> conv7 (1x1)
    #   -> AdaptiveAvgPool2d((1,1)) (single reshaped reduction) -> fc
    tb = x_ref.shape[0]
    hw = h * w
    m = tb * hw
    c_mid = w5_ref.shape[1]

    x2 = x_ref[...].reshape(m, x_ref.shape[-1])
    h5 = jnp.dot(x2, w5_ref[...], preferred_element_type=jnp.float32)
    h5 = jnp.maximum(h5 + b5_ref[...], 0.0).astype(jnp.bfloat16)

    pad_ref[...] = jnp.zeros_like(pad_ref)
    pad_ref[:, 1:h + 1, 1:w + 1, :] = h5.reshape(tb, h, w, c_mid)

    acc = _conv3x3_from_halo(pad_ref, w6_ref, b6_ref, m, h, w)
    h6 = jnp.maximum(acc, 0.0).astype(jnp.bfloat16)

    h7 = jnp.dot(h6, w7_ref[...], preferred_element_type=jnp.float32)
    h7 = jnp.maximum(h7 + b7_ref[...], 0.0)                      # (m, 512) f32

    # global average pool: one reshaped reduction (no per-tile loop / concat)
    pooled = jnp.sum(h7.reshape(tb, hw, h7.shape[-1]), axis=1) * (1.0 / hw)

    logits = jnp.dot(pooled.astype(jnp.bfloat16), wf_ref[...],
                     preferred_element_type=jnp.float32) + bf_ref[...]
    o_ref[...] = logits.reshape(tb, 1, -1).astype(o_ref.dtype)


# ---------------------------- kernel wrappers ------------------------------

def matmul_bias_relu(x, w, b, relu=True):
    """Fused (x @ w + b) [+ ReLU]. M-tiled; M zero-padded if needed so the
    block stays bounded and the grid has >= 2 steps (v7x has 2 TensorCores)."""
    M, K = x.shape
    Kw, N = w.shape
    assert K == Kw, (K, Kw)

    tm = None
    for t in (512, 256, 128, 64, 32, 16, 8):
        if M % t == 0 and M // t >= 2:
            tm = t
            break
    if tm is None:
        tm = min(128, _round_up(M, 8))
        Mp = _round_up(max(M, 2 * tm), tm)
    else:
        Mp = M

    xb = x.astype(jnp.bfloat16)
    if Mp != M:
        xb = jnp.pad(xb, ((0, Mp - M), (0, 0)))

    out = pl.pallas_call(
        functools.partial(_mm_kernel, relu=relu),
        out_shape=jax.ShapeDtypeStruct((Mp, N), jnp.bfloat16),
        grid=(Mp // tm,),
        in_specs=[
            pl.BlockSpec((tm, K), lambda i: (i, 0)),
            pl.BlockSpec((K, N), lambda i: (0, 0)),
            pl.BlockSpec((1, N), lambda i: (0, 0)),
        ],
        out_specs=pl.BlockSpec((tm, N), lambda i: (i, 0)),
        compiler_params=_PAR,
    )(xb, w, b)
    return out if Mp == M else out[:M]


def _pick_batch_tile(n, hw, max_rows=128):
    """Batch tile for the fused kernels: keep block rows <= 128 (v5e vreg
    budget) and the grid >= 2 steps when possible (v7x's 2 TensorCores)."""
    for t in (8, 4, 2, 1):
        if n % t == 0 and t * hw <= max_rows and (n // t >= 2 or n == 1):
            return t
    return 1


def conv234_block(x, w2, b2, w3, b3, w4, b4):
    """Fused conv2(1x1)+conv3(3x3)+conv4(1x1) over NHWC input, grid over batch."""
    N, H, W, C = x.shape
    tb = _pick_batch_tile(N, H * W)
    c_mid = w2.shape[1]
    c_out = w4.shape[1]
    return pl.pallas_call(
        functools.partial(_stage2_kernel, h=H, w=W),
        out_shape=jax.ShapeDtypeStruct((N, H, W, c_out), jnp.bfloat16),
        grid=(N // tb,),
        in_specs=[
            pl.BlockSpec((tb, H, W, C), lambda i: (i, 0, 0, 0)),
            pl.BlockSpec(w2.shape, lambda i: (0, 0)),
            pl.BlockSpec(b2.shape, lambda i: (0, 0)),
            pl.BlockSpec(w3.shape, lambda i: (0, 0, 0)),
            pl.BlockSpec(b3.shape, lambda i: (0, 0)),
            pl.BlockSpec(w4.shape, lambda i: (0, 0)),
            pl.BlockSpec(b4.shape, lambda i: (0, 0)),
        ],
        out_specs=pl.BlockSpec((tb, H, W, c_out), lambda i: (i, 0, 0, 0)),
        scratch_shapes=[pltpu.VMEM((tb, H + 2, W + 2, c_mid), jnp.bfloat16)],
        compiler_params=_PAR,
    )(x, w2, b2, w3, b3, w4, b4)


def head_block(x, w5, b5, w6, b6, w7, b7, wf, bf):
    """Fused conv5+conv6+conv7+AdaptiveAvgPool2d((1,1))+fc -> padded logits."""
    N, H, W, C = x.shape
    tb = _pick_batch_tile(N, H * W)
    c_mid = w5.shape[1]
    nf = wf.shape[1]
    out = pl.pallas_call(
        functools.partial(_head_kernel, h=H, w=W),
        out_shape=jax.ShapeDtypeStruct((N, 1, nf), jnp.float32),
        grid=(N // tb,),
        in_specs=[
            pl.BlockSpec((tb, H, W, C), lambda i: (i, 0, 0, 0)),
            pl.BlockSpec(w5.shape, lambda i: (0, 0)),
            pl.BlockSpec(b5.shape, lambda i: (0, 0)),
            pl.BlockSpec(w6.shape, lambda i: (0, 0, 0)),
            pl.BlockSpec(b6.shape, lambda i: (0, 0)),
            pl.BlockSpec(w7.shape, lambda i: (0, 0)),
            pl.BlockSpec(b7.shape, lambda i: (0, 0)),
            pl.BlockSpec(wf.shape, lambda i: (0, 0)),
            pl.BlockSpec(bf.shape, lambda i: (0, 0)),
        ],
        out_specs=pl.BlockSpec((tb, 1, nf), lambda i: (i, 0, 0)),
        scratch_shapes=[pltpu.VMEM((tb, H + 2, W + 2, c_mid), jnp.bfloat16)],
        compiler_params=_PAR,
    )(x, w5, b5, w6, b6, w7, b7, wf, bf)
    return out[:, 0, :]


# ------------------------------- JAX glue -----------------------------------

def _im2col(x, kh, kw, stride, pad):
    """x: NHWC -> (N*Ho*Wo, kh*kw*C) patches ordered (ki, kj, c). Only used for
    conv1 (3 input channels), where the absolute traffic is tiny."""
    N, H, W, C = x.shape
    if pad:
        x = jnp.pad(x, ((0, 0), (pad, pad), (pad, pad), (0, 0)))
    Ho = (H + 2 * pad - kh) // stride + 1
    Wo = (W + 2 * pad - kw) // stride + 1
    patches = []
    for i in range(kh):
        for j in range(kw):
            patches.append(x[:, i:i + stride * Ho:stride, j:j + stride * Wo:stride, :])
    cols = jnp.concatenate(patches, axis=-1)
    return cols.reshape(N * Ho * Wo, kh * kw * C), Ho, Wo


def maxpool_3x3_s2_p1(x):
    """MaxPool2d(kernel_size=3, stride=2, padding=1), NHWC.
    NOTE: zero padding is exact ONLY because inputs are post-ReLU (>= 0)."""
    N, H, W, C = x.shape
    k, s, p = 3, 2, 1
    xp = jnp.pad(x, ((0, 0), (p, p), (p, p), (0, 0)))
    Ho = (H + 2 * p - k) // s + 1
    Wo = (W + 2 * p - k) // s + 1
    out = None
    for i in range(k):
        for j in range(k):
            win = xp[:, i:i + s * Ho:s, j:j + s * Wo:s, :]
            out = win if out is None else jnp.maximum(out, win)
    return out


# ------------------------------- SimpleNet ----------------------------------

# (Cout, Cin, kh, kw, stride, pad) for the 7 convs in self.features
_CONV_CFG = [
    (64, 3, 7, 7, 2, 3),
    (64, 64, 1, 1, 1, 0),
    (64, 64, 3, 3, 1, 1),
    (256, 64, 1, 1, 1, 0),
    (128, 256, 1, 1, 1, 0),
    (128, 128, 3, 3, 1, 1),
    (512, 128, 1, 1, 1, 0),
]
# lane-friendly channel padding (exact: zero rows/cols): (cin_pad, cout_pad)
_CONV_PAD = [
    (8, 128),     # conv1
    (128, 128),   # conv2
    (128, 128),   # conv3
    (128, 256),   # conv4
    (256, 128),   # conv5
    (128, 128),   # conv6
    (128, 512),   # conv7
]
_CONV1_KPAD = 512   # 7*7*8 = 392 -> 512 (lane / bf16-sublane aligned)


def init_params(key, num_classes=100):
    """PyTorch-layout parameters (same shapes as the nn.Module)."""
    conv_params = []
    for (cout, cin, kh, kw, _, _) in _CONV_CFG:
        key, kw_key, kb_key = jax.random.split(key, 3)
        fan_in = cin * kh * kw
        w = jax.random.normal(kw_key, (cout, cin, kh, kw), jnp.float32) * np.sqrt(2.0 / fan_in)
        b = jax.random.normal(kb_key, (cout,), jnp.float32) * 0.01
        conv_params.append((w, b))
    key, kw_key, kb_key = jax.random.split(key, 3)
    fc_w = jax.random.normal(kw_key, (num_classes, 512), jnp.float32) * np.sqrt(1.0 / 512.0)
    fc_b = jax.random.normal(kb_key, (num_classes,), jnp.float32) * 0.01
    return conv_params, (fc_w, fc_b)


def prepare_params(conv_params, fc_params):
    """One-time prep: reorder, zero-pad channels, cast bf16.
    conv1 -> (K_pad, Cout) im2col weight, 1x1 -> (Cin, Cout), 3x3 -> (9, Cin, Cout)."""
    ws, bs = [], []
    for idx, ((w, b), (cin_p, cout_p)) in enumerate(zip(conv_params, _CONV_PAD)):
        cout, cin, kh, kw = w.shape
        wt = jnp.transpose(w, (2, 3, 1, 0))                       # (kh, kw, cin, cout)
        wt = jnp.pad(wt, ((0, 0), (0, 0), (0, cin_p - cin), (0, cout_p - cout)))
        if kh == 1:
            wt = wt.reshape(cin_p, cout_p)
        elif idx == 0:
            wt = wt.reshape(kh * kw * cin_p, cout_p)
            wt = jnp.pad(wt, ((0, _CONV1_KPAD - wt.shape[0]), (0, 0)))
        else:
            wt = wt.reshape(kh * kw, cin_p, cout_p)
        ws.append(wt.astype(jnp.bfloat16))
        bs.append(jnp.pad(b, (0, cout_p - cout)).reshape(1, cout_p).astype(jnp.float32))
    fc_w, fc_b = fc_params
    nc = fc_w.shape[0]
    nc_p = _round_up(nc, 128)
    wf = jnp.pad(fc_w.T, ((0, 0), (0, nc_p - nc))).astype(jnp.bfloat16)       # (512, 128)
    bf = jnp.pad(fc_b, (0, nc_p - nc)).reshape(1, nc_p).astype(jnp.float32)
    return tuple(ws), tuple(bs), wf, bf


def simplenet_forward(x_nchw, prepared, num_classes=100):
    ws, bs, wf, bf = prepared
    N, Cin, H, W = x_nchw.shape

    # NCHW -> NHWC, bf16 activations, Cin 3 -> 8 (zero channels)
    x = jnp.transpose(x_nchw, (0, 2, 3, 1)).astype(jnp.bfloat16)
    x = jnp.pad(x, ((0, 0), (0, 0), (0, 0), (0, _CONV_PAD[0][0] - Cin)))

    # conv1: 7x7 / s2 / p3 (+ bias + ReLU) via im2col, K padded to 512
    cols, H1, W1 = _im2col(x, 7, 7, 2, 3)
    cols = jnp.pad(cols, ((0, 0), (0, ws[0].shape[0] - cols.shape[1])))
    y = matmul_bias_relu(cols, ws[0], bs[0]).reshape(N, H1, W1, -1)

    y = maxpool_3x3_s2_p1(y)                     # post-ReLU input => zero pad exact

    # conv2 (1x1) + conv3 (3x3) + conv4 (1x1), fused; 3x3 halo built in VMEM
    y = conv234_block(y, ws[1], bs[1], ws[2], bs[2], ws[3], bs[3])

    y = maxpool_3x3_s2_p1(y)                     # post-ReLU input => zero pad exact

    # conv5 + conv6 + conv7 + AdaptiveAvgPool2d((1,1)) + fc, fused head
    logits_pad = head_block(y, ws[4], bs[4], ws[5], bs[5], ws[6], bs[6], wf, bf)
    return logits_pad[:, :num_classes]


# --------------------------------- main --------------------------------------

if __name__ == "__main__":
    key = jax.random.PRNGKey(0)
    key, pkey, xkey = jax.random.split(key, 3)

    num_classes = 100
    conv_params, fc_params = init_params(pkey, num_classes=num_classes)
    prepared = prepare_params(conv_params, fc_params)   # one-time weight prep

    # small deterministic input consistent with SimpleNet (N, 3, H, W)
    x = jax.random.normal(xkey, (2, 3, 32, 32), jnp.float32)

    fwd = jax.jit(simplenet_forward, static_argnames=("num_classes",))
    logits = jax.block_until_ready(fwd(x, prepared, num_classes=num_classes))

    assert logits.shape == (2, num_classes), logits.shape
    assert bool(jnp.all(jnp.isfinite(logits)))
    print("KERNEL_OK")
</pallas_src>

<mosaic_0001>
module attributes {stable_mosaic.version = 11 : i64} {
  func.func @_mm_kernel(%arg0: i32, %arg1: memref<256x512xbf16, #tpu.memory_space<vmem>>, %arg2: memref<512x128xbf16, #tpu.memory_space<vmem>>, %arg3: memref<1x128xf32, #tpu.memory_space<vmem>>, %arg4: memref<256x128xbf16, #tpu.memory_space<vmem>>) attributes {dimension_semantics = [#tpu.dimension_semantics<parallel>], iteration_bounds = array<i64: 2>, scalar_prefetch = 0 : i64, scratch_operands = 0 : i64, tpu.core_type = #tpu.core_type<tc>, window_params = [{transform_indices = @transform_0, window_bounds = array<i64: 256, 512>}, {pipeline_mode = #tpu.pipeline_mode<synchronous>, transform_indices = @transform_1, window_bounds = array<i64: 512, 128>}, {pipeline_mode = #tpu.pipeline_mode<synchronous>, transform_indices = @transform_2, window_bounds = array<i64: 1, 128>}, {transform_indices = @transform_3, window_bounds = array<i64: 256, 128>}]} {
    %c0 = arith.constant 0 : index
    %c0_0 = arith.constant 0 : index
    %0 = vector.load %arg1[%c0, %c0_0] : memref<256x512xbf16, #tpu.memory_space<vmem>>, vector<256x512xbf16>
    %c0_1 = arith.constant 0 : index
    %c0_2 = arith.constant 0 : index
    %1 = vector.load %arg2[%c0_1, %c0_2] : memref<512x128xbf16, #tpu.memory_space<vmem>>, vector<512x128xbf16>
    %cst = arith.constant dense<0.000000e+00> : vector<256x128xf32>
    %2 = tpu.matmul %0, %1, %cst {dimension_numbers = #tpu.dot_dimension_numbers<[1], [0], [0], [1], [0, 0, 1, 1], [], []>} : vector<256x512xbf16>, vector<512x128xbf16>, vector<256x128xf32> -> vector<256x128xf32>
    %c0_3 = arith.constant 0 : index
    %c0_4 = arith.constant 0 : index
    %3 = vector.load %arg3[%c0_3, %c0_4] : memref<1x128xf32, #tpu.memory_space<vmem>>, vector<1x128xf32>
    %4 = vector.broadcast %3 : vector<1x128xf32> to vector<256x128xf32>
    %5 = arith.addf %2, %4 : vector<256x128xf32>
    %cst_5 = arith.constant 0.000000e+00 : f32
    %6 = vector.broadcast %cst_5 : f32 to vector<256x128xf32>
    %7 = arith.maximumf %5, %6 : vector<256x128xf32>
    %8 = arith.truncf %7 : vector<256x128xf32> to vector<256x128xbf16>
    %c0_6 = arith.constant 0 : index
    %c0_7 = arith.constant 0 : index
    %9 = vector.load %arg4[%c0_6, %c0_7] : memref<256x128xbf16, #tpu.memory_space<vmem>>, vector<256x128xbf16>
    tpu.vector_store %arg4[%c0_6, %c0_7], %8 {strides = array<i32>} : memref<256x128xbf16, #tpu.memory_space<vmem>>, vector<256x128xbf16>,
    return
  }
  func.func @transform_0(%arg0: i32) -> (i32, i32) {
    %c0_i32 = arith.constant 0 : i32
    %c0_i32_0 = arith.constant 0 : i32
    return %arg0, %c0_i32 : i32, i32
  }
  func.func @transform_1(%arg0: i32) -> (i32, i32) {
    %c0_i32 = arith.constant 0 : i32
    %c0_i32_0 = arith.constant 0 : i32
    %c0_i32_1 = arith.constant 0 : i32
    return %c0_i32, %c0_i32_0 : i32, i32
  }
  func.func @transform_2(%arg0: i32) -> (i32, i32) {
    %c0_i32 = arith.constant 0 : i32
    %c0_i32_0 = arith.constant 0 : i32
    %c0_i32_1 = arith.constant 0 : i32
    return %c0_i32, %c0_i32_0 : i32, i32
  }
  func.func @transform_3(%arg0: i32) -> (i32, i32) {
    %c0_i32 = arith.constant 0 : i32
    %c0_i32_0 = arith.constant 0 : i32
    return %arg0, %c0_i32 : i32, i32
  }
}

module attributes {stable_mosaic.version = 11 : i64} {
  func.func @_stage2_kernel(%arg0: i32, %arg1: memref<1x8x8x128xbf16, #tpu.memory_space<vmem>>, %arg2: memref<128x128xbf16, #tpu.memory_space<vmem>>, %arg3: memref<1x128xf32, #tpu.memory_space<vmem>>, %arg4: memref<9x128x128xbf16, #tpu.memory_space<vmem>>, %arg5: memref<1x128xf32, #tpu.memory_space<vmem>>, %arg6: memref<128x256xbf16, #tpu.memory_space<vmem>>, %arg7: memref<1x256xf32, #tpu.memory_space<vmem>>, %arg8: memref<1x8x8x256xbf16, #tpu.memory_space<vmem>>, %arg9: memref<1x10x10x128xbf16, #tpu.memory_space<vmem>>) attributes {dimension_semantics = [#tpu.dimension_semantics<parallel>], iteration_bounds = array<i64: 2>, scalar_prefetch = 0 : i64, scratch_operands = 1 : i64, tpu.core_type = #tpu.core_type<tc>, window_params = [{transform_indices = @transform_0, window_bounds = array<i64: 1, 8, 8, 128>}, {pipeline_mode = #tpu.pipeline_mode<synchronous>, transform_indices = @transform_1, window_bounds = array<i64: 128, 128>}, {pipeline_mode = #tpu.pipeline_mode<synchronous>, transform_indices = @transform_2, window_bounds = array<i64: 1, 128>}, {pipeline_mode = #tpu.pipeline_mode<synchronous>, transform_indices = @transform_3, window_bounds = array<i64: 9, 128, 128>}, {pipeline_mode = #tpu.pipeline_mode<synchronous>, transform_indices = @transform_4, window_bounds = array<i64: 1, 128>}, {pipeline_mode = #tpu.pipeline_mode<synchronous>, transform_indices = @transform_5, window_bounds = array<i64: 128, 256>}, {pipeline_mode = #tpu.pipeline_mode<synchronous>, transform_indices = @transform_6, window_bounds = array<i64: 1, 256>}, {transform_indices = @transform_7, window_bounds = array<i64: 1, 8, 8, 256>}]} {
    %c0 = arith.constant 0 : index
    %c0_0 = arith.constant 0 : index
    %c0_1 = arith.constant 0 : index
    %c0_2 = arith.constant 0 : index
    %0 = vector.load %arg1[%c0, %c0_0, %c0_1, %c0_2] : memref<1x8x8x128xbf16, #tpu.memory_space<vmem>>, vector<1x8x8x128xbf16>
    %1 = vector.shape_cast %0 : vector<1x8x8x128xbf16> to vector<64x128xbf16>
    %c0_3 = arith.constant 0 : index
    %c0_4 = arith.constant 0 : index
    %2 = vector.load %arg2[%c0_3, %c0_4] : memref<128x128xbf16, #tpu.memory_space<vmem>>, vector<128x128xbf16>
    %cst = arith.constant dense<0.000000e+00> : vector<64x128xf32>
    %3 = tpu.matmul %1, %2, %cst {dimension_numbers = #tpu.dot_dimension_numbers<[1], [0], [0], [1], [0, 0, 1, 1], [], []>} : vector<64x128xbf16>, vector<128x128xbf16>, vector<64x128xf32> -> vector<64x128xf32>
    %c0_5 = arith.constant 0 : index
    %c0_6 = arith.constant 0 : index
    %4 = vector.load %arg3[%c0_5, %c0_6] : memref<1x128xf32, #tpu.memory_space<vmem>>, vector<1x128xf32>
    %5 = vector.broadcast %4 : vector<1x128xf32> to vector<64x128xf32>
    %6 = arith.addf %3, %5 : vector<64x128xf32>
    %cst_7 = arith.constant 0.000000e+00 : f32
    %7 = vector.broadcast %cst_7 : f32 to vector<64x128xf32>
    %8 = arith.maximumf %6, %7 : vector<64x128xf32>
    %9 = arith.truncf %8 : vector<64x128xf32> to vector<64x128xbf16>
    %cst_8 = arith.constant 0.000000e+00 : bf16
    %10 = vector.broadcast %cst_8 : bf16 to vector<1x10x10x128xbf16>
    %c0_9 = arith.constant 0 : index
    %c0_10 = arith.constant 0 : index
    %c0_11 = arith.constant 0 : index
    %c0_12 = arith.constant 0 : index
    %11 = vector.load %arg9[%c0_9, %c0_10, %c0_11, %c0_12] : memref<1x10x10x128xbf16, #tpu.memory_space<vmem>>, vector<1x10x10x128xbf16>
    tpu.vector_store %arg9[%c0_9, %c0_10, %c0_11, %c0_12], %10 {strides = array<i32>} : memref<1x10x10x128xbf16, #tpu.memory_space<vmem>>, vector<1x10x10x128xbf16>,
    %12 = vector.shape_cast %9 : vector<64x128xbf16> to vector<1x8x8x128xbf16>
    %c0_13 = arith.constant 0 : index
    %c1 = arith.constant 1 : index
    %c1_14 = arith.constant 1 : index
    %c0_15 = arith.constant 0 : index
    %13 = vector.load %arg9[%c0_13, %c1, %c1_14, %c0_15] : memref<1x10x10x128xbf16, #tpu.memory_space<vmem>>, vector<1x8x8x128xbf16>
    tpu.vector_store %arg9[%c0_13, %c1, %c1_14, %c0_15], %12 {strides = array<i32>} : memref<1x10x10x128xbf16, #tpu.memory_space<vmem>>, vector<1x8x8x128xbf16>,
    %cst_16 = arith.constant 0.000000e+00 : f32
    %14 = vector.broadcast %cst_16 : f32 to vector<64x128xf32>
    %c0_17 = arith.constant 0 : index
    %c0_18 = arith.constant 0 : index
    %15 = vector.load %arg5[%c0_17, %c0_18] : memref<1x128xf32, #tpu.memory_space<vmem>>, vector<1x128xf32>
    %16 = vector.broadcast %15 : vector<1x128xf32> to vector<64x128xf32>
    %17 = arith.addf %14, %16 : vector<64x128xf32>
    %c0_19 = arith.constant 0 : index
    %c0_20 = arith.constant 0 : index
    %c0_21 = arith.constant 0 : index
    %c0_22 = arith.constant 0 : index
    %18 = vector.load %arg9[%c0_19, %c0_20, %c0_21, %c0_22] : memref<1x10x10x128xbf16, #tpu.memory_space<vmem>>, vector<1x8x8x128xbf16>
    %19 = vector.shape_cast %18 : vector<1x8x8x128xbf16> to vector<64x128xbf16>
    %c0_23 = arith.constant 0 : index
    %c0_24 = arith.constant 0 : index
    %c0_25 = arith.constant 0 : index
    %20 = vector.load %arg4[%c0_23, %c0_24, %c0_25] : memref<9x128x128xbf16, #tpu.memory_space<vmem>>, vector<1x128x128xbf16>
    %21 = vector.shape_cast %20 : vector<1x128x128xbf16> to vector<128x128xbf16>
    %cst_26 = arith.constant dense<0.000000e+00> : vector<64x128xf32>
    %22 = tpu.matmul %19, %21, %cst_26 {dimension_numbers = #tpu.dot_dimension_numbers<[1], [0], [0], [1], [0, 0, 1, 1], [], []>} : vector<64x128xbf16>, vector<128x128xbf16>, vector<64x128xf32> -> vector<64x128xf32>
    %23 = arith.addf %17, %22 : vector<64x128xf32>
    %c0_27 = arith.constant 0 : index
    %c0_28 = arith.constant 0 : index
    %c1_29 = arith.constant 1 : index
    %c0_30 = arith.constant 0 : index
    %24 = vector.load %arg9[%c0_27, %c0_28, %c1_29, %c0_30] : memref<1x10x10x128xbf16, #tpu.memory_space<vmem>>, vector<1x8x8x128xbf16>
    %25 = vector.shape_cast %24 : vector<1x8x8x128xbf16> to vector<64x128xbf16>
    %c1_31 = arith.constant 1 : index
    %c0_32 = arith.constant 0 : index
    %c0_33 = arith.constant 0 : index
    %26 = vector.load %arg4[%c1_31, %c0_32, %c0_33] : memref<9x128x128xbf16, #tpu.memory_space<vmem>>, vector<1x128x128xbf16>
    %27 = vector.shape_cast %26 : vector<1x128x128xbf16> to vector<128x128xbf16>
    %cst_34 = arith.constant dense<0.000000e+00> : vector<64x128xf32>
    %28 = tpu.matmul %25, %27, %cst_34 {dimension_numbers = #tpu.dot_dimension_numbers<[1], [0], [0], [1], [0, 0, 1, 1], [], []>} : vector<64x128xbf16>, vector<128x128xbf16>, vector<64x128xf32> -> vector<64x128xf32>
    %29 = arith.addf %23, %28 : vector<64x128xf32>
    %c0_35 = arith.constant 0 : index
    %c0_36 = arith.constant 0 : index
    %c2 = arith.constant 2 : index
    %c0_37 = arith.constant 0 : index
    %30 = vector.load %arg9[%c0_35, %c0_36, %c2, %c0_37] : memref<1x10x10x128xbf16, #tpu.memory_space<vmem>>, vector<1x8x8x128xbf16>
    %31 = vector.shape_cast %30 : vector<1x8x8x128xbf16> to vector<64x128xbf16>
    %c2_38 = arith.constant 2 : index
    %c0_39 = arith.constant 0 : index
    %c0_40 = arith.constant 0 : index
    %32 = vector.load %arg4[%c2_38, %c0_39, %c0_40] : memref<9x128x128xbf16, #tpu.memory_space<vmem>>, vector<1x128x128xbf16>
    %33 = vector.shape_cast %32 : vector<1x128x128xbf16> to vector<128x128xbf16>
    %cst_41 = arith.constant dense<0.000000e+00> : vector<64x128xf32>
    %34 = tpu.matmul %31, %33, %cst_41 {dimension_numbers = #tpu.dot_dimension_numbers<[1], [0], [0], [1], [0, 0, 1, 1], [], []>} : vector<64x128xbf16>, vector<128x128xbf16>, vector<64x128xf32> -> vector<64x128xf32>
    %35 = arith.addf %29, %34 : vector<64x128xf32>
    %c0_42 = arith.constant 0 : index
    %c1_43 = arith.constant 1 : index
    %c0_44 = arith.constant 0 : index
    %c0_45 = arith.constant 0 : index
    %36 = vector.load %arg9[%c0_42, %c1_43, %c0_44, %c0_45] : memref<1x10x10x128xbf16, #tpu.memory_space<vmem>>, vector<1x8x8x128xbf16>
    %37 = vector.shape_cast %36 : vector<1x8x8x128xbf16> to vector<64x128xbf16>
    %c3 = arith.constant 3 : index
    %c0_46 = arith.constant 0 : index
    %c0_47 = arith.constant 0 : index
    %38 = vector.load %arg4[%c3, %c0_46, %c0_47] : memref<9x128x128xbf16, #tpu.memory_space<vmem>>, vector<1x128x128xbf16>
    %39 = vector.shape_cast %38 : vector<1x128x128xbf16> to vector<128x128xbf16>
    %cst_48 = arith.constant dense<0.000000e+00> : vector<64x128xf32>
    %40 = tpu.matmul %37, %39, %cst_48 {dimension_numbers = #tpu.dot_dimension_numbers<[1], [0], [0], [1], [0, 0, 1, 1], [], []>} : vector<64x128xbf16>, vector<128x128xbf16>, vector<64x128xf32> -> vector<64x128xf32>
    %41 = arith.addf %35, %40 : vector<64x128xf32>
    %c0_49 = arith.constant 0 : index
    %c1_50 = arith.constant 1 : index
    %c1_51 = arith.constant 1 : index
    %c0_52 = arith.constant 0 : index
    %42 = vector.load %arg9[%c0_49, %c1_50, %c1_51, %c0_52] : memref<1x10x10x128xbf16, #tpu.memory_space<vmem>>, vector<1x8x8x128xbf16>
    %43 = vector.shape_cast %42 : vector<1x8x8x128xbf16> to vector<64x128xbf16>
    %c4 = arith.constant 4 : index
    %c0_53 = arith.constant 0 : index
    %c0_54 = arith.constant 0 : index
    %44 = vector.load %arg4[%c4, %c0_53, %c0_54] : memref<9x128x128xbf16, #tpu.memory_space<vmem>>, vector<1x128x128xbf16>
    %45 = vector.shape_cast %44 : vector<1x128x128xbf16> to vector<128x128xbf16>
    %cst_55 = arith.constant dense<0.000000e+00> : vector<64x128xf32>
    %46 = tpu.matmul %43, %45, %cst_55 {dimension_numbers = #tpu.dot_dimension_numbers<[1], [0], [0], [1], [0, 0, 1, 1], [], []>} : vector<64x128xbf16>, vector<128x128xbf16>, vector<64x128xf32> -> vector<64x128xf32>
    %47 = arith.addf %41, %46 : vector<64x128xf32>
    %c0_56 = arith.constant 0 : index
    %c1_57 = arith.constant 1 : index
    %c2_58 = arith.constant 2 : index
    %c0_59 = arith.constant 0 : index
    %48 = vector.load %arg9[%c0_56, %c1_57, %c2_58, %c0_59] : memref<1x10x10x128xbf16, #tpu.memory_space<vmem>>, vector<1x8x8x128xbf16>
    %49 = vector.shape_cast %48 : vector<1x8x8x128xbf16> to vector<64x128xbf16>
    %c5 = arith.constant 5 : index
    %c0_60 = arith.constant 0 : index
    %c0_61 = arith.constant 0 : index
    %50 = vector.load %arg4[%c5, %c0_60, %c0_61] : memref<9x128x128xbf16, #tpu.memory_space<vmem>>, vector<1x128x128xbf16>
    %51 = vector.shape_cast %50 : vector<1x128x128xbf16> to vector<128x128xbf16>
    %cst_62 = arith.constant dense<0.000000e+00> : vector<64x128xf32>
    %52 = tpu.matmul %49, %51, %cst_62 {dimension_numbers = #tpu.dot_dimension_numbers<[1], [0], [0], [1], [0, 0, 1, 1], [], []>} : vector<64x128xbf16>, vector<128x128xbf16>, vector<64x128xf32> -> vector<64x128xf32>
    %53 = arith.addf %47, %52 : vector<64x128xf32>
    %c0_63 = arith.constant 0 : index
    %c2_64 = arith.constant 2 : index
    %c0_65 = arith.constant 0 : index
    %c0_66 = arith.constant 0 : index
    %54 = vector.load %arg9[%c0_63, %c2_64, %c0_65, %c0_66] : memref<1x10x10x128xbf16, #tpu.memory_space<vmem>>, vector<1x8x8x128xbf16>
    %55 = vector.shape_cast %54 : vector<1x8x8x128xbf16> to vector<64x128xbf16>
    %c6 = arith.constant 6 : index
    %c0_67 = arith.constant 0 : index
    %c0_68 = arith.constant 0 : index
    %56 = vector.load %arg4[%c6, %c0_67, %c0_68] : memref<9x128x128xbf16, #tpu.memory_space<vmem>>, vector<1x128x128xbf16>
    %57 = vector.shape_cast %56 : vector<1x128x128xbf16> to vector<128x128xbf16>
    %cst_69 = arith.constant dense<0.000000e+00> : vector<64x128xf32>
    %58 = tpu.matmul %55, %57, %cst_69 {dimension_numbers = #tpu.dot_dimension_numbers<[1], [0], [0], [1], [0, 0, 1, 1], [], []>} : vector<64x128xbf16>, vector<128x128xbf16>, vector<64x128xf32> -> vector<64x128xf32>
    %59 = arith.addf %53, %58 : vector<64x128xf32>
    %c0_70 = arith.constant 0 : index
    %c2_71 = arith.constant 2 : index
    %c1_72 = arith.constant 1 : index
    %c0_73 = arith.constant 0 : index
    %60 = vector.load %arg9[%c0_70, %c2_71, %c1_72, %c0_73] : memref<1x10x10x128xbf16, #tpu.memory_space<vmem>>, vector<1x8x8x128xbf16>
    %61 = vector.shape_cast %60 : vector<1x8x8x128xbf16> to vector<64x128xbf16>
    %c7 = arith.constant 7 : index
    %c0_74 = arith.constant 0 : index
    %c0_75 = arith.constant 0 : index
    %62 = vector.load %arg4[%c7, %c0_74, %c0_75] : memref<9x128x128xbf16, #tpu.memory_space<vmem>>, vector<1x128x128xbf16>
    %63 = vector.shape_cast %62 : vector<1x128x128xbf16> to vector<128x128xbf16>
    %cst_76 = arith.constant dense<0.000000e+00> : vector<64x128xf32>
    %64 = tpu.matmul %61, %63, %cst_76 {dimension_numbers = #tpu.dot_dimension_numbers<[1], [0], [0], [1], [0, 0, 1, 1], [], []>} : vector<64x128xbf16>, vector<128x128xbf16>, vector<64x128xf32> -> vector<64x128xf32>
    %65 = arith.addf %59, %64 : vector<64x128xf32>
    %c0_77 = arith.constant 0 : index
    %c2_78 = arith.constant 2 : index
    %c2_79 = arith.constant 2 : index
    %c0_80 = arith.constant 0 : index
    %66 = vector.load %arg9[%c0_77, %c2_78, %c2_79, %c0_80] : memref<1x10x10x128xbf16, #tpu.memory_space<vmem>>, vector<1x8x8x128xbf16>
    %67 = vector.shape_cast %66 : vector<1x8x8x128xbf16> to vector<64x128xbf16>
    %c8 = arith.constant 8 : index
    %c0_81 = arith.constant 0 : index
    %c0_82 = arith.constant 0 : index
    %68 = vector.load %arg4[%c8, %c0_81, %c0_82] : memref<9x128x128xbf16, #tpu.memory_space<vmem>>, vector<1x128x128xbf16>
    %69 = vector.shape_cast %68 : vector<1x128x128xbf16> to vector<128x128xbf16>
    %cst_83 = arith.constant dense<0.000000e+00> : vector<64x128xf32>
    %70 = tpu.matmul %67, %69, %cst_83 {dimension_numbers = #tpu.dot_dimension_numbers<[1], [0], [0], [1], [0, 0, 1, 1], [], []>} : vector<64x128xbf16>, vector<128x128xbf16>, vector<64x128xf32> -> vector<64x128xf32>
    %71 = arith.addf %65, %70 : vector<64x128xf32>
    %cst_84 = arith.constant 0.000000e+00 : f32
    %72 = vector.broadcast %cst_84 : f32 to vector<64x128xf32>
    %73 = arith.maximumf %71, %72 : vector<64x128xf32>
    %74 = arith.truncf %73 : vector<64x128xf32> to vector<64x128xbf16>
    %c0_85 = arith.constant 0 : index
    %c0_86 = arith.constant 0 : index
    %75 = vector.load %arg6[%c0_85, %c0_86] : memref<128x256xbf16, #tpu.memory_space<vmem>>, vector<128x256xbf16>
    %cst_87 = arith.constant dense<0.000000e+00> : vector<64x256xf32>
    %76 = tpu.matmul %74, %75, %cst_87 {dimension_numbers = #tpu.dot_dimension_numbers<[1], [0], [0], [1], [0, 0, 1, 1], [], []>} : vector<64x128xbf16>, vector<128x256xbf16>, vector<64x256xf32> -> vector<64x256xf32>
    %c0_88 = arith.constant 0 : index
    %c0_89 = arith.constant 0 : index
    %77 = vector.load %arg7[%c0_88, %c0_89] : memref<1x256xf32, #tpu.memory_space<vmem>>, vector<1x256xf32>
    %78 = vector.broadcast %77 : vector<1x256xf32> to vector<64x256xf32>
    %79 = arith.addf %76, %78 : vector<64x256xf32>
    %cst_90 = arith.constant 0.000000e+00 : f32
    %80 = vector.broadcast %cst_90 : f32 to vector<64x256xf32>
    %81 = arith.maximumf %79, %80 : vector<64x256xf32>
    %82 = arith.truncf %81 : vector<64x256xf32> to vector<64x256xbf16>
    %83 = vector.shape_cast %82 : vector<64x256xbf16> to vector<1x8x8x256xbf16>
    %c0_91 = arith.constant 0 : index
    %c0_92 = arith.constant 0 : index
    %c0_93 = arith.constant 0 : index
    %c0_94 = arith.constant 0 : index
    %84 = vector.load %arg8[%c0_91, %c0_92, %c0_93, %c0_94] : memref<1x8x8x256xbf16, #tpu.memory_space<vmem>>, vector<1x8x8x256xbf16>
    tpu.vector_store %arg8[%c0_91, %c0_92, %c0_93, %c0_94], %83 {strides = array<i32>} : memref<1x8x8x256xbf16, #tpu.memory_space<vmem>>, vector<1x8x8x256xbf16>,
    return
  }
  func.func @transform_0(%arg0: i32) -> (i32, i32, i32, i32) {
    %c0_i32 = arith.constant 0 : i32
    %c0_i32_0 = arith.constant 0 : i32
    %c0_i32_1 = arith.constant 0 : i32
    %c0_i32_2 = arith.constant 0 : i32
    return %arg0, %c0_i32, %c0_i32_0, %c0_i32_1 : i32, i32, i32, i32
  }
  func.func @transform_1(%arg0: i32) -> (i32, i32) {
    %c0_i32 = arith.constant 0 : i32
    %c0_i32_0 = arith.constant 0 : i32
    %c0_i32_1 = arith.constant 0 : i32
    return %c0_i32, %c0_i32_0 : i32, i32
  }
  func.func @transform_2(%arg0: i32) -> (i32, i32) {
    %c0_i32 = arith.constant 0 : i32
    %c0_i32_0 = arith.constant 0 : i32
    %c0_i32_1 = arith.constant 0 : i32
    return %c0_i32, %c0_i32_0 : i32, i32
  }
  func.func @transform_3(%arg0: i32) -> (i32, i32, i32) {
    %c0_i32 = arith.constant 0 : i32
    %c0_i32_0 = arith.constant 0 : i32
    %c0_i32_1 = arith.constant 0 : i32
    %c0_i32_2 = arith.constant 0 : i32
    return %c0_i32, %c0_i32_0, %c0_i32_1 : i32, i32, i32
  }
  func.func @transform_4(%arg0: i32) -> (i32, i32) {
    %c0_i32 = arith.constant 0 : i32
    %c0_i32_0 = arith.constant 0 : i32
    %c0_i32_1 = arith.constant 0 : i32
    return %c0_i32, %c0_i32_0 : i32, i32
  }
  func.func @transform_5(%arg0: i32) -> (i32, i32) {
    %c0_i32 = arith.constant 0 : i32
    %c0_i32_0 = arith.constant 0 : i32
    %c0_i32_1 = arith.constant 0 : i32
    return %c0_i32, %c0_i32_0 : i32, i32
  }
  func.func @transform_6(%arg0: i32) -> (i32, i32) {
    %c0_i32 = arith.constant 0 : i32
    %c0_i32_0 = arith.constant 0 : i32
    %c0_i32_1 = arith.constant 0 : i32
    return %c0_i32, %c0_i32_0 : i32, i32
  }
  func.func @transform_7(%arg0: i32) -> (i32, i32, i32, i32) {
    %c0_i32 = arith.constant 0 : i32
    %c0_i32_0 = arith.constant 0 : i32
    %c0_i32_1 = arith.constant 0 : i32
    %c0_i32_2 = arith.constant 0 : i32
    return %arg0, %c0_i32, %c0_i32_0, %c0_i32_1 : i32, i32, i32, i32
  }
}

module attributes {stable_mosaic.version = 11 : i64} {
  func.func @_head_kernel(%arg0: i32, %arg1: memref<1x4x4x256xbf16, #tpu.memory_space<vmem>>, %arg2: memref<256x128xbf16, #tpu.memory_space<vmem>>, %arg3: memref<1x128xf32, #tpu.memory_space<vmem>>, %arg4: memref<9x128x128xbf16, #tpu.memory_space<vmem>>, %arg5: memref<1x128xf32, #tpu.memory_space<vmem>>, %arg6: memref<128x512xbf16, #tpu.memory_space<vmem>>, %arg7: memref<1x512xf32, #tpu.memory_space<vmem>>, %arg8: memref<512x128xbf16, #tpu.memory_space<vmem>>, %arg9: memref<1x128xf32, #tpu.memory_space<vmem>>, %arg10: memref<1x1x128xf32, #tpu.memory_space<vmem>>, %arg11: memref<1x6x6x128xbf16, #tpu.memory_space<vmem>>) attributes {dimension_semantics = [#tpu.dimension_semantics<parallel>], iteration_bounds = array<i64: 2>, scalar_prefetch = 0 : i64, scratch_operands = 1 : i64, tpu.core_type = #tpu.core_type<tc>, window_params = [{transform_indices = @transform_0, window_bounds = array<i64: 1, 4, 4, 256>}, {pipeline_mode = #tpu.pipeline_mode<synchronous>, transform_indices = @transform_1, window_bounds = array<i64: 256, 128>}, {pipeline_mode = #tpu.pipeline_mode<synchronous>, transform_indices = @transform_2, window_bounds = array<i64: 1, 128>}, {pipeline_mode = #tpu.pipeline_mode<synchronous>, transform_indices = @transform_3, window_bounds = array<i64: 9, 128, 128>}, {pipeline_mode = #tpu.pipeline_mode<synchronous>, transform_indices = @transform_4, window_bounds = array<i64: 1, 128>}, {pipeline_mode = #tpu.pipeline_mode<synchronous>, transform_indices = @transform_5, window_bounds = array<i64: 128, 512>}, {pipeline_mode = #tpu.pipeline_mode<synchronous>, transform_indices = @transform_6, window_bounds = array<i64: 1, 512>}, {pipeline_mode = #tpu.pipeline_mode<synchronous>, transform_indices = @transform_7, window_bounds = array<i64: 512, 128>}, {pipeline_mode = #tpu.pipeline_mode<synchronous>, transform_indices = @transform_8, window_bounds = array<i64: 1, 128>}, {transform_indices = @transform_9, window_bounds = array<i64: 1, 1, 128>}]} {
    %c0 = arith.constant 0 : index
    %c0_0 = arith.constant 0 : index
    %c0_1 = arith.constant 0 : index
    %c0_2 = arith.constant 0 : index
    %0 = vector.load %arg1[%c0, %c0_0, %c0_1, %c0_2] : memref<1x4x4x256xbf16, #tpu.memory_space<vmem>>, vector<1x4x4x256xbf16>
    %1 = vector.shape_cast %0 : vector<1x4x4x256xbf16> to vector<16x256xbf16>
    %c0_3 = arith.constant 0 : index
    %c0_4 = arith.constant 0 : index
    %2 = vector.load %arg2[%c0_3, %c0_4] : memref<256x128xbf16, #tpu.memory_space<vmem>>, vector<256x128xbf16>
    %cst = arith.constant dense<0.000000e+00> : vector<16x128xf32>
    %3 = tpu.matmul %1, %2, %cst {dimension_numbers = #tpu.dot_dimension_numbers<[1], [0], [0], [1], [0, 0, 1, 1], [], []>} : vector<16x256xbf16>, vector<256x128xbf16>, vector<16x128xf32> -> vector<16x128xf32>
    %c0_5 = arith.constant 0 : index
    %c0_6 = arith.constant 0 : index
    %4 = vector.load %arg3[%c0_5, %c0_6] : memref<1x128xf32, #tpu.memory_space<vmem>>, vector<1x128xf32>
    %5 = vector.broadcast %4 : vector<1x128xf32> to vector<16x128xf32>
    %6 = arith.addf %3, %5 : vector<16x128xf32>
    %cst_7 = arith.constant 0.000000e+00 : f32
    %7 = vector.broadcast %cst_7 : f32 to vector<16x128xf32>
    %8 = arith.maximumf %6, %7 : vector<16x128xf32>
    %9 = arith.truncf %8 : vector<16x128xf32> to vector<16x128xbf16>
    %cst_8 = arith.constant 0.000000e+00 : bf16
    %10 = vector.broadcast %cst_8 : bf16 to vector<1x6x6x128xbf16>
    %c0_9 = arith.constant 0 : index
    %c0_10 = arith.constant 0 : index
    %c0_11 = arith.constant 0 : index
    %c0_12 = arith.constant 0 : index
    %11 = vector.load %arg11[%c0_9, %c0_10, %c0_11, %c0_12] : memref<1x6x6x128xbf16, #tpu.memory_space<vmem>>, vector<1x6x6x128xbf16>
    tpu.vector_store %arg11[%c0_9, %c0_10, %c0_11, %c0_12], %10 {strides = array<i32>} : memref<1x6x6x128xbf16, #tpu.memory_space<vmem>>, vector<1x6x6x128xbf16>,
    %12 = vector.shape_cast %9 : vector<16x128xbf16> to vector<1x4x4x128xbf16>
    %c0_13 = arith.constant 0 : index
    %c1 = arith.constant 1 : index
    %c1_14 = arith.constant 1 : index
    %c0_15 = arith.constant 0 : index
    %13 = vector.load %arg11[%c0_13, %c1, %c1_14, %c0_15] : memref<1x6x6x128xbf16, #tpu.memory_space<vmem>>, vector<1x4x4x128xbf16>
    tpu.vector_store %arg11[%c0_13, %c1, %c1_14, %c0_15], %12 {strides = array<i32>} : memref<1x6x6x128xbf16, #tpu.memory_space<vmem>>, vector<1x4x4x128xbf16>,
    %cst_16 = arith.constant 0.000000e+00 : f32
    %14 = vector.broadcast %cst_16 : f32 to vector<16x128xf32>
    %c0_17 = arith.constant 0 : index
    %c0_18 = arith.constant 0 : index
    %15 = vector.load %arg5[%c0_17, %c0_18] : memref<1x128xf32, #tpu.memory_space<vmem>>, vector<1x128xf32>
    %16 = vector.broadcast %15 : vector<1x128xf32> to vector<16x128xf32>
    %17 = arith.addf %14, %16 : vector<16x128xf32>
    %c0_19 = arith.constant 0 : index
    %c0_20 = arith.constant 0 : index
    %c0_21 = arith.constant 0 : index
    %c0_22 = arith.constant 0 : index
    %18 = vector.load %arg11[%c0_19, %c0_20, %c0_21, %c0_22] : memref<1x6x6x128xbf16, #tpu.memory_space<vmem>>, vector<1x4x4x128xbf16>
    %19 = vector.shape_cast %18 : vector<1x4x4x128xbf16> to vector<16x128xbf16>
    %c0_23 = arith.constant 0 : index
    %c0_24 = arith.constant 0 : index
    %c0_25 = arith.constant 0 : index
    %20 = vector.load %arg4[%c0_23, %c0_24, %c0_25] : memref<9x128x128xbf16, #tpu.memory_space<vmem>>, vector<1x128x128xbf16>
    %21 = vector.shape_cast %20 : vector<1x128x128xbf16> to vector<128x128xbf16>
    %cst_26 = arith.constant dense<0.000000e+00> : vector<16x128xf32>
    %22 = tpu.matmul %19, %21, %cst_26 {dimension_numbers = #tpu.dot_dimension_numbers<[1], [0], [0], [1], [0, 0, 1, 1], [], []>} : vector<16x128xbf16>, vector<128x128xbf16>, vector<16x128xf32> -> vector<16x128xf32>
    %23 = arith.addf %17, %22 : vector<16x128xf32>
    %c0_27 = arith.constant 0 : index
    %c0_28 = arith.constant 0 : index
    %c1_29 = arith.constant 1 : index
    %c0_30 = arith.constant 0 : index
    %24 = vector.load %arg11[%c0_27, %c0_28, %c1_29, %c0_30] : memref<1x6x6x128xbf16, #tpu.memory_space<vmem>>, vector<1x4x4x128xbf16>
    %25 = vector.shape_cast %24 : vector<1x4x4x128xbf16> to vector<16x128xbf16>
    %c1_31 = arith.constant 1 : index
    %c0_32 = arith.constant 0 : index
    %c0_33 = arith.constant 0 : index
    %26 = vector.load %arg4[%c1_31, %c0_32, %c0_33] : memref<9x128x128xbf16, #tpu.memory_space<vmem>>, vector<1x128x128xbf16>
    %27 = vector.shape_cast %26 : vector<1x128x128xbf16> to vector<128x128xbf16>
    %cst_34 = arith.constant dense<0.000000e+00> : vector<16x128xf32>
    %28 = tpu.matmul %25, %27, %cst_34 {dimension_numbers = #tpu.dot_dimension_numbers<[1], [0], [0], [1], [0, 0, 1, 1], [], []>} : vector<16x128xbf16>, vector<128x128xbf16>, vector<16x128xf32> -> vector<16x128xf32>
    %29 = arith.addf %23, %28 : vector<16x128xf32>
    %c0_35 = arith.constant 0 : index
    %c0_36 = arith.constant 0 : index
    %c2 = arith.constant 2 : index
    %c0_37 = arith.constant 0 : index
    %30 = vector.load %arg11[%c0_35, %c0_36, %c2, %c0_37] : memref<1x6x6x128xbf16, #tpu.memory_space<vmem>>, vector<1x4x4x128xbf16>
    %31 = vector.shape_cast %30 : vector<1x4x4x128xbf16> to vector<16x128xbf16>
    %c2_38 = arith.constant 2 : index
    %c0_39 = arith.constant 0 : index
    %c0_40 = arith.constant 0 : index
    %32 = vector.load %arg4[%c2_38, %c0_39, %c0_40] : memref<9x128x128xbf16, #tpu.memory_space<vmem>>, vector<1x128x128xbf16>
    %33 = vector.shape_cast %32 : vector<1x128x128xbf16> to vector<128x128xbf16>
    %cst_41 = arith.constant dense<0.000000e+00> : vector<16x128xf32>
    %34 = tpu.matmul %31, %33, %cst_41 {dimension_numbers = #tpu.dot_dimension_numbers<[1], [0], [0], [1], [0, 0, 1, 1], [], []>} : vector<16x128xbf16>, vector<128x128xbf16>, vector<16x128xf32> -> vector<16x128xf32>
    %35 = arith.addf %29, %34 : vector<16x128xf32>
    %c0_42 = arith.constant 0 : index
    %c1_43 = arith.constant 1 : index
    %c0_44 = arith.constant 0 : index
    %c0_45 = arith.constant 0 : index
    %36 = vector.load %arg11[%c0_42, %c1_43, %c0_44, %c0_45] : memref<1x6x6x128xbf16, #tpu.memory_space<vmem>>, vector<1x4x4x128xbf16>
    %37 = vector.shape_cast %36 : vector<1x4x4x128xbf16> to vector<16x128xbf16>
    %c3 = arith.constant 3 : index
    %c0_46 = arith.constant 0 : index
    %c0_47 = arith.constant 0 : index
    %38 = vector.load %arg4[%c3, %c0_46, %c0_47] : memref<9x128x128xbf16, #tpu.memory_space<vmem>>, vector<1x128x128xbf16>
    %39 = vector.shape_cast %38 : vector<1x128x128xbf16> to vector<128x128xbf16>
    %cst_48 = arith.constant dense<0.000000e+00> : vector<16x128xf32>
    %40 = tpu.matmul %37, %39, %cst_48 {dimension_numbers = #tpu.dot_dimension_numbers<[1], [0], [0], [1], [0, 0, 1, 1], [], []>} : vector<16x128xbf16>, vector<128x128xbf16>, vector<16x128xf32> -> vector<16x128xf32>
    %41 = arith.addf %35, %40 : vector<16x128xf32>
    %c0_49 = arith.constant 0 : index
    %c1_50 = arith.constant 1 : index
    %c1_51 = arith.constant 1 : index
    %c0_52 = arith.constant 0 : index
    %42 = vector.load %arg11[%c0_49, %c1_50, %c1_51, %c0_52] : memref<1x6x6x128xbf16, #tpu.memory_space<vmem>>, vector<1x4x4x128xbf16>
    %43 = vector.shape_cast %42 : vector<1x4x4x128xbf16> to vector<16x128xbf16>
    %c4 = arith.constant 4 : index
    %c0_53 = arith.constant 0 : index
    %c0_54 = arith.constant 0 : index
    %44 = vector.load %arg4[%c4, %c0_53, %c0_54] : memref<9x128x128xbf16, #tpu.memory_space<vmem>>, vector<1x128x128xbf16>
    %45 = vector.shape_cast %44 : vector<1x128x128xbf16> to vector<128x128xbf16>
    %cst_55 = arith.constant dense<0.000000e+00> : vector<16x128xf32>
    %46 = tpu.matmul %43, %45, %cst_55 {dimension_numbers = #tpu.dot_dimension_numbers<[1], [0], [0], [1], [0, 0, 1, 1], [], []>} : vector<16x128xbf16>, vector<128x128xbf16>, vector<16x128xf32> -> vector<16x128xf32>
    %47 = arith.addf %41, %46 : vector<16x128xf32>
    %c0_56 = arith.constant 0 : index
    %c1_57 = arith.constant 1 : index
    %c2_58 = arith.constant 2 : index
    %c0_59 = arith.constant 0 : index
    %48 = vector.load %arg11[%c0_56, %c1_57, %c2_58, %c0_59] : memref<1x6x6x128xbf16, #tpu.memory_space<vmem>>, vector<1x4x4x128xbf16>
    %49 = vector.shape_cast %48 : vector<1x4x4x128xbf16> to vector<16x128xbf16>
    %c5 = arith.constant 5 : index
    %c0_60 = arith.constant 0 : index
    %c0_61 = arith.constant 0 : index
    %50 = vector.load %arg4[%c5, %c0_60, %c0_61] : memref<9x128x128xbf16, #tpu.memory_space<vmem>>, vector<1x128x128xbf16>
    %51 = vector.shape_cast %50 : vector<1x128x128xbf16> to vector<128x128xbf16>
    %cst_62 = arith.constant dense<0.000000e+00> : vector<16x128xf32>
    %52 = tpu.matmul %49, %51, %cst_62 {dimension_numbers = #tpu.dot_dimension_numbers<[1], [0], [0], [1], [0, 0, 1, 1], [], []>} : vector<16x128xbf16>, vector<128x128xbf16>, vector<16x128xf32> -> vector<16x128xf32>
    %53 = arith.addf %47, %52 : vector<16x128xf32>
    %c0_63 = arith.constant 0 : index
    %c2_64 = arith.constant 2 : index
    %c0_65 = arith.constant 0 : index
    %c0_66 = arith.constant 0 : index
    %54 = vector.load %arg11[%c0_63, %c2_64, %c0_65, %c0_66] : memref<1x6x6x128xbf16, #tpu.memory_space<vmem>>, vector<1x4x4x128xbf16>
    %55 = vector.shape_cast %54 : vector<1x4x4x128xbf16> to vector<16x128xbf16>
    %c6 = arith.constant 6 : index
    %c0_67 = arith.constant 0 : index
    %c0_68 = arith.constant 0 : index
    %56 = vector.load %arg4[%c6, %c0_67, %c0_68] : memref<9x128x128xbf16, #tpu.memory_space<vmem>>, vector<1x128x128xbf16>
    %57 = vector.shape_cast %56 : vector<1x128x128xbf16> to vector<128x128xbf16>
    %cst_69 = arith.constant dense<0.000000e+00> : vector<16x128xf32>
    %58 = tpu.matmul %55, %57, %cst_69 {dimension_numbers = #tpu.dot_dimension_numbers<[1], [0], [0], [1], [0, 0, 1, 1], [], []>} : vector<16x128xbf16>, vector<128x128xbf16>, vector<16x128xf32> -> vector<16x128xf32>
    %59 = arith.addf %53, %58 : vector<16x128xf32>
    %c0_70 = arith.constant 0 : index
    %c2_71 = arith.constant 2 : index
    %c1_72 = arith.constant 1 : index
    %c0_73 = arith.constant 0 : index
    %60 = vector.load %arg11[%c0_70, %c2_71, %c1_72, %c0_73] : memref<1x6x6x128xbf16, #tpu.memory_space<vmem>>, vector<1x4x4x128xbf16>
    %61 = vector.shape_cast %60 : vector<1x4x4x128xbf16> to vector<16x128xbf16>
    %c7 = arith.constant 7 : index
    %c0_74 = arith.constant 0 : index
    %c0_75 = arith.constant 0 : index
    %62 = vector.load %arg4[%c7, %c0_74, %c0_75] : memref<9x128x128xbf16, #tpu.memory_space<vmem>>, vector<1x128x128xbf16>
    %63 = vector.shape_cast %62 : vector<1x128x128xbf16> to vector<128x128xbf16>
    %cst_76 = arith.constant dense<0.000000e+00> : vector<16x128xf32>
    %64 = tpu.matmul %61, %63, %cst_76 {dimension_numbers = #tpu.dot_dimension_numbers<[1], [0], [0], [1], [0, 0, 1, 1], [], []>} : vector<16x128xbf16>, vector<128x128xbf16>, vector<16x128xf32> -> vector<16x128xf32>
    %65 = arith.addf %59, %64 : vector<16x128xf32>
    %c0_77 = arith.constant 0 : index
    %c2_78 = arith.constant 2 : index
    %c2_79 = arith.constant 2 : index
    %c0_80 = arith.constant 0 : index
    %66 = vector.load %arg11[%c0_77, %c2_78, %c2_79, %c0_80] : memref<1x6x6x128xbf16, #tpu.memory_space<vmem>>, vector<1x4x4x128xbf16>
    %67 = vector.shape_cast %66 : vector<1x4x4x128xbf16> to vector<16x128xbf16>
    %c8 = arith.constant 8 : index
    %c0_81 = arith.constant 0 : index
    %c0_82 = arith.constant 0 : index
    %68 = vector.load %arg4[%c8, %c0_81, %c0_82] : memref<9x128x128xbf16, #tpu.memory_space<vmem>>, vector<1x128x128xbf16>
    %69 = vector.shape_cast %68 : vector<1x128x128xbf16> to vector<128x128xbf16>
    %cst_83 = arith.constant dense<0.000000e+00> : vector<16x128xf32>
    %70 = tpu.matmul %67, %69, %cst_83 {dimension_numbers = #tpu.dot_dimension_numbers<[1], [0], [0], [1], [0, 0, 1, 1], [], []>} : vector<16x128xbf16>, vector<128x128xbf16>, vector<16x128xf32> -> vector<16x128xf32>
    %71 = arith.addf %65, %70 : vector<16x128xf32>
    %cst_84 = arith.constant 0.000000e+00 : f32
    %72 = vector.broadcast %cst_84 : f32 to vector<16x128xf32>
    %73 = arith.maximumf %71, %72 : vector<16x128xf32>
    %74 = arith.truncf %73 : vector<16x128xf32> to vector<16x128xbf16>
    %c0_85 = arith.constant 0 : index
    %c0_86 = arith.constant 0 : index
    %75 = vector.load %arg6[%c0_85, %c0_86] : memref<128x512xbf16, #tpu.memory_space<vmem>>, vector<128x512xbf16>
    %cst_87 = arith.constant dense<0.000000e+00> : vector<16x512xf32>
    %76 = tpu.matmul %74, %75, %cst_87 {dimension_numbers = #tpu.dot_dimension_numbers<[1], [0], [0], [1], [0, 0, 1, 1], [], []>} : vector<16x128xbf16>, vector<128x512xbf16>, vector<16x512xf32> -> vector<16x512xf32>
    %c0_88 = arith.constant 0 : index
    %c0_89 = arith.constant 0 : index
    %77 = vector.load %arg7[%c0_88, %c0_89] : memref<1x512xf32, #tpu.memory_space<vmem>>, vector<1x512xf32>
    %78 = vector.broadcast %77 : vector<1x512xf32> to vector<16x512xf32>
    %79 = arith.addf %76, %78 : vector<16x512xf32>
    %cst_90 = arith.constant 0.000000e+00 : f32
    %80 = vector.broadcast %cst_90 : f32 to vector<16x512xf32>
    %81 = arith.maximumf %79, %80 : vector<16x512xf32>
    %82 = vector.shape_cast %81 : vector<16x512xf32> to vector<1x16x512xf32>
    %cst_91 = arith.constant dense<0.000000e+00> : vector<1x512xf32>
    %83 = vector.multi_reduction <add>, %82, %cst_91 [1] : vector<1x16x512xf32> to vector<1x512xf32>
    %cst_92 = arith.constant 6.250000e-02 : f32
    %84 = vector.broadcast %cst_92 : f32 to vector<1x512xf32>
    %85 = arith.mulf %83, %84 : vector<1x512xf32>
    %86 = arith.truncf %85 : vector<1x512xf32> to vector<1x512xbf16>
    %c0_93 = arith.constant 0 : index
    %c0_94 = arith.constant 0 : index
    %87 = vector.load %arg8[%c0_93, %c0_94] : memref<512x128xbf16, #tpu.memory_space<vmem>>, vector<512x128xbf16>
    %cst_95 = arith.constant dense<0.000000e+00> : vector<1x128xf32>
    %88 = tpu.matmul %86, %87, %cst_95 {dimension_numbers = #tpu.dot_dimension_numbers<[1], [0], [0], [1], [0, 0, 1, 1], [], []>} : vector<1x512xbf16>, vector<512x128xbf16>, vector<1x128xf32> -> vector<1x128xf32>
    %c0_96 = arith.constant 0 : index
    %c0_97 = arith.constant 0 : index
    %89 = vector.load %arg9[%c0_96, %c0_97] : memref<1x128xf32, #tpu.memory_space<vmem>>, vector<1x128xf32>
    %90 = arith.addf %88, %89 : vector<1x128xf32>
    %91 = vector.shape_cast %90 : vector<1x128xf32> to vector<1x1x128xf32>
    %c0_98 = arith.constant 0 : index
    %c0_99 = arith.constant 0 : index
    %c0_100 = arith.constant 0 : index
    %92 = vector.load %arg10[%c0_98, %c0_99, %c0_100] : memref<1x1x128xf32, #tpu.memory_space<vmem>>, vector<1x1x128xf32>
    tpu.vector_store %arg10[%c0_98, %c0_99, %c0_100], %91 {strides = array<i32>} : memref<1x1x128xf32, #tpu.memory_space<vmem>>, vector<1x1x128xf32>,
    return
  }
  func.func @transform_0(%arg0: i32) -> (i32, i32, i32, i32) {
    %c0_i32 = arith.constant 0 : i32
    %c0_i32_0 = arith.constant 0 : i32
    %c0_i32_1 = arith.constant 0 : i32
    %c0_i32_2 = arith.constant 0 : i32
    return %arg0, %c0_i32, %c0_i32_0, %c0_i32_1 : i32, i32, i32, i32
  }
  func.func @transform_1(%arg0: i32) -> (i32, i32) {
    %c0_i32 = arith.constant 0 : i32
    %c0_i32_0 = arith.constant 0 : i32
    %c0_i32_1 = arith.constant 0 : i32
    return %c0_i32, %c0_i32_0 : i32, i32
  }
  func.func @transform_2(%arg0: i32) -> (i32, i32) {
    %c0_i32 = arith.constant 0 : i32
    %c0_i32_0 = arith.constant 0 : i32
    %c0_i32_1 = arith.constant 0 : i32
    return %c0_i32, %c0_i32_0 : i32, i32
  }
  func.func @transform_3(%arg0: i32) -> (i32, i32, i32) {
    %c0_i32 = arith.constant 0 : i32
    %c0_i32_0 = arith.constant 0 : i32
    %c0_i32_1 = arith.constant 0 : i32
    %c0_i32_2 = arith.constant 0 : i32
    return %c0_i32, %c0_i32_0, %c0_i32_1 : i32, i32, i32
  }
  func.func @transform_4(%arg0: i32) -> (i32, i32) {
    %c0_i32 = arith.constant 0 : i32
    %c0_i32_0 = arith.constant 0 : i32
    %c0_i32_1 = arith.constant 0 : i32
    return %c0_i32, %c0_i32_0 : i32, i32
  }
  func.func @transform_5(%arg0: i32) -> (i32, i32) {
    %c0_i32 = arith.constant 0 : i32
    %c0_i32_0 = arith.constant 0 : i32
    %c0_i32_1 = arith.constant 0 : i32
    return %c0_i32, %c0_i32_0 : i32, i32
  }
  func.func @transform_6(%arg0: i32) -> (i32, i32) {
    %c0_i32 = arith.constant 0 : i32
    %c0_i32_0 = arith.constant 0 : i32
    %c0_i32_1 = arith.constant 0 : i32
    return %c0_i32, %c0_i32_0 : i32, i32
  }
  func.func @transform_7(%arg0: i32) -> (i32, i32) {
    %c0_i32 = arith.constant 0 : i32
    %c0_i32_0 = arith.constant 0 : i32
    %c0_i32_1 = arith.constant 0 : i32
    return %c0_i32, %c0_i32_0 : i32, i32
  }
  func.func @transform_8(%arg0: i32) -> (i32, i32) {
    %c0_i32 = arith.constant 0 : i32
    %c0_i32_0 = arith.constant 0 : i32
    %c0_i32_1 = arith.constant 0 : i32
    return %c0_i32, %c0_i32_0 : i32, i32
  }
  func.func @transform_9(%arg0: i32) -> (i32, i32, i32) {
    %c0_i32 = arith.constant 0 : i32
    %c0_i32_0 = arith.constant 0 : i32
    %c0_i32_1 = arith.constant 0 : i32
    return %arg0, %c0_i32, %c0_i32_0 : i32, i32, i32
  }
}

</mosaic_0001>

<bundles_post_ra>
// kernel: simplenet_forward.3
= control target key start
LH: loop header
LB: loop body
LE: loop exit
PB: predicated region body
PF: predicated region fallthrough
CT: control target
= control target key end

     0   :  { %s2052_s12 = smov 0   ;;  %s2292_s0 = inlined_call_operand.vmem [shape: bf16[512,512], index: 0, kind: input, shape index: {}]   ;;  %s2293_s1 = inlined_call_operand.vmem [shape: bf16[512,128], index: 1, kind: input, shape index: {}]   ;;  %s2294_s2 = inlined_call_operand.vmem [shape: f32[1,128], index: 2, kind: input, shape index: {}]   ;;  %s2295_s3 = inlined_call_operand.vmem [shape: bf16[512,128], index: 3, kind: output, shape index: {}]  }
   0x1 LB: > { %s1395_s13 = sadd.s32 4294967295, %s2030_s12   ;;  %p1399_p0 = scmp.ge.s32.totalorder %s2030_s12, 1  ;;  %s2030_s12 = sphi %s2052_s12, %s13_s12  }
   0x2   : > { %p139_p1 = scmp.lt.s32.totalorder %s2030_s12, 3 }
   0x4   : > { %p140_p2 = pnand %p1399_p0, %p139_p1 }
   0x5   : > { %v1896_v0 = vld [vmem:[%s2293_s1 + $0x40] sm:$0xff] (!%p140_p2)   ;;  %v1900_v4 = vld [vmem:[%s2293_s1 + $0x48] sm:$0xff] (!%p140_p2)   ;;  %v1904_v8 = vld [vmem:[%s2293_s1 + $0x50] sm:$0xff] (!%p140_p2)   ;;  %s1400_s21 = sshll.u32 (!%p140_p2), %s1395_s13, 5 }
   0x6   : > { %143 = sbr.rel (%p140_p2) target bundleno = 385 (0x181), region = 32  ;;  %v1897_v1 = vld [vmem:[%s2293_s1 + $0xc0] sm:$0xff] (!%p140_p2)   ;;  %1664 = vmatprep.subr.bf16.mxu0 (!%p140_p2), %v1896_v0  ;;  %v1901_v5 = vld [vmem:[%s2293_s1 + $0xc8] sm:$0xff] (!%p140_p2)   ;;  %v1905_v9 = vld [vmem:[%s2293_s1 + $0xd0] sm:$0xff] (!%p140_p2)   ;;  %p165_p3 = scmp.lt.s32.totalorder (!%p140_p2), %s1400_s21, 63 }
   0x7   : > { %v1898_v2 = vld [vmem:[%s2293_s1] sm:$0xff] (!%p140_p2)   ;;  %1776 = vmatprep.subr.bf16.mxu1 (!%p140_p2), %v1897_v1  ;;  %v1902_v6 = vld [vmem:[%s2293_s1 + $0x8] sm:$0xff] (!%p140_p2)   ;;  %v1906_v10 = vld [vmem:[%s2293_s1 + $0x10] sm:$0xff] (!%p140_p2)  }
   0x8   : > { %v1899_v3 = vld [vmem:[%s2293_s1 + $0x80] sm:$0xff] (!%p140_p2)   ;;  %1665 = vmatpush3.bf16.msra.mxu0 (!%p140_p2), %v1898_v2  ;;  %v1903_v7 = vld [vmem:[%s2293_s1 + $0x88] sm:$0xff] (!%p140_p2)   ;;  %v1907_v11 = vld [vmem:[%s2293_s1 + $0x90] sm:$0xff] (!%p140_p2)  }
   0x9   : > { %1777 = vmatpush3.bf16.msra.mxu1 (!%p140_p2), %v1899_v3  ;;  %1666 = vmatprep.subr.bf16.mxu0 (!%p140_p2), %v1900_v4  ;;  %v1908_v12 = vld [vmem:[%s2293_s1 + $0x58] sm:$0xff] (!%p140_p2)   ;;  %v1912_v16 = vld [vmem:[%s2293_s1 + $0x60] sm:$0xff] (!%p140_p2)   ;;  %v1916_v20 = vld [vmem:[%s2293_s1 + $0x68] sm:$0xff] (!%p140_p2)  }
   0xa   : > { %1778 = vmatprep.subr.bf16.mxu1 (!%p140_p2), %v1901_v5  ;;  %v1909_v13 = vld [vmem:[%s2293_s1 + $0xd8] sm:$0xff] (!%p140_p2)   ;;  %v1913_v17 = vld [vmem:[%s2293_s1 + $0xe0] sm:$0xff] (!%p140_p2)   ;;  %v1917_v21 = vld [vmem:[%s2293_s1 + $0xe8] sm:$0xff] (!%p140_p2)  }
   0xb   : > { %v1910_v14 = vld [vmem:[%s2293_s1 + $0x18] sm:$0xff] (!%p140_p2)   ;;  %v1914_v18 = vld [vmem:[%s2293_s1 + $0x20] sm:$0xff] (!%p140_p2)   ;;  %v1918_v22 = vld [vmem:[%s2293_s1 + $0x28] sm:$0xff] (!%p140_p2)  }
   0xc   : > { %1667 = vmatpush3.bf16.msra.mxu0 (!%p140_p2), %v1902_v6  ;;  %v1911_v15 = vld [vmem:[%s2293_s1 + $0x98] sm:$0xff] (!%p140_p2)   ;;  %v1915_v19 = vld [vmem:[%s2293_s1 + $0xa0] sm:$0xff] (!%p140_p2)   ;;  %v1919_v23 = vld [vmem:[%s2293_s1 + $0xa8] sm:$0xff] (!%p140_p2)  }
   0xd   : > { %1779 = vmatpush3.bf16.msra.mxu1 %v1903_v7  ;;  %1668 = vmatprep.subr.bf16.mxu0 %v1904_v8  ;;  %s2297_s21 = smov (!%p165_p3, %s1400_s21), 63  ;;  %v1920_v24 = vld [vmem:[%s2293_s1 + $0x70] sm:$0xff]   ;;  %v1924_v28 = vld [vmem:[%s2293_s1 + $0x78] sm:$0xff]  }
   0xe   : > { %1780 = vmatprep.subr.bf16.mxu1 %v1905_v9  ;;  %v1921_v25 = vld [vmem:[%s2293_s1 + $0xf0] sm:$0xff]   ;;  %s1536_s18 = sshll.u32 %s2297_s21, 4  ;;  %v1925_v29 = vld [vmem:[%s2293_s1 + $0xf8] sm:$0xff]   ;;  %s1404_s7 = sshll.u32 %s2297_s21, 2 }
   0xf   : > { %v1922_v26 = vld [vmem:[%s2293_s1 + $0x30] sm:$0xff]   ;;  %s2158_s28 = scalar_lea.vmem %s2292_s0, %s1536_s18  ;;  %v1926_v30 = vld [vmem:[%s2293_s1 + $0x38] sm:$0xff]   ;;  %s2241_s10 = scalar_lea.vmem %s2295_s3, %s1404_s7 }
  0x10   : > { %1669 = vmatpush3.bf16.msra.mxu0 %v1906_v10  ;;  %v1923_v27 = vld [vmem:[%s2293_s1 + $0xb0] sm:$0xff]   ;;  %v1927_v31 = vld [vmem:[%s2293_s1 + $0xb8] sm:$0xff]  }
  0x11   : > { %1781 = vmatpush3.bf16.msra.mxu1 %v1907_v11  ;;  %1670 = vmatprep.subr.bf16.mxu0 %v1908_v12  ;;  %v1928_v32 = vld [vmem:[%s2158_s28] ss:$16 sps:$4 sm:$0xff]   ;;  %v1930_v33 = vld [vmem:[%s2158_s28 + $0x4] ss:$16 sps:$4 sm:$0xff]   ;;  %v1931_v34 = vld [vmem:[%s2158_s28 + $0x8] ss:$16 sps:$4 sm:$0xff]  }
  0x12   : > { %1782 = vmatprep.subr.bf16.mxu1 %v1909_v13  ;;  %v1933_v35 = vld [vmem:[%s2158_s28 + $0xc] ss:$16 sps:$4 sm:$0xff]   ;;  %857 = vmatprep.mubr.bf16.mxu0 %v1930_v33  ;;  %v1934_v36 = vld [vmem:[%s2158_s28 + $0x24] ss:$16 sps:$4 sm:$0xff]   ;;  %v1938_v38 = vld [vmem:[%s2158_s28 + $0x20] ss:$16 sps:$4 sm:$0xff]  }
  0x13   : > { %1018 = vmatprep.mubr.bf16.mxu1 %v1933_v35  ;;  %v1936_v37 = vld [vmem:[%s2158_s28 + $0x2c] ss:$16 sps:$4 sm:$0xff]   ;;  %v1939_v39 = vld [vmem:[%s2158_s28 + $0x28] ss:$16 sps:$4 sm:$0xff]   ;;  %v1940_v40 = vld [vmem:[%s2158_s28 + $0x44] ss:$16 sps:$4 sm:$0xff]  }
  0x14   : > { %1671 = vmatpush3.bf16.msra.mxu0 %v1910_v14  ;;  %v1942_v41 = vld [vmem:[%s2158_s28 + $0x4c] ss:$16 sps:$4 sm:$0xff]   ;;  %v1944_v42 = vld [vmem:[%s2158_s28 + $0x40] ss:$16 sps:$4 sm:$0xff]   ;;  %v1945_v43 = vld [vmem:[%s2158_s28 + $0x48] ss:$16 sps:$4 sm:$0xff]  }
  0x15   : > { %1783 = vmatpush3.bf16.msra.mxu1 %v1911_v15  ;;  %1672 = vmatprep.subr.bf16.mxu0 %v1912_v16  ;;  %v1946_v44 = vld [vmem:[%s2158_s28 + $0x64] ss:$16 sps:$4 sm:$0xff]   ;;  %v1948_v45 = vld [vmem:[%s2158_s28 + $0x6c] ss:$16 sps:$4 sm:$0xff]   ;;  %v1950_v46 = vld [vmem:[%s2158_s28 + $0x60] ss:$16 sps:$4 sm:$0xff]  }
  0x16   : > { %1784 = vmatprep.subr.bf16.mxu1 %v1913_v17  ;;  %v1951_v47 = vld [vmem:[%s2158_s28 + $0x68] ss:$16 sps:$4 sm:$0xff]   ;;  %v1952_v48 = vld [vmem:[%s2158_s28 + $0x84] ss:$16 sps:$4 sm:$0xff]   ;;  %v1954_v49 = vld [vmem:[%s2158_s28 + $0x8c] ss:$16 sps:$4 sm:$0xff]  }
  0x17   : > { %v1956_v50 = vld [vmem:[%s2158_s28 + $0x80] ss:$16 sps:$4 sm:$0xff]   ;;  %v1957_v51 = vld [vmem:[%s2158_s28 + $0x88] ss:$16 sps:$4 sm:$0xff]   ;;  %v1958_v52 = vld [vmem:[%s2158_s28 + $0xa4] ss:$16 sps:$4 sm:$0xff]  }
  0x18   : > { %1673 = vmatpush3.bf16.msra.mxu0 %v1914_v18  ;;  %v1960_v53 = vld [vmem:[%s2158_s28 + $0xac] ss:$16 sps:$4 sm:$0xff]   ;;  %v1962_v54 = vld [vmem:[%s2158_s28 + $0xa0] ss:$16 sps:$4 sm:$0xff]   ;;  %v1963_v55 = vld [vmem:[%s2158_s28 + $0xa8] ss:$16 sps:$4 sm:$0xff]  }
  0x19   : > { %1785 = vmatpush3.bf16.msra.mxu1 %v1915_v19  ;;  %1674 = vmatprep.subr.bf16.mxu0 %v1916_v20  ;;  %v1964_v56 = vld [vmem:[%s2158_s28 + $0xc4] ss:$16 sps:$4 sm:$0xff]   ;;  %v1966_v57 = vld [vmem:[%s2158_s28 + $0xcc] ss:$16 sps:$4 sm:$0xff]   ;;  %v1968_v58 = vld [vmem:[%s2158_s28 + $0xc0] ss:$16 sps:$4 sm:$0xff]  }
  0x1a   : > { %1786 = vmatprep.subr.bf16.mxu1 %v1917_v21  ;;  %v1969_v59 = vld [vmem:[%s2158_s28 + $0xc8] ss:$16 sps:$4 sm:$0xff]   ;;  %v1970_v60 = vld [vmem:[%s2158_s28 + $0xe4] ss:$16 sps:$4 sm:$0xff]   ;;  %v1972_v61 = vld [vmem:[%s2158_s28 + $0xec] ss:$16 sps:$4 sm:$0xff]  }
  0x1b   : > { %v1974_v62 = vld [vmem:[%s2158_s28 + $0xe0] ss:$16 sps:$4 sm:$0xff]   ;;  %v1975_v63 = vld [vmem:[%s2158_s28 + $0xe8] ss:$16 sps:$4 sm:$0xff]   ;;  %v1976_v0 = vld [vmem:[%s2158_s28 + $0x104] ss:$16 sps:$4 sm:$0xff]  }
  0x1c   : > { %1675 = vmatpush3.bf16.msra.mxu0 %v1918_v22  ;;  %v1978_v1 = vld [vmem:[%s2158_s28 + $0x10c] ss:$16 sps:$4 sm:$0xff]   ;;  %v1980_v2 = vld [vmem:[%s2158_s28 + $0x100] ss:$16 sps:$4 sm:$0xff]   ;;  %v1981_v3 = vld [vmem:[%s2158_s28 + $0x108] ss:$16 sps:$4 sm:$0xff]  }
  0x1d   : > { %1787 = vmatpush3.bf16.msra.mxu1 %v1919_v23  ;;  %1676 = vmatprep.subr.bf16.mxu0 %v1920_v24  ;;  %v1982_v4 = vld [vmem:[%s2158_s28 + $0x124] ss:$16 sps:$4 sm:$0xff]   ;;  %v1984_v5 = vld [vmem:[%s2158_s28 + $0x12c] ss:$16 sps:$4 sm:$0xff]   ;;  %v1986_v6 = vld [vmem:[%s2158_s28 + $0x120] ss:$16 sps:$4 sm:$0xff]  }
  0x1e   : > { %1788 = vmatprep.subr.bf16.mxu1 %v1921_v25  ;;  %v1987_v7 = vld [vmem:[%s2158_s28 + $0x128] ss:$16 sps:$4 sm:$0xff]   ;;  %v1988_v8 = vld [vmem:[%s2158_s28 + $0x144] ss:$16 sps:$4 sm:$0xff]   ;;  %v1990_v9 = vld [vmem:[%s2158_s28 + $0x14c] ss:$16 sps:$4 sm:$0xff]  }
  0x1f   : > { %v1992_v10 = vld [vmem:[%s2158_s28 + $0x140] ss:$16 sps:$4 sm:$0xff]   ;;  %v1993_v11 = vld [vmem:[%s2158_s28 + $0x148] ss:$16 sps:$4 sm:$0xff]   ;;  %v1994_v12 = vld [vmem:[%s2158_s28 + $0x164] ss:$16 sps:$4 sm:$0xff]  }
  0x20   : > { %1677 = vmatpush3.bf16.msra.mxu0 %v1922_v26  ;;  %v1996_v13 = vld [vmem:[%s2158_s28 + $0x16c] ss:$16 sps:$4 sm:$0xff]   ;;  %v1998_v14 = vld [vmem:[%s2158_s28 + $0x160] ss:$16 sps:$4 sm:$0xff]   ;;  %v1999_v15 = vld [vmem:[%s2158_s28 + $0x168] ss:$16 sps:$4 sm:$0xff]  }
  0x21   : > { %1789 = vmatpush3.bf16.msra.mxu1 %v1923_v27  ;;  %1678 = vmatprep.subr.bf16.mxu0 %v1924_v28  ;;  %v2000_v16 = vld [vmem:[%s2158_s28 + $0x184] ss:$16 sps:$4 sm:$0xff]   ;;  %v2002_v17 = vld [vmem:[%s2158_s28 + $0x18c] ss:$16 sps:$4 sm:$0xff]   ;;  %v2004_v18 = vld [vmem:[%s2158_s28 + $0x180] ss:$16 sps:$4 sm:$0xff]  }
  0x22   : > { %1790 = vmatprep.subr.bf16.mxu1 %v1925_v29  ;;  %v2005_v19 = vld [vmem:[%s2158_s28 + $0x188] ss:$16 sps:$4 sm:$0xff]   ;;  %v2006_v20 = vld [vmem:[%s2158_s28 + $0x1a4] ss:$16 sps:$4 sm:$0xff]   ;;  %v2008_v21 = vld [vmem:[%s2158_s28 + $0x1ac] ss:$16 sps:$4 sm:$0xff]  }
  0x23   : > { %v2010_v22 = vld [vmem:[%s2158_s28 + $0x1a0] ss:$16 sps:$4 sm:$0xff]   ;;  %v2011_v23 = vld [vmem:[%s2158_s28 + $0x1a8] ss:$16 sps:$4 sm:$0xff]   ;;  %v2012_v24 = vld [vmem:[%s2158_s28 + $0x1c4] ss:$16 sps:$4 sm:$0xff]  }
  0x24   : > { %1679 = vmatpush3.bf16.msra.mxu0 %v1926_v30  ;;  %v2014_v25 = vld [vmem:[%s2158_s28 + $0x1cc] ss:$16 sps:$4 sm:$0xff]   ;;  %v2016_v26 = vld [vmem:[%s2158_s28 + $0x1c0] ss:$16 sps:$4 sm:$0xff]   ;;  %v2017_v27 = vld [vmem:[%s2158_s28 + $0x1c8] ss:$16 sps:$4 sm:$0xff]  }
  0x25   : > { %1791 = vmatpush3.bf16.msra.mxu1 %v1927_v31  ;;  %v2018_v28 = vld [vmem:[%s2158_s28 + $0x1e4] ss:$16 sps:$4 sm:$0xff]   ;;  %v2020_v29 = vld [vmem:[%s2158_s28 + $0x1ec] ss:$16 sps:$4 sm:$0xff]   ;;  %v2022_v30 = vld [vmem:[%s2158_s28 + $0x1e0] ss:$16 sps:$4 sm:$0xff]  }
  0x26   : > { %v2023_v31 = vld [vmem:[%s2158_s28 + $0x1e8] ss:$16 sps:$4 sm:$0xff]  }
  0x27   : > { %858 = vmatmul.mubr.bf16.vlgmr.msra.gmra.mrb[0].mxu0 %v1928_v32 }
  0x28   : > { %1019 = vmatmul.mubr.bf16.vlgmr.msra.gmra.mrb[0].mxu1 %v1931_v34  ;;  %865 = vmatprep.mubr.bf16.mxu0 %v1934_v36  ;;  %v2233_v34 = vld [vmem:[%s2294_s2] ss:$0 sm:$0xff] }
  0x29   : > { %1026 = vmatprep.mubr.bf16.mxu1 %v1936_v37 }
  0x2f   : > { %866 = vmatmul.mubr.bf16.gmra.mrb[4].mxu0 %v1938_v38 }
  0x30   : > { %1027 = vmatmul.mubr.bf16.gmra.mrb[4].mxu1 %v1939_v39  ;;  %873 = vmatprep.mubr.bf16.mxu0 %v1940_v40 }
  0x31   : > { %1034 = vmatprep.mubr.bf16.mxu1 %v1942_v41 }
  0x37   : > { %874 = vmatmul.mubr.bf16.gmra.mrb[8].mxu0 %v1944_v42 }
  0x38   : > { %1035 = vmatmul.mubr.bf16.gmra.mrb[8].mxu1 %v1945_v43  ;;  %881 = vmatprep.mubr.bf16.mxu0 %v1946_v44 }
  0x39   : > { %1042 = vmatprep.mubr.bf16.mxu1 %v1948_v45 }
  0x3f   : > { %882 = vmatmul.mubr.bf16.gmra.mrb[12].mxu0 %v1950_v46 }
  0x40   : > { %1043 = vmatmul.mubr.bf16.gmra.mrb[12].mxu1 %v1951_v47  ;;  %889 = vmatprep.mubr.bf16.mxu0 %v1952_v48 }
  0x41   : > { %1050 = vmatprep.mubr.bf16.mxu1 %v1954_v49 }
  0x47   : > { %890 = vmatmul.mubr.bf16.gmra.mrb[16].mxu0 %v1956_v50 }
  0x48   : > { %1051 = vmatmul.mubr.bf16.gmra.mrb[16].mxu1 %v1957_v51  ;;  %897 = vmatprep.mubr.bf16.mxu0 %v1958_v52 }
  0x49   : > { %1058 = vmatprep.mubr.bf16.mxu1 %v1960_v53 }
  0x4f   : > { %898 = vmatmul.mubr.bf16.gmra.mrb[20].mxu0 %v1962_v54 }
  0x50   : > { %1059 = vmatmul.mubr.bf16.gmra.mrb[20].mxu1 %v1963_v55  ;;  %905 = vmatprep.mubr.bf16.mxu0 %v1964_v56 }
  0x51   : > { %1066 = vmatprep.mubr.bf16.mxu1 %v1966_v57 }
  0x57   : > { %906 = vmatmul.mubr.bf16.gmra.mrb[24].mxu0 %v1968_v58 }
  0x58   : > { %1067 = vmatmul.mubr.bf16.gmra.mrb[24].mxu1 %v1969_v59  ;;  %913 = vmatprep.mubr.bf16.mxu0 %v1970_v60 }
  0x59   : > { %1074 = vmatprep.mubr.bf16.mxu1 %v1972_v61 }
  0x5f   : > { %914 = vmatmul.mubr.bf16.gmra.mrb[28].mxu0 %v1974_v62 }
  0x60   : > { %1075 = vmatmul.mubr.bf16.gmra.mrb[28].mxu1 %v1975_v63  ;;  %921 = vmatprep.mubr.bf16.mxu0 %v1976_v0 }
  0x61   : > { %1082 = vmatprep.mubr.bf16.mxu1 %v1978_v1 }
  0x67   : > { %922 = vmatmul.mubr.bf16.gmra.mrb[32].mxu0 %v1980_v2 }
  0x68   : > { %1083 = vmatmul.mubr.bf16.gmra.mrb[32].mxu1 %v1981_v3  ;;  %929 = vmatprep.mubr.bf16.mxu0 %v1982_v4 }
  0x69   : > { %1090 = vmatprep.mubr.bf16.mxu1 %v1984_v5 }
  0x6f   : > { %930 = vmatmul.mubr.bf16.gmra.mrb[36].mxu0 %v1986_v6 }
  0x70   : > { %1091 = vmatmul.mubr.bf16.gmra.mrb[36].mxu1 %v1987_v7  ;;  %937 = vmatprep.mubr.bf16.mxu0 %v1988_v8 }
  0x71   : > { %1098 = vmatprep.mubr.bf16.mxu1 %v1990_v9 }
  0x77   : > { %938 = vmatmul.mubr.bf16.gmra.mrb[40].mxu0 %v1992_v10 }
  0x78   : > { %1099 = vmatmul.mubr.bf16.gmra.mrb[40].mxu1 %v1993_v11  ;;  %945 = vmatprep.mubr.bf16.mxu0 %v1994_v12 }
  0x79   : > { %1106 = vmatprep.mubr.bf16.mxu1 %v1996_v13 }
  0x7f   : > { %946 = vmatmul.mubr.bf16.gmra.mrb[44].mxu0 %v1998_v14 }
  0x80   : > { %1107 = vmatmul.mubr.bf16.gmra.mrb[44].mxu1 %v1999_v15  ;;  %953 = vmatprep.mubr.bf16.mxu0 %v2000_v16 }
  0x81   : > { %1114 = vmatprep.mubr.bf16.mxu1 %v2002_v17 }
  0x87   : > { %954 = vmatmul.mubr.bf16.gmra.mrb[48].mxu0 %v2004_v18 }
  0x88   : > { %1115 = vmatmul.mubr.bf16.gmra.mrb[48].mxu1 %v2005_v19  ;;  %961 = vmatprep.mubr.bf16.mxu0 %v2006_v20 }
  0x89   : > { %1122 = vmatprep.mubr.bf16.mxu1 %v2008_v21 }
  0x8f   : > { %962 = vmatmul.mubr.bf16.gmra.mrb[52].mxu0 %v2010_v22 }
  0x90   : > { %1123 = vmatmul.mubr.bf16.gmra.mrb[52].mxu1 %v2011_v23  ;;  %969 = vmatprep.mubr.bf16.mxu0 %v2012_v24 }
  0x91   : > { %1130 = vmatprep.mubr.bf16.mxu1 %v2014_v25 }
  0x97   : > { %970 = vmatmul.mubr.bf16.gmra.mrb[56].mxu0 %v2016_v26 }
  0x98   : > { %1131 = vmatmul.mubr.bf16.gmra.mrb[56].mxu1 %v2017_v27  ;;  %977 = vmatprep.mubr.bf16.mxu0 %v2018_v28 }
  0x99   : > { %1138 = vmatprep.mubr.bf16.mxu1 %v2020_v29 }
  0x9f   : > { %978 = vmatmul.mubr.bf16.gmra.mrb[60].mxu0 %v2022_v30 }
  0xa0   : > { %1139 = vmatmul.mubr.bf16.gmra.mrb[60].mxu1 %v2023_v31 }
  0xfa   : > { %v1680_v32 = vpop.f32.mrb[0].mxu0 }
  0xfb   : > { %v1792_v33 = vpop.f32.mrb[0].mxu1  ;;  %v1681_v35 = vpop.f32.mrb[1].mxu0 }
  0xfc   : > { %v1682_v36 = vadd.f32 %v1681_v35, %v1680_v32  ;;  %v1793_v37 = vpop.f32.mrb[1].mxu1  ;;  %v1683_v38 = vpop.f32.mrb[2].mxu0 }
  0xfd   : > { %v1794_v39 = vadd.f32 %v1793_v37, %v1792_v33  ;;  %v1795_v40 = vpop.f32.mrb[2].mxu1  ;;  %v1684_v41 = vpop.f32.mrb[3].mxu0 }
  0xfe   : > { %v860_v42 = vadd.f32 %v1682_v36, %v2233_v34  ;;  %v1685_v43 = vadd.f32 %v1684_v41, %v1683_v38  ;;  %v1796_v44 = vpop.f32.mrb[3].mxu1 }
  0xff   : > { %v1797_v45 = vadd.f32 %v1796_v44, %v1795_v40 }
 0x100   : > { %v1021_v46 = vadd.f32 %v1794_v39, %v860_v42  ;;  %v863_v47 = vadd.f32 %v1685_v43, %v2233_v34 }
 0x102   : > { %v1024_v48 = vadd.f32 %v1797_v45, %v863_v47  ;;  %v1686_v49 = vpop.f32.mrb[4].mxu0  ;;  %v1147_v52 = vmax.f32 %v1021_v46, 0.0 }
 0x103   : > { %v1798_v50 = vpop.f32.mrb[4].mxu1  ;;  %v1687_v51 = vpop.f32.mrb[5].mxu0 }
 0x104   : > { %v1148_v53 = vmax.f32 %v1024_v48, 0.0  ;;  %v1688_v54 = vadd.f32 %v1687_v51, %v1686_v49  ;;  %v1799_v55 = vpop.f32.mrb[5].mxu1  ;;  %v1689_v56 = vpop.f32.mrb[6].mxu0 }
 0x105   : > { %v1800_v57 = vadd.f32 %v1799_v55, %v1798_v50  ;;  %v1801_v58 = vpop.f32.mrb[6].mxu1  ;;  %v1690_v59 = vpop.f32.mrb[7].mxu0 }
 0x106   : > { %v1572_v60 = vpack.c.bf16 %v1148_v53, %v1147_v52  ;;  %v868_v61 = vadd.f32 %v1688_v54, %v2233_v34  ;;  %v1691_v62 = vadd.f32 %v1690_v59, %v1689_v56  ;;  %v1802_v63 = vpop.f32.mrb[7].mxu1 }
 0x107   : > { %v1803_v0 = vadd.f32 %v1802_v63, %v1801_v58 }
 0x108   : > { %1573 = vst [vmem:[%s2241_s10] sm:$0xff] %v1572_v60   ;;  %v1029_v1 = vadd.f32 %v1800_v57, %v868_v61  ;;  %v871_v2 = vadd.f32 %v1691_v62, %v2233_v34 }
 0x10a   : > { %v1032_v3 = vadd.f32 %v1803_v0, %v871_v2  ;;  %v1692_v4 = vpop.f32.mrb[8].mxu0  ;;  %v1149_v7 = vmax.f32 %v1029_v1, 0.0 }
 0x10b   : > { %v1804_v5 = vpop.f32.mrb[8].mxu1  ;;  %v1693_v6 = vpop.f32.mrb[9].mxu0 }
 0x10c   : > { %v1150_v8 = vmax.f32 %v1032_v3, 0.0  ;;  %v1694_v9 = vadd.f32 %v1693_v6, %v1692_v4  ;;  %v1805_v10 = vpop.f32.mrb[9].mxu1  ;;  %v1695_v11 = vpop.f32.mrb[10].mxu0 }
 0x10d   : > { %v1806_v12 = vadd.f32 %v1805_v10, %v1804_v5  ;;  %v1807_v13 = vpop.f32.mrb[10].mxu1  ;;  %v1696_v14 = vpop.f32.mrb[11].mxu0 }
 0x10e   : > { %v1577_v15 = vpack.c.bf16 %v1150_v8, %v1149_v7  ;;  %v876_v16 = vadd.f32 %v1694_v9, %v2233_v34  ;;  %v1697_v17 = vadd.f32 %v1696_v14, %v1695_v11  ;;  %v1808_v18 = vpop.f32.mrb[11].mxu1 }
 0x10f   : > { %v1809_v19 = vadd.f32 %v1808_v18, %v1807_v13 }
 0x110   : > { %1649 = vst [vmem:[%s2241_s10 + $0x8] sm:$0xff] %v1577_v15   ;;  %v1037_v20 = vadd.f32 %v1806_v12, %v876_v16  ;;  %v879_v21 = vadd.f32 %v1697_v17, %v2233_v34 }
 0x112   : > { %v1040_v22 = vadd.f32 %v1809_v19, %v879_v21  ;;  %v1698_v23 = vpop.f32.mrb[12].mxu0  ;;  %v1151_v26 = vmax.f32 %v1037_v20, 0.0 }
 0x113   : > { %v1810_v24 = vpop.f32.mrb[12].mxu1  ;;  %v1699_v25 = vpop.f32.mrb[13].mxu0 }
 0x114   : > { %v1152_v27 = vmax.f32 %v1040_v22, 0.0  ;;  %v1700_v28 = vadd.f32 %v1699_v25, %v1698_v23  ;;  %v1811_v29 = vpop.f32.mrb[13].mxu1  ;;  %v1701_v30 = vpop.f32.mrb[14].mxu0 }
 0x115   : > { %v1812_v31 = vadd.f32 %v1811_v29, %v1810_v24  ;;  %v1813_v32 = vpop.f32.mrb[14].mxu1  ;;  %v1702_v33 = vpop.f32.mrb[15].mxu0 }
 0x116   : > { %v1582_v35 = vpack.c.bf16 %v1152_v27, %v1151_v26  ;;  %v884_v36 = vadd.f32 %v1700_v28, %v2233_v34  ;;  %v1703_v37 = vadd.f32 %v1702_v33, %v1701_v30  ;;  %v1814_v38 = vpop.f32.mrb[15].mxu1 }
 0x117   : > { %v1815_v39 = vadd.f32 %v1814_v38, %v1813_v32 }
 0x118   : > { %1650 = vst [vmem:[%s2241_s10 + $0x10] sm:$0xff] %v1582_v35   ;;  %v1045_v40 = vadd.f32 %v1812_v31, %v884_v36  ;;  %v887_v41 = vadd.f32 %v1703_v37, %v2233_v34 }
 0x11a   : > { %v1048_v42 = vadd.f32 %v1815_v39, %v887_v41  ;;  %v1704_v43 = vpop.f32.mrb[16].mxu0  ;;  %v1153_v46 = vmax.f32 %v1045_v40, 0.0 }
 0x11b   : > { %v1816_v44 = vpop.f32.mrb[16].mxu1  ;;  %v1705_v45 = vpop.f32.mrb[17].mxu0 }
 0x11c   : > { %v1154_v47 = vmax.f32 %v1048_v42, 0.0  ;;  %v1706_v48 = vadd.f32 %v1705_v45, %v1704_v43  ;;  %v1817_v49 = vpop.f32.mrb[17].mxu1  ;;  %v1707_v50 = vpop.f32.mrb[18].mxu0 }
 0x11d   : > { %v1818_v51 = vadd.f32 %v1817_v49, %v1816_v44  ;;  %v1819_v52 = vpop.f32.mrb[18].mxu1  ;;  %v1708_v53 = vpop.f32.mrb[19].mxu0 }
 0x11e   : > { %v1587_v54 = vpack.c.bf16 %v1154_v47, %v1153_v46  ;;  %v892_v55 = vadd.f32 %v1706_v48, %v2233_v34  ;;  %v1709_v56 = vadd.f32 %v1708_v53, %v1707_v50  ;;  %v1820_v57 = vpop.f32.mrb[19].mxu1 }
 0x11f   : > { %v1821_v58 = vadd.f32 %v1820_v57, %v1819_v52 }
 0x120   : > { %1651 = vst [vmem:[%s2241_s10 + $0x18] sm:$0xff] %v1587_v54   ;;  %v1053_v59 = vadd.f32 %v1818_v51, %v892_v55  ;;  %v895_v60 = vadd.f32 %v1709_v56, %v2233_v34 }
 0x122   : > { %v1056_v61 = vadd.f32 %v1821_v58, %v895_v60  ;;  %v1710_v62 = vpop.f32.mrb[20].mxu0  ;;  %v1155_v1 = vmax.f32 %v1053_v59, 0.0 }
 0x123   : > { %v1822_v63 = vpop.f32.mrb[20].mxu1  ;;  %v1711_v0 = vpop.f32.mrb[21].mxu0 }
 0x124   : > { %v1156_v2 = vmax.f32 %v1056_v61, 0.0  ;;  %v1712_v3 = vadd.f32 %v1711_v0, %v1710_v62  ;;  %v1823_v4 = vpop.f32.mrb[21].mxu1  ;;  %v1713_v5 = vpop.f32.mrb[22].mxu0 }
 0x125   : > { %v1824_v6 = vadd.f32 %v1823_v4, %v1822_v63  ;;  %v1825_v7 = vpop.f32.mrb[22].mxu1  ;;  %v1714_v8 = vpop.f32.mrb[23].mxu0 }
 0x126   : > { %v1592_v9 = vpack.c.bf16 %v1156_v2, %v1155_v1  ;;  %v900_v10 = vadd.f32 %v1712_v3, %v2233_v34  ;;  %v1715_v11 = vadd.f32 %v1714_v8, %v1713_v5  ;;  %v1826_v12 = vpop.f32.mrb[23].mxu1 }
 0x127   : > { %v1827_v13 = vadd.f32 %v1826_v12, %v1825_v7 }
 0x128   : > { %1652 = vst [vmem:[%s2241_s10 + $0x20] sm:$0xff] %v1592_v9   ;;  %v1061_v14 = vadd.f32 %v1824_v6, %v900_v10  ;;  %v903_v15 = vadd.f32 %v1715_v11, %v2233_v34 }
 0x12a   : > { %v1064_v16 = vadd.f32 %v1827_v13, %v903_v15  ;;  %v1716_v17 = vpop.f32.mrb[24].mxu0  ;;  %v1157_v20 = vmax.f32 %v1061_v14, 0.0 }
 0x12b   : > { %v1828_v18 = vpop.f32.mrb[24].mxu1  ;;  %v1717_v19 = vpop.f32.mrb[25].mxu0 }
 0x12c   : > { %v1158_v21 = vmax.f32 %v1064_v16, 0.0  ;;  %v1718_v22 = vadd.f32 %v1717_v19, %v1716_v17  ;;  %v1829_v23 = vpop.f32.mrb[25].mxu1  ;;  %v1719_v24 = vpop.f32.mrb[26].mxu0 }
 0x12d   : > { %v1830_v25 = vadd.f32 %v1829_v23, %v1828_v18  ;;  %v1831_v26 = vpop.f32.mrb[26].mxu1  ;;  %v1720_v27 = vpop.f32.mrb[27].mxu0 }
 0x12e   : > { %v1597_v28 = vpack.c.bf16 %v1158_v21, %v1157_v20  ;;  %v908_v29 = vadd.f32 %v1718_v22, %v2233_v34  ;;  %v1721_v30 = vadd.f32 %v1720_v27, %v1719_v24  ;;  %v1832_v31 = vpop.f32.mrb[27].mxu1 }
 0x12f   : > { %v1833_v32 = vadd.f32 %v1832_v31, %v1831_v26 }
 0x130   : > { %1653 = vst [vmem:[%s2241_s10 + $0x28] sm:$0xff] %v1597_v28   ;;  %v1069_v33 = vadd.f32 %v1830_v25, %v908_v29  ;;  %v911_v35 = vadd.f32 %v1721_v30, %v2233_v34 }
 0x132   : > { %v1072_v36 = vadd.f32 %v1833_v32, %v911_v35  ;;  %v1722_v37 = vpop.f32.mrb[28].mxu0  ;;  %v1159_v40 = vmax.f32 %v1069_v33, 0.0 }
 0x133   : > { %v1834_v38 = vpop.f32.mrb[28].mxu1  ;;  %v1723_v39 = vpop.f32.mrb[29].mxu0 }
 0x134   : > { %v1160_v41 = vmax.f32 %v1072_v36, 0.0  ;;  %v1724_v42 = vadd.f32 %v1723_v39, %v1722_v37  ;;  %v1835_v43 = vpop.f32.mrb[29].mxu1  ;;  %v1725_v44 = vpop.f32.mrb[30].mxu0 }
 0x135   : > { %v1836_v45 = vadd.f32 %v1835_v43, %v1834_v38  ;;  %v1837_v46 = vpop.f32.mrb[30].mxu1  ;;  %v1726_v47 = vpop.f32.mrb[31].mxu0 }
 0x136   : > { %v1602_v48 = vpack.c.bf16 %v1160_v41, %v1159_v40  ;;  %v916_v49 = vadd.f32 %v1724_v42, %v2233_v34  ;;  %v1727_v50 = vadd.f32 %v1726_v47, %v1725_v44  ;;  %v1838_v51 = vpop.f32.mrb[31].mxu1 }
 0x137   : > { %v1839_v52 = vadd.f32 %v1838_v51, %v1837_v46 }
 0x138   : > { %1654 = vst [vmem:[%s2241_s10 + $0x30] sm:$0xff] %v1602_v48   ;;  %v1077_v53 = vadd.f32 %v1836_v45, %v916_v49  ;;  %v919_v54 = vadd.f32 %v1727_v50, %v2233_v34 }
 0x13a   : > { %v1080_v55 = vadd.f32 %v1839_v52, %v919_v54  ;;  %v1728_v56 = vpop.f32.mrb[32].mxu0  ;;  %v1161_v59 = vmax.f32 %v1077_v53, 0.0 }
 0x13b   : > { %v1840_v57 = vpop.f32.mrb[32].mxu1  ;;  %v1729_v58 = vpop.f32.mrb[33].mxu0 }
 0x13c   : > { %v1162_v60 = vmax.f32 %v1080_v55, 0.0  ;;  %v1730_v61 = vadd.f32 %v1729_v58, %v1728_v56  ;;  %v1841_v62 = vpop.f32.mrb[33].mxu1  ;;  %v1731_v63 = vpop.f32.mrb[34].mxu0 }
 0x13d   : > { %v1842_v0 = vadd.f32 %v1841_v62, %v1840_v57  ;;  %v1843_v1 = vpop.f32.mrb[34].mxu1  ;;  %v1732_v2 = vpop.f32.mrb[35].mxu0 }
 0x13e   : > { %v1607_v3 = vpack.c.bf16 %v1162_v60, %v1161_v59  ;;  %v924_v4 = vadd.f32 %v1730_v61, %v2233_v34  ;;  %v1733_v5 = vadd.f32 %v1732_v2, %v1731_v63  ;;  %v1844_v6 = vpop.f32.mrb[35].mxu1 }
 0x13f   : > { %v1845_v7 = vadd.f32 %v1844_v6, %v1843_v1 }
 0x140   : > { %1655 = vst [vmem:[%s2241_s10 + $0x38] sm:$0xff] %v1607_v3   ;;  %v1085_v8 = vadd.f32 %v1842_v0, %v924_v4  ;;  %v927_v9 = vadd.f32 %v1733_v5, %v2233_v34 }
 0x142   : > { %v1088_v10 = vadd.f32 %v1845_v7, %v927_v9  ;;  %v1734_v11 = vpop.f32.mrb[36].mxu0  ;;  %v1163_v14 = vmax.f32 %v1085_v8, 0.0 }
 0x143   : > { %v1846_v12 = vpop.f32.mrb[36].mxu1  ;;  %v1735_v13 = vpop.f32.mrb[37].mxu0 }
 0x144   : > { %v1164_v15 = vmax.f32 %v1088_v10, 0.0  ;;  %v1736_v16 = vadd.f32 %v1735_v13, %v1734_v11  ;;  %v1847_v17 = vpop.f32.mrb[37].mxu1  ;;  %v1737_v18 = vpop.f32.mrb[38].mxu0 }
 0x145   : > { %v1848_v19 = vadd.f32 %v1847_v17, %v1846_v12  ;;  %v1849_v20 = vpop.f32.mrb[38].mxu1  ;;  %v1738_v21 = vpop.f32.mrb[39].mxu0 }
 0x146   : > { %v1612_v22 = vpack.c.bf16 %v1164_v15, %v1163_v14  ;;  %v932_v23 = vadd.f32 %v1736_v16, %v2233_v34  ;;  %v1739_v24 = vadd.f32 %v1738_v21, %v1737_v18  ;;  %v1850_v25 = vpop.f32.mrb[39].mxu1 }
 0x147   : > { %v1851_v26 = vadd.f32 %v1850_v25, %v1849_v20 }
 0x148   : > { %1656 = vst [vmem:[%s2241_s10 + $0x40] sm:$0xff] %v1612_v22   ;;  %v1093_v27 = vadd.f32 %v1848_v19, %v932_v23  ;;  %v935_v28 = vadd.f32 %v1739_v24, %v2233_v34 }
 0x14a   : > { %v1096_v29 = vadd.f32 %v1851_v26, %v935_v28  ;;  %v1740_v30 = vpop.f32.mrb[40].mxu0  ;;  %v1165_v33 = vmax.f32 %v1093_v27, 0.0 }
 0x14b   : > { %v1852_v31 = vpop.f32.mrb[40].mxu1  ;;  %v1741_v32 = vpop.f32.mrb[41].mxu0 }
 0x14c   : > { %v1166_v35 = vmax.f32 %v1096_v29, 0.0  ;;  %v1742_v36 = vadd.f32 %v1741_v32, %v1740_v30  ;;  %v1853_v37 = vpop.f32.mrb[41].mxu1  ;;  %v1743_v38 = vpop.f32.mrb[42].mxu0 }
 0x14d   : > { %v1854_v39 = vadd.f32 %v1853_v37, %v1852_v31  ;;  %v1855_v40 = vpop.f32.mrb[42].mxu1  ;;  %v1744_v41 = vpop.f32.mrb[43].mxu0 }
 0x14e   : > { %v1617_v42 = vpack.c.bf16 %v1166_v35, %v1165_v33  ;;  %v940_v43 = vadd.f32 %v1742_v36, %v2233_v34  ;;  %v1745_v44 = vadd.f32 %v1744_v41, %v1743_v38  ;;  %v1856_v45 = vpop.f32.mrb[43].mxu1 }
 0x14f   : > { %v1857_v46 = vadd.f32 %v1856_v45, %v1855_v40 }
 0x150   : > { %1657 = vst [vmem:[%s2241_s10 + $0x48] sm:$0xff] %v1617_v42   ;;  %v1101_v47 = vadd.f32 %v1854_v39, %v940_v43  ;;  %v943_v48 = vadd.f32 %v1745_v44, %v2233_v34 }
 0x152   : > { %v1104_v49 = vadd.f32 %v1857_v46, %v943_v48  ;;  %v1746_v50 = vpop.f32.mrb[44].mxu0  ;;  %v1167_v53 = vmax.f32 %v1101_v47, 0.0 }
 0x153   : > { %v1858_v51 = vpop.f32.mrb[44].mxu1  ;;  %v1747_v52 = vpop.f32.mrb[45].mxu0 }
 0x154   : > { %v1168_v54 = vmax.f32 %v1104_v49, 0.0  ;;  %v1748_v55 = vadd.f32 %v1747_v52, %v1746_v50  ;;  %v1859_v56 = vpop.f32.mrb[45].mxu1  ;;  %v1749_v57 = vpop.f32.mrb[46].mxu0 }
 0x155   : > { %v1860_v58 = vadd.f32 %v1859_v56, %v1858_v51  ;;  %v1861_v59 = vpop.f32.mrb[46].mxu1  ;;  %v1750_v60 = vpop.f32.mrb[47].mxu0 }
 0x156   : > { %v1622_v61 = vpack.c.bf16 %v1168_v54, %v1167_v53  ;;  %v948_v62 = vadd.f32 %v1748_v55, %v2233_v34  ;;  %v1751_v63 = vadd.f32 %v1750_v60, %v1749_v57  ;;  %v1862_v0 = vpop.f32.mrb[47].mxu1 }
 0x157   : > { %v1863_v1 = vadd.f32 %v1862_v0, %v1861_v59 }
 0x158   : > { %1658 = vst [vmem:[%s2241_s10 + $0x50] sm:$0xff] %v1622_v61   ;;  %v1109_v2 = vadd.f32 %v1860_v58, %v948_v62  ;;  %v951_v3 = vadd.f32 %v1751_v63, %v2233_v34 }
 0x15a   : > { %v1112_v4 = vadd.f32 %v1863_v1, %v951_v3  ;;  %v1752_v5 = vpop.f32.mrb[48].mxu0  ;;  %v1169_v8 = vmax.f32 %v1109_v2, 0.0 }
 0x15b   : > { %v1864_v6 = vpop.f32.mrb[48].mxu1  ;;  %v1753_v7 = vpop.f32.mrb[49].mxu0 }
 0x15c   : > { %v1170_v9 = vmax.f32 %v1112_v4, 0.0  ;;  %v1754_v10 = vadd.f32 %v1753_v7, %v1752_v5  ;;  %v1865_v11 = vpop.f32.mrb[49].mxu1  ;;  %v1755_v12 = vpop.f32.mrb[50].mxu0 }
 0x15d   : > { %v1866_v13 = vadd.f32 %v1865_v11, %v1864_v6  ;;  %v1867_v14 = vpop.f32.mrb[50].mxu1  ;;  %v1756_v15 = vpop.f32.mrb[51].mxu0 }
 0x15e   : > { %v1627_v16 = vpack.c.bf16 %v1170_v9, %v1169_v8  ;;  %v956_v17 = vadd.f32 %v1754_v10, %v2233_v34  ;;  %v1757_v18 = vadd.f32 %v1756_v15, %v1755_v12  ;;  %v1868_v19 = vpop.f32.mrb[51].mxu1 }
 0x15f   : > { %v1869_v20 = vadd.f32 %v1868_v19, %v1867_v14 }
 0x160   : > { %1659 = vst [vmem:[%s2241_s10 + $0x58] sm:$0xff] %v1627_v16   ;;  %v1117_v21 = vadd.f32 %v1866_v13, %v956_v17  ;;  %v959_v22 = vadd.f32 %v1757_v18, %v2233_v34 }
 0x162   : > { %v1120_v23 = vadd.f32 %v1869_v20, %v959_v22  ;;  %v1758_v24 = vpop.f32.mrb[52].mxu0  ;;  %v1171_v27 = vmax.f32 %v1117_v21, 0.0 }
 0x163   : > { %v1870_v25 = vpop.f32.mrb[52].mxu1  ;;  %v1759_v26 = vpop.f32.mrb[53].mxu0 }
 0x164   : > { %v1172_v28 = vmax.f32 %v1120_v23, 0.0  ;;  %v1760_v29 = vadd.f32 %v1759_v26, %v1758_v24  ;;  %v1871_v30 = vpop.f32.mrb[53].mxu1  ;;  %v1761_v31 = vpop.f32.mrb[54].mxu0 }
 0x165   : > { %v1872_v32 = vadd.f32 %v1871_v30, %v1870_v25  ;;  %v1873_v33 = vpop.f32.mrb[54].mxu1  ;;  %v1762_v35 = vpop.f32.mrb[55].mxu0 }
 0x166   : > { %v1632_v36 = vpack.c.bf16 %v1172_v28, %v1171_v27  ;;  %v964_v37 = vadd.f32 %v1760_v29, %v2233_v34  ;;  %v1763_v38 = vadd.f32 %v1762_v35, %v1761_v31  ;;  %v1874_v39 = vpop.f32.mrb[55].mxu1 }
 0x167   : > { %v1875_v40 = vadd.f32 %v1874_v39, %v1873_v33 }
 0x168   : > { %1660 = vst [vmem:[%s2241_s10 + $0x60] sm:$0xff] %v1632_v36   ;;  %v1125_v41 = vadd.f32 %v1872_v32, %v964_v37  ;;  %v967_v42 = vadd.f32 %v1763_v38, %v2233_v34 }
 0x16a   : > { %v1128_v43 = vadd.f32 %v1875_v40, %v967_v42  ;;  %v1764_v44 = vpop.f32.mrb[56].mxu0  ;;  %v1173_v47 = vmax.f32 %v1125_v41, 0.0 }
 0x16b   : > { %v1876_v45 = vpop.f32.mrb[56].mxu1  ;;  %v1765_v46 = vpop.f32.mrb[57].mxu0 }
 0x16c   : > { %v1174_v48 = vmax.f32 %v1128_v43, 0.0  ;;  %v1766_v49 = vadd.f32 %v1765_v46, %v1764_v44  ;;  %v1877_v50 = vpop.f32.mrb[57].mxu1  ;;  %v1767_v51 = vpop.f32.mrb[58].mxu0 }
 0x16d   : > { %v1878_v52 = vadd.f32 %v1877_v50, %v1876_v45  ;;  %v1879_v53 = vpop.f32.mrb[58].mxu1  ;;  %v1768_v54 = vpop.f32.mrb[59].mxu0 }
 0x16e   : > { %v1637_v55 = vpack.c.bf16 %v1174_v48, %v1173_v47  ;;  %v972_v56 = vadd.f32 %v1766_v49, %v2233_v34  ;;  %v1769_v57 = vadd.f32 %v1768_v54, %v1767_v51  ;;  %v1880_v58 = vpop.f32.mrb[59].mxu1 }
 0x16f   : > { %v1881_v59 = vadd.f32 %v1880_v58, %v1879_v53 }
 0x170   : > { %1661 = vst [vmem:[%s2241_s10 + $0x68] sm:$0xff] %v1637_v55   ;;  %v1133_v60 = vadd.f32 %v1878_v52, %v972_v56  ;;  %v975_v61 = vadd.f32 %v1769_v57, %v2233_v34 }
 0x172   : > { %v1136_v62 = vadd.f32 %v1881_v59, %v975_v61  ;;  %v1770_v63 = vpop.f32.mrb[60].mxu0  ;;  %v1175_v2 = vmax.f32 %v1133_v60, 0.0 }
 0x173   : > { %v1882_v0 = vpop.f32.mrb[60].mxu1  ;;  %v1771_v1 = vpop.f32.mrb[61].mxu0 }
 0x174   : > { %v1176_v3 = vmax.f32 %v1136_v62, 0.0  ;;  %v1772_v4 = vadd.f32 %v1771_v1, %v1770_v63  ;;  %v1883_v5 = vpop.f32.mrb[61].mxu1  ;;  %v1773_v6 = vpop.f32.mrb[62].mxu0 }
 0x175   : > { %v1884_v7 = vadd.f32 %v1883_v5, %v1882_v0  ;;  %v1885_v8 = vpop.f32.mrb[62].mxu1  ;;  %v1774_v9 = vpop.f32.mrb[63].mxu0 }
 0x176   : > { %v1642_v10 = vpack.c.bf16 %v1176_v3, %v1175_v2  ;;  %v980_v11 = vadd.f32 %v1772_v4, %v2233_v34  ;;  %v1775_v12 = vadd.f32 %v1774_v9, %v1773_v6  ;;  %v1886_v13 = vpop.f32.mrb[63].mxu1 }
 0x177   : > { %v1887_v14 = vadd.f32 %v1886_v13, %v1885_v8 }
 0x178   : > { %1662 = vst [vmem:[%s2241_s10 + $0x70] sm:$0xff] %v1642_v10   ;;  %v1141_v15 = vadd.f32 %v1884_v7, %v980_v11  ;;  %v983_v16 = vadd.f32 %v1775_v12, %v2233_v34 }
 0x17a   : > { %v1144_v17 = vadd.f32 %v1887_v14, %v983_v16  ;;  %v1177_v18 = vmax.f32 %v1141_v15, 0.0 }
 0x17c   : > { %v1178_v19 = vmax.f32 %v1144_v17, 0.0 }
 0x17e   : > { %v1647_v20 = vpack.c.bf16 %v1178_v19, %v1177_v18 }
 0x180   : > { %1663 = vst [vmem:[%s2241_s10 + $0x78] sm:$0xff] %v1647_v20  }
 0x181 PF: > { %s13_s12 = sadd.s32 1, %s2030_s12  }
 0x182   : > { %p10_p4 = scmp.ge.s32.totalorder %s13_s12, 4  }
 0x184   :  { %12 = sbr.rel (!%p10_p4) target bundleno = 1 (0x1), region = 62 }

// kernel: simplenet_forward.4
= control target key start
LH: loop header
LB: loop body
LE: loop exit
PB: predicated region body
PF: predicated region fallthrough
CT: control target
= control target key end

     0   :  { %s3900_s24 = smov 0   ;;  %s4551_s0 = inlined_call_operand.vmem [shape: bf16[2,8,8,128], index: 0, kind: input, shape index: {}]   ;;  %s4552_s1 = inlined_call_operand.vmem [shape: bf16[128,128], index: 1, kind: input, shape index: {}]   ;;  %s4553_s2 = inlined_call_operand.vmem [shape: f32[1,128], index: 2, kind: input, shape index: {}]   ;;  %s4554_s3 = inlined_call_operand.vmem [shape: bf16[9,128,128], index: 3, kind: input, shape index: {}]   ;;  %s4555_s4 = inlined_call_operand.vmem [shape: f32[1,128], index: 4, kind: input, shape index: {}]   ;;  %s4556_s5 = inlined_call_operand.vmem [shape: bf16[128,256], index: 5, kind: input, shape index: {}]   ;;  %s4557_s6 = inlined_call_operand.vmem [shape: f32[1,256], index: 6, kind: input, shape index: {}]   ;;  %s4558_s7 = inlined_call_operand.vmem [shape: bf16[2,8,8,256], index: 7, kind: output, shape index: {}]  }
   0x1 LB: > { %s2955_s25 = sadd.s32 4294967295, %s3857_s24   ;;  %p2959_p0 = scmp.ge.s32.totalorder %s3857_s24, 1  ;;  %s3857_s24 = sphi %s3900_s24, %s17_s24  }
   0x2   : > { %p237_p1 = scmp.lt.s32.totalorder %s3857_s24, 3 }
   0x4   : > { %p238_p2 = pnand %p2959_p0, %p237_p1 }
   0x5   : > { %v3731_v0 = vld [vmem:[%s4552_s1] sm:$0xff] (!%p238_p2)   ;;  %p269_p3 = scmp.lt.s32.totalorder (!%p238_p2), %s2955_s25, 1  ;;  %v3732_v1 = vld [vmem:[%s4552_s1 + $0x8] sm:$0xff] (!%p238_p2)   ;;  %v3733_v2 = vld [vmem:[%s4552_s1 + $0x10] sm:$0xff] (!%p238_p2)   ;;  %v3859_v19 = vmov (!%p238_p2), 0   ;;  %vm581_vm0 = vcmask (!%p238_p2), 1043456  }
   0x6   : > { %241 = sbr.rel (%p238_p2) target bundleno = 906 (0x38a), region = 48  ;;  %3410 = vmatprep.subr.bf16.mxu0 (!%p238_p2), %v3731_v0  ;;  %v3734_v3 = vld [vmem:[%s4552_s1 + $0x18] sm:$0xff] (!%p238_p2)   ;;  %v3735_v5 = vld [vmem:[%s4552_s1 + $0x20] sm:$0xff] (!%p238_p2)   ;;  %v3736_v7 = vld [vmem:[%s4552_s1 + $0x28] sm:$0xff] (!%p238_p2)   ;;  %466 = vst [vmem:[#allocation2 + $0x18] sm:$0xf] (!%p238_p2), %v3859_v19 }
   0x7   : > { %3411 = vmatpush3.bf16.msra.mxu0 (!%p238_p2), %v3731_v0  ;;  %v3744_v6 = vld [vmem:[%s4554_s3 + $0xc0] sm:$0xff] (!%p238_p2)   ;;  %v3746_v8 = vld [vmem:[%s4554_s3 + $0xc8] sm:$0xff] (!%p238_p2)   ;;  %v3737_v9 = vld [vmem:[%s4552_s1 + $0x30] sm:$0xff] (!%p238_p2)   ;;  %467 = vst [vmem:[#allocation2 + $0x1c] sm:$0x1] (!%p238_p2), %v3859_v19  ;;  %vm587_vm2 = vcmask (!%p238_p2), 1040384  }
   0x8   : > { %3412 = vmatprep.subr.bf16.mxu0 (!%p238_p2), %v3732_v1  ;;  %3506 = vmatprep.subr.bf16.mxu1 (!%p238_p2), %v3744_v6  ;;  %v3738_v10 = vld [vmem:[%s4552_s1 + $0x38] sm:$0xff] (!%p238_p2)   ;;  %v3743_v11 = vld [vmem:[%s4554_s3] sm:$0xff] (!%p238_p2)   ;;  %v3745_v14 = vld [vmem:[%s4554_s3 + $0x8] sm:$0xff] (!%p238_p2)   ;;  %460 = vst [vmem:[#allocation2] sm:$0xf] (!%p238_p2), %v3859_v19  ;;  %vm1121_vm9 = vcmask (!%p238_p2), 1042432  }
   0x9   : > { %3507 = vmatpush3.bf16.msra.mxu1 (!%p238_p2), %v3744_v6  ;;  %v3747_v16 = vld [vmem:[%s4554_s3 + $0x10] sm:$0xff] (!%p238_p2)   ;;  %v3749_v18 = vld [vmem:[%s4554_s3 + $0x18] sm:$0xff] (!%p238_p2)   ;;  %461 = vst [vmem:[#allocation2 + $0x4] sm:$0x1] (!%p238_p2), %v3859_v19  ;;  %462 = vst [vmem:[#allocation2 + $0x8] sm:$0xf] (!%p238_p2), %v3859_v19 }
   0xa   : > { %3508 = vmatprep.subr.bf16.mxu1 (!%p238_p2), %v3746_v8  ;;  %v3748_v17 = vld [vmem:[%s4554_s3 + $0xd0] sm:$0xff] (!%p238_p2)   ;;  %463 = vst [vmem:[#allocation2 + $0xc] sm:$0x1] (!%p238_p2), %v3859_v19  ;;  %464 = vst [vmem:[#allocation2 + $0x10] sm:$0xf] (!%p238_p2), %v3859_v19  ;;  %v3750_v20 = vld [vmem:[%s4554_s3 + $0xd8] sm:$0xff] (!%p238_p2)  }
   0xb   : > { %3413 = vmatpush3.bf16.msra.mxu0 (!%p238_p2), %v3732_v1  ;;  %465 = vst [vmem:[#allocation2 + $0x14] sm:$0x1] (!%p238_p2), %v3859_v19  ;;  %468 = vst [vmem:[#allocation2 + $0x20] sm:$0xf] (!%p238_p2), %v3859_v19  ;;  %v3751_v21 = vld [vmem:[%s4554_s3 + $0x20] sm:$0xff] (!%p238_p2)   ;;  %v3753_v23 = vld [vmem:[%s4554_s3 + $0x28] sm:$0xff] (!%p238_p2)  }
   0xc   : > { %3414 = vmatprep.subr.bf16.mxu0 (!%p238_p2), %v3733_v2  ;;  %469 = vst [vmem:[#allocation2 + $0x24] sm:$0x1] (!%p238_p2), %v3859_v19  ;;  %470 = vst [vmem:[#allocation2 + $0x28] sm:$0xf] (!%p238_p2), %v3859_v19  ;;  %v3752_v22 = vld [vmem:[%s4554_s3 + $0xe0] sm:$0xff] (!%p238_p2)   ;;  %v3754_v24 = vld [vmem:[%s4554_s3 + $0xe8] sm:$0xff] (!%p238_p2)  }
   0xd   : > { %s4568_s25 = smov (!%p269_p3, %s2955_s25), 1  ;;  %3509 = vmatpush3.bf16.msra.mxu1 %v3746_v8  ;;  %471 = vst [vmem:[#allocation2 + $0x2c] sm:$0x1] %v3859_v19  ;;  %472 = vst [vmem:[#allocation2 + $0x30] sm:$0xf] %v3859_v19  ;;  %v3755_v25 = vld [vmem:[%s4554_s3 + $0x30] sm:$0xff]  }
   0xe   : > { %s3272_s9 = sshll.u32 %s4568_s25, 5  ;;  %3510 = vmatprep.subr.bf16.mxu1 %v3748_v17  ;;  %473 = vst [vmem:[#allocation2 + $0x34] sm:$0x1] %v3859_v19  ;;  %474 = vst [vmem:[#allocation2 + $0x38] sm:$0xf] %v3859_v19  ;;  %v3756_v26 = vld [vmem:[%s4554_s3 + $0xf0] sm:$0xff]  }
   0xf   : > { %s3923_s12 = scalar_lea.vmem %s4551_s0, %s3272_s9  ;;  %3415 = vmatpush3.bf16.msra.mxu0 %v3733_v2  ;;  %475 = vst [vmem:[#allocation2 + $0x3c] sm:$0x1] %v3859_v19  ;;  %476 = vst [vmem:[#allocation2 + $0x40] sm:$0xf] %v3859_v19  ;;  %v3757_v27 = vld [vmem:[%s4554_s3 + $0x38] sm:$0xff]   ;;  %v4015_v29 = vld [vmem:[%s4554_s3 + $0x40] sm:$0xff]  }
  0x10   : > { %v3739_v4 = vld [vmem:[%s3923_s12] sm:$0xff]   ;;  %3416 = vmatprep.subr.bf16.mxu0 %v3734_v3  ;;  %v3740_v12 = vld [vmem:[%s3923_s12 + $0x8] sm:$0xff]   ;;  %v3741_v13 = vld [vmem:[%s3923_s12 + $0x10] sm:$0xff]   ;;  %477 = vst [vmem:[#allocation2 + $0x44] sm:$0x1] %v3859_v19  ;;  %vm1122_vm10 = vcmask 1046532  }
  0x11   : > { %3426 = vmatprep.mubr.bf16.mxu0 %v3739_v4  ;;  %v3742_v15 = vld [vmem:[%s3923_s12 + $0x18] sm:$0xff]   ;;  %3511 = vmatpush3.bf16.msra.mxu1 %v3748_v17  ;;  %478 = vst [vmem:[#allocation2 + $0x48] sm:$0xf] %v3859_v19  ;;  %479 = vst [vmem:[#allocation2 + $0x4c] sm:$0x1] %v3859_v19  ;;  %v4020_v30 = vld [vmem:[%s4554_s3 + $0x100] sm:$0xff]  }
  0x12   : > { %3512 = vmatprep.subr.bf16.mxu1 %v3750_v20  ;;  %v3758_v28 = vld [vmem:[%s4554_s3 + $0xf8] sm:$0xff]   ;;  %v812_v31 = vld [vmem:[#allocation2] sm:$0xf]  ;;  %vm582_vm1 = vsmask.f32 7938  ;;  %vm4241_vm11 = vmor %vm1121_vm9, %vm1122_vm10  ;;  %s3273_s12 = sshll.u32 %s4568_s25, 6 }
  0x13   : > { %3417 = vmatpush3.bf16.msra.mxu0 %v3734_v3  ;;  %v4027_v32 = vld [vmem:[%s4553_s2] ss:$0 sm:$0xff]  ;;  %v832_v33 = vshrl.u32 %v812_v31, 16  ;;  %v835_v34 = vshll.u32 %v812_v31, 16  ;;  %vm588_vm3 = vsmask.f32 256  ;;  %vm4044_vm4 = vmand %vm581_vm0, %vm582_vm1  ;;  %s4538_s19 = scalar_lea.vmem %s4558_s7, %s3273_s12 }
  0x14   : > { %3418 = vmatprep.subr.bf16.mxu0 %v3735_v5  ;;  %v4037_v51 = vld [vmem:[#allocation2 + $0x4] sm:$0x1]  ;;  %v599_v57 = vld [vmem:[#allocation2 + $0x18] sm:$0xf]  ;;  %v602_v58 = vld [vmem:[#allocation2 + $0x1c] sm:$0x1] }
  0x15   : > { %3513 = vmatpush3.bf16.msra.mxu1 %v3750_v20  ;;  %v4032_v43 = vrot.slane %v832_v33, 4  ;;  %v4034_v44 = vrot.slane %v835_v34, 5  ;;  %v841_v55 = vshll.u32 %v4037_v51, 16  ;;  %v584_v1 = vld [vmem:[#allocation2 + $0x8] sm:$0xf]  ;;  %vm4051_vm5 = vmand %vm587_vm2, %vm588_vm3  ;;  %v3823_v0 = vld [vmem:[%s4554_s3 + $0x220] sm:$0xff]  }
  0x16   : > { %3514 = vmatprep.subr.bf16.mxu1 %v3752_v22  ;;  %v590_v8 = vld [vmem:[#allocation2 + $0xc] sm:$0x1]  ;;  %v593_v31 = vld [vmem:[#allocation2 + $0x10] sm:$0xf]  ;;  %v596_v33 = vld [vmem:[#allocation2 + $0x14] sm:$0x1] }
  0x17   : > { %3419 = vmatpush3.bf16.msra.mxu0 %v3735_v5  ;;  %v838_v54 = vor.u32 %v4034_v44, %v4032_v43  ;;  %vm828_vm6 = vsmask.f32 3328  ;;  %vm829_vm7 = vsmask.f32 7440 }
  0x18   : > { %3420 = vmatprep.subr.bf16.mxu0 %v3736_v7  ;;  %vm4122_vm8 = vmor %vm828_vm6, %vm829_vm7 }
  0x19   : > { %3515 = vmatpush3.bf16.msra.mxu1 %v3752_v22  ;;  %v608_v22 = vld [vmem:[#allocation2 + $0x24] sm:$0x1] }
  0x1a   : > { %3516 = vmatprep.subr.bf16.mxu1 %v3754_v24 }
  0x1b   : > { %3421 = vmatpush3.bf16.msra.mxu0 %v3736_v7 }
  0x1c   : > { %3422 = vmatprep.subr.bf16.mxu0 %v3737_v9 }
  0x1d   : > { %3517 = vmatpush3.bf16.msra.mxu1 %v3754_v24 }
  0x1e   : > { %3518 = vmatprep.subr.bf16.mxu1 %v3756_v26 }
  0x1f   : > { %3423 = vmatpush3.bf16.msra.mxu0 %v3737_v9 }
  0x20   : > { %3424 = vmatprep.subr.bf16.mxu0 %v3738_v10 }
  0x21   : > { %3519 = vmatpush3.bf16.msra.mxu1 %v3756_v26 }
  0x22   : > { %3520 = vmatprep.subr.bf16.mxu1 %v3758_v28 }
  0x23   : > { %3425 = vmatpush3.bf16.msra.mxu0 %v3738_v10 }
  0x24   : > { %3434 = vmatprep.subr.bf16.mxu0 %v3743_v11 }
  0x25   : > { %3521 = vmatpush3.bf16.msra.mxu1 %v3758_v28 }
  0x26   : > { %3427 = vmatmul.mubr.bf16.vlgmr.msra.gmra.mrb[0].mxu0 %v3740_v12  ;;  %3530 = vmatprep.subr.bf16.mxu1 %v4020_v30 }
  0x27   : > { %3430 = vmatprep.mubr.bf16.mxu0 %v3741_v13  ;;  %3435 = vmatpush3.bf16.msra.mxu0 %v3743_v11 }
  0x28   : > { %3436 = vmatprep.subr.bf16.mxu0 %v3745_v14 }
  0x2b   : > { %3437 = vmatpush3.bf16.msra.mxu0 %v3745_v14 }
  0x2c   : > { %3438 = vmatprep.subr.bf16.mxu0 %v3747_v16 }
  0x2e   : > { %3431 = vmatmul.mubr.bf16.gmra.mrb[4].mxu0 %v3742_v15 }
  0x2f   : > { %3439 = vmatpush3.bf16.msra.mxu0 %v3747_v16  ;;  %v605_v16 = vld [vmem:[#allocation2 + $0x20] sm:$0xf] }
  0x30   : > { %3440 = vmatprep.subr.bf16.mxu0 %v3749_v18 }
  0x33   : > { %3441 = vmatpush3.bf16.msra.mxu0 %v3749_v18 }
  0x34   : > { %3442 = vmatprep.subr.bf16.mxu0 %v3751_v21 }
  0x37   : > { %3443 = vmatpush3.bf16.msra.mxu0 %v3751_v21 }
  0x38   : > { %3444 = vmatprep.subr.bf16.mxu0 %v3753_v23 }
  0x3b   : > { %3445 = vmatpush3.bf16.msra.mxu0 %v3753_v23 }
  0x3c   : > { %3446 = vmatprep.subr.bf16.mxu0 %v3755_v25 }
  0x3f   : > { %3447 = vmatpush3.bf16.msra.mxu0 %v3755_v25 }
  0x40   : > { %3448 = vmatprep.subr.bf16.mxu0 %v3757_v27 }
  0x43   : > { %3449 = vmatpush3.bf16.msra.mxu0 %v3757_v27 }
  0x44   : > { %3458 = vmatprep.subr.bf16.mxu0 %v4015_v29 }
  0xf9   : > { %v3428_v35 = vpop.f32.mrb[0].mxu0 }
  0xfa   : > { %v426_v36 = vadd.f32 %v3428_v35, %v4027_v32  ;;  %v417_v37 = vpop.f32.mrb[1].mxu0 }
  0xfb   : > { %v418_v38 = vadd.f32 %v4027_v32, %v417_v37  ;;  %v3429_v39 = vpop.f32.mrb[2].mxu0 }
  0xfc   : > { %v450_v40 = vmax.f32 %v426_v36, 0.0  ;;  %v429_v41 = vadd.f32 %v3429_v39, %v4027_v32  ;;  %v420_v42 = vpop.f32.mrb[3].mxu0 }
  0xfd   : > { %v448_v45 = vmax.f32 %v418_v38, 0.0  ;;  %v421_v46 = vadd.f32 %v4027_v32, %v420_v42 }
  0xfe   : > { %v3276_v47 = vpack.c.bf16 %v450_v40, %v450_v40  ;;  %v451_v48 = vmax.f32 %v429_v41, 0.0 }
  0xff   : > { %v3274_v49 = vpack.c.bf16 %v448_v45, %v448_v45  ;;  %v449_v50 = vmax.f32 %v421_v46, 0.0 }
 0x100   : > { %v517_v52 = vshrl.u32 %v3276_v47, 16  ;;  %v3277_v53 = vpack.c.bf16 %v451_v48, %v451_v48  ;;  %v520_v56 = vshll.u32 %v3276_v47, 16 }
 0x101   : > { %v501_v59 = vshrl.u32 %v3274_v49, 16  ;;  %v504_v60 = vshll.u32 %v3274_v49, 16  ;;  %v3275_v61 = vpack.c.bf16 %v449_v50, %v449_v50  ;;  %v3432_v62 = vpop.f32.mrb[4].mxu0 }
 0x102   : > { %v519_v63 = vrot.slane %v517_v52, 7  ;;  %v525_v2 = vshrl.u32 %v3277_v53, 16  ;;  %v528_v3 = vshll.u32 %v3277_v53, 16  ;;  %v442_v4 = vadd.f32 %v3432_v62, %v4027_v32  ;;  %v433_v5 = vpop.f32.mrb[5].mxu0  ;;  %v4074_v53 = vld [vmem:[#allocation2] sm:$0xe] }
 0x103   : > { %v503_v7 = vrot.slane %v501_v59, 7  ;;  %v509_v9 = vshrl.u32 %v3275_v61, 16  ;;  %v512_v10 = vshll.u32 %v3275_v61, 16  ;;  %v434_v11 = vadd.f32 %v4027_v32, %v433_v5  ;;  %v3433_v12 = vpop.f32.mrb[6].mxu0  ;;  %v626_v62 = vld [vmem:[#allocation2 + $0x3c] sm:$0x1] }
 0x104   : > { %v522_v13 = vor.u32 %v520_v56, %v519_v63  ;;  %v523_v14 = vrot.slane %v519_v63, 4  ;;  %v527_v15 = vrot.slane %v525_v2, 7  ;;  %v454_v17 = vmax.f32 %v442_v4, 0.0  ;;  %v436_v18 = vpop.f32.mrb[7].mxu0  ;;  %v623_v56 = vld [vmem:[#allocation2 + $0x38] sm:$0xf] }
 0x105   : > { %v506_v20 = vor.u32 %v504_v60, %v503_v7  ;;  %v507_v21 = vrot.slane %v503_v7, 4  ;;  %v511_v23 = vrot.slane %v509_v9, 7  ;;  %v452_v24 = vmax.f32 %v434_v11, 0.0  ;;  %v614_v63 = vld [vmem:[#allocation2 + $0x2c] sm:$0x1] }
 0x106   : > { %v600_v25 = vsel %vm4044_vm4, %v522_v13, %v599_v57  ;;  %v603_v26 = vsel %vm4051_vm5, %v523_v14, %v602_v58  ;;  %v530_v27 = vor.u32 %v528_v3, %v527_v15  ;;  %v531_v28 = vrot.slane %v527_v15, 4  ;;  %v611_v57 = vld [vmem:[#allocation2 + $0x28] sm:$0xf]  ;;  %v629_v14 = vld [vmem:[#allocation2 + $0x40] sm:$0xf] }
 0x107   : > { %601 = vst [vmem:[#allocation2 + $0x18] sm:$0xf] %v600_v25  ;;  %604 = vst [vmem:[#allocation2 + $0x1c] sm:$0x1] %v603_v26  ;;  %v585_v34 = vsel %vm4044_vm4, %v506_v20, %v584_v1  ;;  %v591_v35 = vsel %vm4051_vm5, %v507_v21, %v590_v8  ;;  %v514_v36 = vor.u32 %v512_v10, %v511_v23  ;;  %v515_v37 = vrot.slane %v511_v23, 4  ;;  %v3765_v20 = vld [vmem:[%s4554_s3 + $0x48] sm:$0xff]  }
 0x108   : > { %586 = vst [vmem:[#allocation2 + $0x8] sm:$0xf] %v585_v34  ;;  %592 = vst [vmem:[#allocation2 + $0xc] sm:$0x1] %v591_v35  ;;  %v606_v38 = vsel %vm4044_vm4, %v530_v27, %v605_v16  ;;  %v609_v39 = vsel %vm4051_vm5, %v531_v28, %v608_v22  ;;  %v3280_v40 = vpack.c.bf16 %v454_v17, %v454_v17  ;;  %v4083_v3 = vrot.slane %v841_v55, 5  ;;  %v3768_v34 = vld [vmem:[%s4554_s3 + $0x50] sm:$0xff]  }
 0x109   : > { %v3278_v41 = vpack.c.bf16 %v452_v24, %v452_v24  ;;  %607 = vst [vmem:[#allocation2 + $0x20] sm:$0xf] %v606_v38  ;;  %610 = vst [vmem:[#allocation2 + $0x24] sm:$0x1] %v609_v39  ;;  %v594_v42 = vsel %vm4044_vm4, %v514_v36, %v593_v31  ;;  %v597_v45 = vsel %vm4051_vm5, %v515_v37, %v596_v33  ;;  %v3026_v4 = vrot.slane %v4074_v53, 9  ;;  %v3766_v24 = vld [vmem:[%s4554_s3 + $0x108] sm:$0xff]  }
 0x10a   : > { %v445_v46 = vadd.f32 %v3433_v12, %v4027_v32  ;;  %v437_v47 = vadd.f32 %v4027_v32, %v436_v18  ;;  %595 = vst [vmem:[#allocation2 + $0x10] sm:$0xf] %v594_v42  ;;  %598 = vst [vmem:[#allocation2 + $0x14] sm:$0x1] %v597_v45  ;;  %v549_v48 = vshrl.u32 %v3280_v40, 16  ;;  %v552_v49 = vshll.u32 %v3280_v40, 16 }
 0x10b   : > { %v533_v50 = vshrl.u32 %v3278_v41, 16  ;;  %v536_v52 = vshll.u32 %v3278_v41, 16  ;;  %v4079_v32 = vrot.slane %v838_v54, 4  ;;  %v632_v15 = vld [vmem:[#allocation2 + $0x44] sm:$0x1] }
 0x10c   : > { %v455_v58 = vmax.f32 %v445_v46, 0.0  ;;  %v453_v59 = vmax.f32 %v437_v47, 0.0  ;;  %v551_v60 = vrot.slane %v549_v48, 7  ;;  %v617_v16 = vld [vmem:[#allocation2 + $0x30] sm:$0xf] }
 0x10d   : > { %v535_v61 = vrot.slane %v533_v50, 7  ;;  %v620_v17 = vld [vmem:[#allocation2 + $0x34] sm:$0x1] }
 0x10e   : > { %v3281_v1 = vpack.c.bf16 %v455_v58, %v455_v58  ;;  %v3279_v2 = vpack.c.bf16 %v453_v59, %v453_v59  ;;  %v554_v5 = vor.u32 %v552_v49, %v551_v60  ;;  %v555_v7 = vrot.slane %v551_v60, 4  ;;  %v3773_v60 = vld [vmem:[%s4554_s3 + $0x58] sm:$0xff]  }
 0x10f   : > { %v538_v8 = vor.u32 %v536_v52, %v535_v61  ;;  %v539_v9 = vrot.slane %v535_v61, 4  ;;  %v3759_v18 = vld [vmem:[#allocation2] ss:$8 sps:$4 sm:$0xff]   ;;  %v4104_v36 = vld [vmem:[#allocation2 + $0xc] sm:$0x1] }
 0x110   : > { %v557_v10 = vshrl.u32 %v3281_v1, 16  ;;  %v560_v11 = vshll.u32 %v3281_v1, 16  ;;  %v541_v12 = vshrl.u32 %v3279_v2, 16  ;;  %v544_v43 = vshll.u32 %v3279_v2, 16  ;;  %3450 = vmatprep.mubr.bf16.mxu0 %v3759_v18  ;;  %v3764_v26 = vld [vmem:[#allocation2 + $0x18] ss:$8 sps:$4 sm:$0xff]  }
 0x111   : > { %v624_v44 = vsel %vm4044_vm4, %v554_v5, %v623_v56  ;;  %v627_v54 = vsel %vm4051_vm5, %v555_v7, %v626_v62  ;;  %v612_v55 = vsel %vm4044_vm4, %v538_v8, %v611_v57  ;;  %v615_v13 = vsel %vm4051_vm5, %v539_v9, %v614_v63  ;;  %v3761_v23 = vld [vmem:[#allocation2 + $0x10] ss:$8 sps:$4 sm:$0xff]   ;;  %v814_v35 = vld [vmem:[#allocation2 + $0x8] sm:$0xf]  ;;  %v4117_v46 = vld [vmem:[#allocation2 + $0xc] sm:$0x1] }
 0x112   : > { %625 = vst [vmem:[#allocation2 + $0x38] sm:$0xf] %v624_v44  ;;  %628 = vst [vmem:[#allocation2 + $0x3c] sm:$0x1] %v627_v54  ;;  %v559_v21 = vrot.slane %v557_v10, 7  ;;  %v543_v22 = vrot.slane %v541_v12, 7  ;;  %3451 = vmatmul.mubr.bf16.vlgmr.msra.gmra.mrb[8].mxu0 %v3761_v23  ;;  %v844_v1 = vsel %vm4122_vm8, %v4079_v32, %v4083_v3 }
 0x113   : > { %613 = vst [vmem:[#allocation2 + $0x28] sm:$0xf] %v612_v55  ;;  %616 = vst [vmem:[#allocation2 + $0x2c] sm:$0x1] %v615_v13  ;;  %v3762_v25 = vld [vmem:[#allocation2 + $0x8] ss:$8 sps:$4 sm:$0xff]   ;;  %3459 = vmatpush3.bf16.msra.mxu0 %v4015_v29 }
 0x114   : > { %v562_v27 = vor.u32 %v560_v11, %v559_v21  ;;  %v563_v28 = vrot.slane %v559_v21, 4  ;;  %v546_v31 = vor.u32 %v544_v43, %v543_v22  ;;  %v547_v33 = vrot.slane %v543_v22, 4  ;;  %3522 = vmatprep.mubr.bf16.mxu1 %v3762_v25  ;;  %v1480_v39 = vld [vmem:[#allocation2 + $0x8] sm:$0xf]  ;;  %v3771_v29 = vld [vmem:[%s4554_s3 + $0x110] sm:$0xff]   ;;  %3460 = vmatprep.subr.bf16.mxu0 %v3765_v20  ;;  %v3774_v44 = vld [vmem:[%s4554_s3 + $0x118] sm:$0xff]  }
 0x115   : > { %v846_v37 = vshrl.u32 %v814_v35, 16  ;;  %v849_v38 = vshll.u32 %v814_v35, 16  ;;  %3523 = vmatmul.mubr.bf16.vlgmr.msra.gmra.mrb[0].mxu1 %v3764_v26  ;;  %v1482_v47 = vld [vmem:[#allocation2 + $0x10] sm:$0xf]  ;;  %v855_v49 = vshll.u32 %v4104_v36, 16  ;;  %v1497_v52 = vshrl.u32 %v1480_v39, 16 }
 0x116   : > { %v630_v40 = vsel %vm4044_vm4, %v562_v27, %v629_v14  ;;  %v633_v41 = vsel %vm4051_vm5, %v563_v28, %v632_v15  ;;  %v618_v42 = vsel %vm4044_vm4, %v546_v31, %v617_v16  ;;  %v621_v45 = vsel %vm4051_vm5, %v547_v33, %v620_v17  ;;  %3531 = vmatpush3.bf16.msra.mxu1 %v4020_v30  ;;  %v4127_v50 = vld [vmem:[#allocation2 + $0x14] sm:$0x1]  ;;  %v816_v56 = vld [vmem:[#allocation2 + $0x10] sm:$0xf]  ;;  %v818_v11 = vld [vmem:[#allocation2 + $0x18] sm:$0xf] }
 0x117   : > { %631 = vst [vmem:[#allocation2 + $0x40] sm:$0xf] %v630_v40  ;;  %634 = vst [vmem:[#allocation2 + $0x44] sm:$0x1] %v633_v41  ;;  %v848_v6 = vrot.slane %v846_v37, 4  ;;  %v851_v48 = vrot.slane %v849_v38, 5  ;;  %3532 = vmatprep.subr.bf16.mxu1 %v3766_v24  ;;  %3461 = vmatpush3.bf16.msra.mxu0 %v3765_v20 }
 0x118   : > { %619 = vst [vmem:[#allocation2 + $0x30] sm:$0xf] %v618_v42  ;;  %622 = vst [vmem:[#allocation2 + $0x34] sm:$0x1] %v621_v45  ;;  %v1500_v57 = vshll.u32 %v1480_v39, 16  ;;  %v1506_v58 = vshll.u32 %v4117_v46, 16  ;;  %3462 = vmatprep.subr.bf16.mxu0 %v3768_v34 }
 0x119   : > { %v1511_v30 = vshrl.u32 %v1482_v47, 16  ;;  %v1514_v59 = vshll.u32 %v1482_v47, 16  ;;  %v4133_v61 = vld [vmem:[#allocation2 + $0x14] sm:$0x1]  ;;  %v852_v63 = vor.u32 %v851_v48, %v848_v6  ;;  %v857_v2 = vrot.slane %v855_v49, 5  ;;  %v3775_v13 = vld [vmem:[%s4554_s3 + $0x60] sm:$0xff]  }
 0x11a   : > { %v3767_v62 = vld [vmem:[#allocation2 + $0x20] ss:$8 sps:$4 sm:$0xff]   ;;  %v1499_v5 = vrot.slane %v1497_v52, 4  ;;  %3533 = vmatpush3.bf16.msra.mxu1 %v3766_v24  ;;  %v1502_v8 = vrot.slane %v1500_v57, 5  ;;  %v1508_v9 = vrot.slane %v1506_v58, 5  ;;  %v1520_v43 = vshll.u32 %v4127_v50, 16 }
 0x11b   : > { %3454 = vmatprep.mubr.bf16.mxu0 %v3767_v62  ;;  %v853_v7 = vrot.slane %v852_v63, 4  ;;  %v1513_v10 = vrot.slane %v1511_v30, 4  ;;  %3534 = vmatprep.subr.bf16.mxu1 %v3771_v29  ;;  %v1516_v12 = vrot.slane %v1514_v59, 5  ;;  %v860_v54 = vshrl.u32 %v816_v56, 16  ;;  %v4148_v14 = vld [vmem:[#allocation2 + $0x1c] sm:$0x1] }
 0x11c   : > { %v863_v55 = vshll.u32 %v816_v56, 16  ;;  %3463 = vmatpush3.bf16.msra.mxu0 %v3768_v34  ;;  %v1503_v3 = vor.u32 %v1502_v8, %v1499_v5  ;;  %v869_v15 = vshll.u32 %v4133_v61, 16  ;;  %v874_v16 = vshrl.u32 %v818_v11, 16  ;;  %v820_v17 = vld [vmem:[#allocation2 + $0x20] sm:$0xf]  ;;  %v3777_v40 = vld [vmem:[%s4554_s3 + $0x68] sm:$0xff]  }
 0x11d   : > { %v858_v32 = vsel %vm4122_vm8, %v853_v7, %v857_v2  ;;  %v1517_v21 = vor.u32 %v1516_v12, %v1513_v10  ;;  %3464 = vmatprep.subr.bf16.mxu0 %v3773_v60  ;;  %v1522_v26 = vrot.slane %v1520_v43, 5  ;;  %v3776_v27 = vld [vmem:[%s4554_s3 + $0x120] sm:$0xff]   ;;  %v862_v28 = vrot.slane %v860_v54, 4  ;;  %v822_v35 = vld [vmem:[#allocation2 + $0x28] sm:$0xf]  ;;  %v3780_v12 = vld [vmem:[%s4554_s3 + $0x130] sm:$0xff]  }
 0x11e   : > { %v3014_v20 = vcombine.low %v844_v1, %v858_v32  ;;  %v3772_v23 = vld [vmem:[#allocation2 + $0x38] ss:$8 sps:$4 sm:$0xff]   ;;  %3535 = vmatpush3.bf16.msra.mxu1 %v3771_v29  ;;  %v1504_v24 = vrot.slane %v1503_v3, 4  ;;  %v865_v31 = vrot.slane %v863_v55, 5  ;;  %v876_v33 = vrot.slane %v874_v16, 4  ;;  %v3778_v41 = vld [vmem:[%s4554_s3 + $0x128] sm:$0xff]  }
 0x11f   : > { %v3769_v18 = vld [vmem:[#allocation2 + $0x30] ss:$8 sps:$4 sm:$0xff]   ;;  %v1518_v25 = vrot.slane %v1517_v21, 4  ;;  %3536 = vmatprep.subr.bf16.mxu1 %v3774_v44  ;;  %v877_v34 = vshll.u32 %v818_v11, 16  ;;  %v1126_v37 = vrot.slane %v4037_v51, 5  ;;  %v883_v42 = vshll.u32 %v4148_v14, 16 }
 0x120   : > { %v3770_v22 = vld [vmem:[#allocation2 + $0x28] ss:$8 sps:$4 sm:$0xff]   ;;  %3455 = vmatmul.mubr.bf16.gmra.mrb[12].mxu0 %v3769_v18  ;;  %v1509_v38 = vsel %vm4122_vm8, %v1504_v24, %v1508_v9  ;;  %v888_v45 = vshrl.u32 %v820_v17, 16  ;;  %v866_v47 = vor.u32 %v865_v31, %v862_v28  ;;  %v4166_v48 = vld [vmem:[#allocation2 + $0x24] sm:$0x1]  ;;  %v891_v49 = vshll.u32 %v820_v17, 16 }
 0x121   : > { %3526 = vmatprep.mubr.bf16.mxu1 %v3770_v22  ;;  %3474 = vmatprep.mubr.bf16.mxu0 %v3014_v20  ;;  %v1523_v39 = vsel %vm4122_vm8, %v1518_v25, %v1522_v26  ;;  %v879_v6 = vrot.slane %v877_v34, 5  ;;  %v1484_v52 = vld [vmem:[#allocation2 + $0x18] sm:$0xf]  ;;  %v871_v56 = vrot.slane %v869_v15, 5  ;;  %v885_v57 = vrot.slane %v883_v42, 5  ;;  %v3779_v11 = vld [vmem:[%s4554_s3 + $0x70] sm:$0xff]  }
 0x122   : > { %3527 = vmatmul.mubr.bf16.gmra.mrb[4].mxu1 %v3772_v23  ;;  %3465 = vmatpush3.bf16.msra.mxu0 %v3773_v60  ;;  %v3106_v29 = vcombine.low %v1509_v38, %v1523_v39  ;;  %v4168_v58 = vld [vmem:[#allocation2 + $0x2c] sm:$0x1]  ;;  %v890_v30 = vrot.slane %v888_v45, 4  ;;  %v902_v59 = vshrl.u32 %v822_v35, 16  ;;  %v867_v60 = vrot.slane %v866_v47, 4  ;;  %v3781_v28 = vld [vmem:[%s4554_s3 + $0x78] sm:$0xff]  }
 0x123   : > { %3537 = vmatpush3.bf16.msra.mxu1 %v3774_v44  ;;  %3466 = vmatprep.subr.bf16.mxu0 %v3775_v13  ;;  %v880_v62 = vor.u32 %v879_v6, %v876_v33  ;;  %v893_v63 = vrot.slane %v891_v49, 5  ;;  %v905_v1 = vshll.u32 %v822_v35, 16  ;;  %v4170_v2 = vld [vmem:[#allocation2 + $0x1c] sm:$0x1]  ;;  %v897_v5 = vshll.u32 %v4166_v48, 16 }
 0x124   : > { %3538 = vmatprep.subr.bf16.mxu1 %v3776_v27  ;;  %3546 = vmatprep.mubr.bf16.mxu1 %v3106_v29  ;;  %v904_v7 = vrot.slane %v902_v59, 4  ;;  %v911_v8 = vshll.u32 %v4168_v58, 16  ;;  %v1486_v9 = vld [vmem:[#allocation2 + $0x20] sm:$0xf]  ;;  %v1525_v10 = vshrl.u32 %v1484_v52, 16  ;;  %v872_v43 = vsel %vm4122_vm8, %v867_v60, %v871_v56  ;;  %v3782_v38 = vld [vmem:[%s4554_s3 + $0x138] sm:$0xff]  }
 0x125   : > { %v881_v44 = vrot.slane %v880_v62, 4  ;;  %v894_v54 = vor.u32 %v893_v63, %v890_v30  ;;  %v907_v55 = vrot.slane %v905_v1, 5  ;;  %v4182_v3 = vld [vmem:[#allocation2 + $0x24] sm:$0x1]  ;;  %v1528_v15 = vshll.u32 %v1484_v52, 16 }
 0x126   : > { %3467 = vmatpush3.bf16.msra.mxu0 %v3775_v13  ;;  %v913_v32 = vrot.slane %v911_v8, 5  ;;  %v1527_v13 = vrot.slane %v1525_v10, 4  ;;  %v1534_v16 = vshll.u32 %v4170_v2, 16  ;;  %v1539_v21 = vshrl.u32 %v1486_v9, 16  ;;  %v1488_v22 = vld [vmem:[#allocation2 + $0x28] sm:$0xf] }
 0x127   : > { %3539 = vmatpush3.bf16.msra.mxu1 %v3776_v27  ;;  %3468 = vmatprep.subr.bf16.mxu0 %v3777_v40  ;;  %v886_v17 = vsel %vm4122_vm8, %v881_v44, %v885_v57  ;;  %v895_v18 = vrot.slane %v894_v54, 4  ;;  %v908_v20 = vor.u32 %v907_v55, %v904_v7  ;;  %v899_v24 = vrot.slane %v897_v5, 5  ;;  %v1490_v27 = vld [vmem:[#allocation2 + $0x30] sm:$0xf]  ;;  %v4196_v42 = vld [vmem:[#allocation2 + $0x2c] sm:$0x1] }
 0x128   : > { %3540 = vmatprep.subr.bf16.mxu1 %v3778_v41  ;;  %v4187_v23 = vcombine.low %v872_v43, %v886_v17  ;;  %v1530_v25 = vrot.slane %v1528_v15, 5  ;;  %v1542_v26 = vshll.u32 %v1486_v9, 16  ;;  %v1536_v33 = vrot.slane %v1534_v16, 5  ;;  %v824_v52 = vld [vmem:[#allocation2 + $0x30] sm:$0xf]  ;;  %v3783_v56 = vld [vmem:[%s4554_s3 + $0x80] sm:$0xff]  }
 0x129   : > { %v909_v31 = vrot.slane %v908_v20, 4  ;;  %v1541_v34 = vrot.slane %v1539_v21, 4  ;;  %v1548_v35 = vshll.u32 %v4182_v3, 16  ;;  %v1556_v45 = vshll.u32 %v1488_v22, 16  ;;  %v4206_v60 = vld [vmem:[#allocation2 + $0x34] sm:$0x1] }
 0x12a   : > { %3469 = vmatpush3.bf16.msra.mxu0 %v3777_v40  ;;  %v1531_v39 = vor.u32 %v1530_v25, %v1527_v13  ;;  %v1544_v40 = vrot.slane %v1542_v26, 5  ;;  %v900_v29 = vsel %vm4122_vm8, %v895_v18, %v899_v24  ;;  %v1562_v6 = vshll.u32 %v4196_v42, 16  ;;  %v3784_v1 = vld [vmem:[%s4554_s3 + $0x140] sm:$0xff]   ;;  %v826_v9 = vld [vmem:[#allocation2 + $0x38] sm:$0xf]  ;;  %v3785_v26 = vld [vmem:[%s4554_s3 + $0x88] sm:$0xff]  }
 0x12b   : > { %3541 = vmatpush3.bf16.msra.mxu1 %v3778_v41  ;;  %3470 = vmatprep.subr.bf16.mxu0 %v3779_v11  ;;  %v1553_v41 = vshrl.u32 %v1488_v22, 16  ;;  %v914_v47 = vsel %vm4122_vm8, %v909_v31, %v913_v32  ;;  %v1567_v49 = vshrl.u32 %v1490_v27, 16  ;;  %v1550_v59 = vrot.slane %v1548_v35, 5  ;;  %v4212_v44 = vld [vmem:[#allocation2 + $0x34] sm:$0x1] }
 0x12c   : > { %3542 = vmatprep.subr.bf16.mxu1 %v3780_v12  ;;  %v1532_v57 = vrot.slane %v1531_v39, 4  ;;  %v1545_v30 = vor.u32 %v1544_v40, %v1541_v34  ;;  %v3016_v63 = vcombine.low %v900_v29, %v914_v47  ;;  %v1558_v5 = vrot.slane %v1556_v45, 5  ;;  %v4219_v17 = vld [vmem:[#allocation2 + $0x3c] sm:$0x1]  ;;  %v1098_v21 = vld [vmem:[#allocation2 + $0x8] sm:$0xe] }
 0x12d   : > { %v1555_v62 = vrot.slane %v1553_v41, 4  ;;  %v1569_v7 = vrot.slane %v1567_v49, 4  ;;  %v1570_v8 = vshll.u32 %v1490_v27, 16  ;;  %v1576_v43 = vshll.u32 %v4206_v60, 16  ;;  %v3786_v40 = vld [vmem:[%s4554_s3 + $0x148] sm:$0xff]  }
 0x12e   : > { %3471 = vmatpush3.bf16.msra.mxu0 %v3779_v11  ;;  %v1546_v10 = vrot.slane %v1545_v30, 4  ;;  %v1564_v11 = vrot.slane %v1562_v6, 5  ;;  %v916_v54 = vshrl.u32 %v824_v52, 16  ;;  %v919_v32 = vshll.u32 %v824_v52, 16  ;;  %v4231_v49 = vld [vmem:[#allocation2 + $0x3c] sm:$0x1] }
 0x12f   : > { %3543 = vmatpush3.bf16.msra.mxu1 %v3780_v12  ;;  %3472 = vmatprep.subr.bf16.mxu0 %v3781_v28  ;;  %v1559_v55 = vor.u32 %v1558_v5, %v1555_v62  ;;  %v1572_v12 = vrot.slane %v1570_v8, 5  ;;  %v925_v13 = vshll.u32 %v4212_v44, 16  ;;  %v1537_v15 = vsel %vm4122_vm8, %v1532_v57, %v1536_v33  ;;  %v3787_v30 = vld [vmem:[%s4554_s3 + $0x90] sm:$0xff]   ;;  %v1494_v62 = vld [vmem:[#allocation2 + $0x40] sm:$0xf] }
 0x130   : > { %3544 = vmatprep.subr.bf16.mxu1 %v3782_v38  ;;  %v1551_v16 = vsel %vm4122_vm8, %v1546_v10, %v1550_v59  ;;  %v918_v18 = vrot.slane %v916_v54, 4  ;;  %v930_v20 = vshrl.u32 %v826_v9, 16  ;;  %v1578_v25 = vrot.slane %v1576_v43, 5  ;;  %v4245_v8 = vld [vmem:[#allocation2 + $0x44] sm:$0x1] }
 0x131   : > { %v1560_v22 = vrot.slane %v1559_v55, 4  ;;  %v1573_v24 = vor.u32 %v1572_v12, %v1569_v7  ;;  %v921_v27 = vrot.slane %v919_v32, 5  ;;  %v3107_v31 = vcombine.low %v1537_v15, %v1551_v16  ;;  %v1763_v32 = vld [vmem:[#allocation2 + $0x10] sm:$0xe]  ;;  %v3841_v7 = vld [vmem:[%s4556_s5 + $0x44] ss:$8 sps:$4 sm:$0xff]  }
 0x132   : > { %3473 = vmatpush3.bf16.msra.mxu0 %v3781_v28  ;;  %v1492_v28 = vld [vmem:[#allocation2 + $0x38] sm:$0xf]  ;;  %v932_v33 = vrot.slane %v930_v20, 4  ;;  %v933_v34 = vshll.u32 %v826_v9, 16  ;;  %v939_v35 = vshll.u32 %v4219_v17, 16  ;;  %v927_v45 = vrot.slane %v925_v13, 5 }
 0x133   : > { %3545 = vmatpush3.bf16.msra.mxu1 %v3782_v38  ;;  %3482 = vmatprep.subr.bf16.mxu0 %v3783_v56  ;;  %v1565_v38 = vsel %vm4122_vm8, %v1560_v22, %v1564_v11  ;;  %v1574_v39 = vrot.slane %v1573_v24, 4  ;;  %v922_v41 = vor.u32 %v921_v27, %v918_v18  ;;  %v3027_v6 = vrot.slane %v1098_v21, 9  ;;  %v1762_v18 = vld [vmem:[#allocation2 + $0x8] sm:$0xe]  ;;  %v3789_v20 = vld [vmem:[%s4554_s3 + $0x98] sm:$0xff]  }
 0x134   : > { %3554 = vmatprep.subr.bf16.mxu1 %v3784_v1  ;;  %v935_v29 = vrot.slane %v933_v34, 5  ;;  %v941_v47 = vrot.slane %v939_v35, 5  ;;  %v1581_v52 = vshrl.u32 %v1492_v28, 16  ;;  %v1130_v59 = vrot.slane %v4104_v36, 5  ;;  %v3791_v35 = vld [vmem:[%s4554_s3 + $0xa0] sm:$0xff]  }
 0x135   : > { %3475 = vmatmul.mubr.bf16.vlgmr.msra.gmra.mrb[8].mxu0 %v4187_v23  ;;  %v1579_v23 = vsel %vm4122_vm8, %v1574_v39, %v1578_v25  ;;  %v923_v57 = vrot.slane %v922_v41, 4  ;;  %v1590_v10 = vshll.u32 %v4231_v49, 16  ;;  %v1595_v54 = vshrl.u32 %v1494_v62, 16 }
 0x136   : > { %3478 = vmatprep.mubr.bf16.mxu0 %v3016_v63  ;;  %3483 = vmatpush3.bf16.msra.mxu0 %v3783_v56  ;;  %v1584_v56 = vshll.u32 %v1492_v28, 16  ;;  %v3108_v63 = vcombine.low %v1565_v38, %v1579_v23  ;;  %v936_v5 = vor.u32 %v935_v29, %v932_v33  ;;  %v1583_v9 = vrot.slane %v1581_v52, 4  ;;  %v3793_v29 = vld [vmem:[%s4554_s3 + $0xa8] sm:$0xff]   ;;  %v1099_v52 = vld [vmem:[#allocation2 + $0x10] sm:$0xe] }
 0x137   : > { %3547 = vmatmul.mubr.bf16.vlgmr.msra.gmra.mrb[0].mxu1 %v3107_v31  ;;  %3484 = vmatprep.subr.bf16.mxu0 %v3785_v26  ;;  %v928_v36 = vsel %vm4122_vm8, %v923_v57, %v927_v45  ;;  %v1598_v55 = vshll.u32 %v1494_v62, 16  ;;  %v1604_v12 = vshll.u32 %v4245_v8, 16  ;;  %v1127_v13 = vsel %vm4241_vm11, %v3026_v4, %v1126_v37  ;;  %v3795_v23 = vld [vmem:[%s4554_s3 + $0xb0] sm:$0xff]  }
 0x138   : > { %3555 = vmatpush3.bf16.msra.mxu1 %v3784_v1  ;;  %v1586_v11 = vrot.slane %v1584_v56, 5  ;;  %v3788_v1 = vld [vmem:[%s4554_s3 + $0x150] sm:$0xff]   ;;  %3550 = vmatprep.mubr.bf16.mxu1 %v3108_v63  ;;  %v937_v43 = vrot.slane %v936_v5, 4  ;;  %v1131_v15 = vsel %vm4241_vm11, %v3027_v6, %v1130_v59  ;;  %v1592_v22 = vrot.slane %v1590_v10, 5  ;;  %v3794_v6 = vld [vmem:[%s4554_s3 + $0x168] sm:$0xff]   ;;  %v3797_v63 = vld [vmem:[%s4554_s3 + $0xb8] sm:$0xff]  }
 0x139   : > { %3556 = vmatprep.subr.bf16.mxu1 %v3786_v40  ;;  %v1597_v51 = vrot.slane %v1595_v54, 4  ;;  %v1600_v24 = vrot.slane %v1598_v55, 5  ;;  %v3119_v4 = vrot.slane %v1763_v32, 9  ;;  %v1792_v37 = vrot.slane %v4127_v50, 5  ;;  %v3796_v57 = vld [vmem:[%s4554_s3 + $0x170] sm:$0xff]  }
 0x13a   : > { %3485 = vmatpush3.bf16.msra.mxu0 %v3785_v26  ;;  %v1587_v16 = vor.u32 %v1586_v11, %v1583_v9  ;;  %v942_v21 = vsel %vm4122_vm8, %v937_v43, %v941_v47  ;;  %v3790_v26 = vld [vmem:[%s4554_s3 + $0x158] sm:$0xff]   ;;  %v3050_v27 = vcombine.low %v1127_v13, %v1131_v15  ;;  %v1606_v31 = vrot.slane %v1604_v12, 5  ;;  %v1102_v56 = vld [vmem:[#allocation2 + $0x28] sm:$0xe]  ;;  %v1101_v5 = vld [vmem:[#allocation2 + $0x20] sm:$0xe] }
 0x13b   : > { %3486 = vmatprep.subr.bf16.mxu0 %v3787_v30  ;;  %v3017_v53 = vcombine.low %v928_v36, %v942_v21  ;;  %v1601_v28 = vor.u32 %v1600_v24, %v1597_v51  ;;  %v3118_v33 = vrot.slane %v1762_v18, 9  ;;  %v1788_v34 = vrot.slane %v4117_v46, 5  ;;  %v1764_v9 = vld [vmem:[#allocation2 + $0x18] sm:$0xe]  ;;  %v1765_v10 = vld [vmem:[#allocation2 + $0x20] sm:$0xe] }
 0x13c   : > { %3557 = vmatpush3.bf16.msra.mxu1 %v3786_v40  ;;  %v1588_v25 = vrot.slane %v1587_v16, 4  ;;  %v1793_v39 = vsel %vm4241_vm11, %v3119_v4, %v1792_v37  ;;  %v3792_v40 = vld [vmem:[%s4554_s3 + $0x160] sm:$0xff]   ;;  %v3028_v59 = vrot.slane %v1099_v52, 9  ;;  %v1134_v62 = vrot.slane %v4133_v61, 5  ;;  %v1766_v36 = vld [vmem:[#allocation2 + $0x28] sm:$0xe] }
 0x13d   : > { %3558 = vmatprep.subr.bf16.mxu1 %v3788_v1  ;;  %3479 = vmatmul.mubr.bf16.gmra.mrb[12].mxu0 %v3017_v53  ;;  %v1602_v38 = vrot.slane %v1601_v28, 4  ;;  %v1789_v45 = vsel %vm4241_vm11, %v3118_v33, %v1788_v34  ;;  %v1146_v43 = vrot.slane %v4168_v58, 5  ;;  %v1767_v54 = vld [vmem:[#allocation2 + $0x30] sm:$0xe]  ;;  %v3798_v61 = vld [vmem:[%s4554_s3 + $0x178] sm:$0xff]   ;;  %v1138_v12 = vrot.slane %v4148_v14, 5 }
 0x13e   : > { %3487 = vmatpush3.bf16.msra.mxu0 %v3787_v30  ;;  %3498 = vmatprep.mubr.bf16.mxu0 %v3050_v27  ;;  %v1593_v50 = vsel %vm4122_vm8, %v1588_v25, %v1592_v22  ;;  %v3142_v47 = vcombine.low %v1789_v45, %v1793_v39  ;;  %v1100_v30 = vld [vmem:[#allocation2 + $0x18] sm:$0xe]  ;;  %v1135_v55 = vsel %vm4241_vm11, %v3028_v59, %v1134_v62  ;;  %v3030_v32 = vrot.slane %v1101_v5, 9  ;;  %v1769_v28 = vld [vmem:[#allocation2 + $0x40] sm:$0xe]  ;;  %v3806_v62 = vld [vmem:[%s4554_s3 + $0x1b0] sm:$0xff]  }
 0x13f   : > { %3488 = vmatprep.subr.bf16.mxu0 %v3789_v20  ;;  %v1607_v46 = vsel %vm4122_vm8, %v1602_v38, %v1606_v31  ;;  %v3029_v11 = vrot.slane %v1100_v30, 9  ;;  %v1142_v13 = vrot.slane %v4166_v48, 5  ;;  %v3120_v15 = vrot.slane %v1764_v9, 9  ;;  %v1104_v24 = vld [vmem:[#allocation2 + $0x38] sm:$0xe]  ;;  %v3800_v38 = vld [vmem:[%s4554_s3 + $0x188] sm:$0xff]  }
 0x140   : > { %3559 = vmatpush3.bf16.msra.mxu1 %v3788_v1  ;;  %v3109_v41 = vcombine.low %v1593_v50, %v1607_v46  ;;  %v3031_v1 = vrot.slane %v1102_v56, 9  ;;  %v1796_v16 = vrot.slane %v4170_v2, 5  ;;  %v3121_v18 = vrot.slane %v1765_v10, 9  ;;  %v3799_v2 = vld [vmem:[%s4554_s3 + $0x180] sm:$0xff]   ;;  %v1768_v25 = vld [vmem:[#allocation2 + $0x38] sm:$0xe] }
 0x141   : > { %3560 = vmatprep.subr.bf16.mxu1 %v3790_v26  ;;  %v1800_v58 = vrot.slane %v4182_v3, 5  ;;  %v1804_v21 = vrot.slane %v4196_v42, 5  ;;  %v3123_v22 = vrot.slane %v1767_v54, 9  ;;  %v1808_v51 = vrot.slane %v4206_v60, 5  ;;  %v1103_v3 = vld [vmem:[#allocation2 + $0x30] sm:$0xe] }
 0x142   : > { %3489 = vmatpush3.bf16.msra.mxu0 %v3789_v20  ;;  %3551 = vmatmul.mubr.bf16.gmra.mrb[4].mxu1 %v3109_v41  ;;  %v3122_v20 = vrot.slane %v1766_v36, 9  ;;  %v1147_v14 = vsel %vm4241_vm11, %v3031_v1, %v1146_v43  ;;  %v1139_v48 = vsel %vm4241_vm11, %v3029_v11, %v1138_v12  ;;  %v1143_v42 = vsel %vm4241_vm11, %v3030_v32, %v1142_v13  ;;  %v3803_v52 = vld [vmem:[%s4554_s3 + $0x198] sm:$0xff]   ;;  %v3805_v30 = vld [vmem:[%s4554_s3 + $0x1a8] sm:$0xff]   ;;  %v2143_v59 = vld [vmem:[#allocation2 + $0x10] sm:$0xf] }
 0x143   : > { %3490 = vmatprep.subr.bf16.mxu0 %v3791_v35  ;;  %3570 = vmatprep.mubr.bf16.mxu1 %v3142_v47  ;;  %v3051_v53 = vcombine.low %v1135_v55, %v1139_v48  ;;  %v1801_v60 = vsel %vm4241_vm11, %v3121_v18, %v1800_v58  ;;  %v3052_v4 = vcombine.low %v1143_v42, %v1147_v14  ;;  %v3032_v31 = vrot.slane %v1103_v3, 9  ;;  %v2145_v56 = vld [vmem:[#allocation2 + $0x18] sm:$0xf]  ;;  %v3809_v43 = vld [vmem:[%s4554_s3 + $0x1c0] sm:$0xff]   ;;  %v4368_v55 = vld [vmem:[#allocation2 + $0x14] sm:$0x1] }
 0x144   : > { %3561 = vmatpush3.bf16.msra.mxu1 %v3790_v26  ;;  %v1797_v37 = vsel %vm4241_vm11, %v3120_v15, %v1796_v16  ;;  %v1805_v26 = vsel %vm4241_vm11, %v3122_v20, %v1804_v21  ;;  %v1809_v27 = vsel %vm4241_vm11, %v3123_v22, %v1808_v51  ;;  %v1150_v33 = vrot.slane %v4212_v44, 5  ;;  %v3807_v9 = vld [vmem:[%s4554_s3 + $0x1b8] sm:$0xff]   ;;  %v3808_v13 = vld [vmem:[#allocation2 + $0x20] ss:$8 sps:$4 sm:$0xff]   ;;  %v3813_v22 = vld [vmem:[%s4554_s3 + $0x1d0] sm:$0xff]  }
 0x145   : > { %3562 = vmatprep.subr.bf16.mxu1 %v3792_v40  ;;  %v3033_v34 = vrot.slane %v1104_v24, 9  ;;  %v3143_v50 = vcombine.low %v1797_v37, %v1801_v60  ;;  %v3124_v39 = vrot.slane %v1768_v25, 9  ;;  %v1812_v46 = vrot.slane %v4231_v49, 5  ;;  %v4370_v32 = vld [vmem:[#allocation2 + $0x1c] sm:$0x1]  ;;  %v3811_v15 = vld [vmem:[%s4554_s3 + $0x1c8] sm:$0xff]  }
 0x146   : > { %3491 = vmatpush3.bf16.msra.mxu0 %v3791_v35  ;;  %v1154_v35 = vrot.slane %v4219_v17, 5  ;;  %v3125_v41 = vrot.slane %v1769_v28, 9  ;;  %v1816_v45 = vrot.slane %v4245_v8, 5  ;;  %v1151_v44 = vsel %vm4241_vm11, %v3032_v31, %v1150_v33  ;;  %v3810_v58 = vld [vmem:[#allocation2 + $0x30] ss:$8 sps:$4 sm:$0xff]   ;;  %v3815_v37 = vld [vmem:[%s4554_s3 + $0x1e0] sm:$0xff]  }
 0x147   : > { %3492 = vmatprep.subr.bf16.mxu0 %v3793_v29  ;;  %v1813_v49 = vsel %vm4241_vm11, %v3124_v39, %v1812_v46  ;;  %v2163_v5 = vshll.u32 %v2143_v59, 16  ;;  %v2174_v10 = vshrl.u32 %v2145_v56, 16  ;;  %v2177_v36 = vshll.u32 %v2145_v56, 16  ;;  %v3812_v3 = vld [vmem:[#allocation2 + $0x40] ss:$8 sps:$4 sm:$0xff]  }
 0x148   : > { %3563 = vmatpush3.bf16.msra.mxu1 %v3792_v40  ;;  %v3144_v40 = vcombine.low %v1805_v26, %v1809_v27  ;;  %v1155_v17 = vsel %vm4241_vm11, %v3033_v34, %v1154_v35  ;;  %v1817_v8 = vsel %vm4241_vm11, %v3125_v41, %v1816_v45  ;;  %v2169_v16 = vshll.u32 %v4368_v55, 16  ;;  %v2149_v60 = vld [vmem:[#allocation2 + $0x28] sm:$0xf]  ;;  %v2151_v25 = vld [vmem:[#allocation2 + $0x30] sm:$0xf] }
 0x149   : > { %3564 = vmatprep.subr.bf16.mxu1 %v3794_v6  ;;  %v3053_v47 = vcombine.low %v1151_v44, %v1155_v17  ;;  %v2165_v1 = vrot.slane %v2163_v5, 5  ;;  %v2176_v54 = vrot.slane %v2174_v10, 4  ;;  %v2183_v21 = vshll.u32 %v4370_v32, 16  ;;  %v2147_v26 = vld [vmem:[#allocation2 + $0x20] sm:$0xf]  ;;  %v3816_v39 = vld [vmem:[%s4554_s3 + $0x1e8] sm:$0xff]  }
 0x14a   : > { %3493 = vmatpush3.bf16.msra.mxu0 %v3793_v29  ;;  %v3801_v29 = vld [vmem:[%s4554_s3 + $0x190] sm:$0xff]   ;;  %v2171_v51 = vrot.slane %v2169_v16, 5  ;;  %v2202_v27 = vshrl.u32 %v2149_v60, 16  ;;  %v2205_v28 = vshll.u32 %v2149_v60, 16  ;;  %v2216_v31 = vshrl.u32 %v2151_v25, 16 }
 0x14b   : > { %3494 = vmatprep.subr.bf16.mxu0 %v3795_v23  ;;  %v2219_v33 = vshll.u32 %v2151_v25, 16 }
 0x14c   : > { %3565 = vmatpush3.bf16.msra.mxu1 %v3794_v6  ;;  %v3145_v6 = vcombine.low %v1813_v49, %v1817_v8  ;;  %v2204_v46 = vrot.slane %v2202_v27, 4  ;;  %v2207_v41 = vrot.slane %v2205_v28, 5  ;;  %v2218_v45 = vrot.slane %v2216_v31, 4  ;;  %v2155_v49 = vld [vmem:[#allocation2 + $0x40] sm:$0xf]  ;;  %v3817_v8 = vld [vmem:[%s4554_s3 + $0x1f0] sm:$0xff]  }
 0x14d   : > { %3566 = vmatprep.subr.bf16.mxu1 %v3796_v57  ;;  %v2221_v44 = vrot.slane %v2219_v33, 5  ;;  %v2244_v5 = vshrl.u32 %v2155_v49, 16  ;;  %v2425_v28 = vld [vmem:[#allocation2 + $0x10] sm:$0xe]  ;;  %v3820_v33 = vld [vmem:[%s4554_s3 + $0x208] sm:$0xff]  }
 0x14e   : > { %3495 = vmatpush3.bf16.msra.mxu0 %v3795_v23  ;;  %v3802_v23 = vld [vmem:[#allocation2 + $0x10] ss:$8 sps:$4 sm:$0xff]  }
 0x14f   : > { %3496 = vmatprep.subr.bf16.mxu0 %v3797_v63  ;;  %v2222_v10 = vor.u32 %v2221_v44, %v2218_v45  ;;  %v3821_v45 = vld [vmem:[%s4554_s3 + $0x210] sm:$0xff]  }
 0x150   : > { %3567 = vmatpush3.bf16.msra.mxu1 %v3796_v57  ;;  %v3804_v57 = vld [vmem:[%s4554_s3 + $0x1a0] sm:$0xff]  }
 0x151   : > { %3568 = vmatprep.subr.bf16.mxu1 %v3798_v61 }
 0x152   : > { %3497 = vmatpush3.bf16.msra.mxu0 %v3797_v63  ;;  %v2160_v63 = vshrl.u32 %v2143_v59, 16  ;;  %v4400_v59 = vld [vmem:[#allocation2 + $0x34] sm:$0x1] }
 0x154   : > { %3569 = vmatpush3.bf16.msra.mxu1 %v3798_v61  ;;  %v2162_v11 = vrot.slane %v2160_v63, 4  ;;  %v2179_v61 = vrot.slane %v2177_v36, 5  ;;  %v4403_v63 = vld [vmem:[#allocation2 + $0x3c] sm:$0x1]  ;;  %v2225_v36 = vshll.u32 %v4400_v59, 16 }
 0x155   : > { %3499 = vmatmul.mubr.bf16.vlgmr.msra.gmra.mrb[8].mxu0 %v3051_v53  ;;  %3578 = vmatprep.subr.bf16.mxu1 %v3799_v2  ;;  %v3814_v53 = vld [vmem:[%s4554_s3 + $0x1d8] sm:$0xff]  }
 0x156   : > { %3502 = vmatprep.mubr.bf16.mxu0 %v3052_v4  ;;  %v2166_v12 = vor.u32 %v2165_v1, %v2162_v11  ;;  %v2180_v18 = vor.u32 %v2179_v61, %v2176_v54  ;;  %v2153_v4 = vld [vmem:[#allocation2 + $0x38] sm:$0xf]  ;;  %v2239_v1 = vshll.u32 %v4403_v63, 16 }
 0x157   : > { %3571 = vmatmul.mubr.bf16.vlgmr.msra.gmra.mrb[0].mxu1 %v3143_v50  ;;  %v2230_v34 = vshrl.u32 %v2153_v4, 16  ;;  %v2233_v35 = vshll.u32 %v2153_v4, 16  ;;  %v2188_v50 = vshrl.u32 %v2147_v26, 16  ;;  %v3818_v54 = vld [vmem:[%s4554_s3 + $0x1f8] sm:$0xff]  }
 0x158   : > { %3574 = vmatprep.mubr.bf16.mxu1 %v3144_v40  ;;  %3579 = vmatpush3.bf16.msra.mxu1 %v3799_v2  ;;  %v2167_v20 = vrot.slane %v2166_v12, 4  ;;  %v2181_v14 = vrot.slane %v2180_v18, 4  ;;  %v2185_v2 = vrot.slane %v2183_v21, 5  ;;  %v2157_v40 = vld [vmem:[#allocation2 + $0x48] sm:$0xf]  ;;  %v2246_v18 = vrot.slane %v2244_v5, 4 }
 0x159   : > { %3580 = vmatprep.subr.bf16.mxu1 %v3800_v38  ;;  %v2232_v17 = vrot.slane %v2230_v34, 4  ;;  %v2227_v21 = vrot.slane %v2225_v36, 5  ;;  %v2430_v5 = vld [vmem:[#allocation2 + $0x38] sm:$0xe] }
 0x15a   : > { %v2172_v48 = vsel %vm4122_vm8, %v2167_v20, %v2171_v51  ;;  %v2186_v24 = vsel %vm4122_vm8, %v2181_v14, %v2185_v2  ;;  %v2223_v20 = vrot.slane %v2222_v10, 4  ;;  %v2241_v51 = vrot.slane %v2239_v1, 5  ;;  %v3819_v2 = vld [vmem:[%s4554_s3 + $0x200] sm:$0xff]  }
 0x15b   : > { %v3198_v42 = vcombine.low %v2172_v48, %v2186_v24  ;;  %v4411_v48 = vld [vmem:[#allocation2 + $0x4c] sm:$0x1]  ;;  %v2427_v10 = vld [vmem:[#allocation2 + $0x20] sm:$0xe] }
 0x15c   : > { %3581 = vmatpush3.bf16.msra.mxu1 %v3800_v38  ;;  %v2191_v38 = vshll.u32 %v2147_v26, 16 }
 0x15d   : > { %3503 = vmatmul.mubr.bf16.gmra.mrb[12].mxu0 %v3053_v47  ;;  %3582 = vmatprep.subr.bf16.mxu1 %v3801_v29  ;;  %v2190_v47 = vrot.slane %v2188_v50, 4 }
 0x15e   : > { %2787 = vmatprep.mubr.bf16.mxu0 %v3859_v19 }
 0x15f   : > { %3575 = vmatmul.mubr.bf16.gmra.mrb[4].mxu1 %v3145_v6  ;;  %v2193_v6 = vrot.slane %v2191_v38, 5 }
 0x160   : > { %3583 = vmatpush3.bf16.msra.mxu1 %v3801_v29  ;;  %3594 = vmatprep.mubr.bf16.mxu1 %v3802_v23  ;;  %v2235_v29 = vrot.slane %v2233_v35, 5  ;;  %v2261_v23 = vshll.u32 %v2157_v40, 16 }
 0x161   : > { %3584 = vmatprep.subr.bf16.mxu1 %v3803_v52 }
 0x162   : > { %v2236_v11 = vor.u32 %v2235_v29, %v2232_v17  ;;  %v2455_v17 = vrot.slane %v4370_v32, 5 }
 0x164   : > { %3585 = vmatpush3.bf16.msra.mxu1 %v3803_v52  ;;  %v2258_v52 = vshrl.u32 %v2157_v40, 16  ;;  %v2426_v40 = vld [vmem:[#allocation2 + $0x18] sm:$0xe] }
 0x165   : > { %3586 = vmatprep.subr.bf16.mxu1 %v3804_v57  ;;  %v3211_v44 = vrot.slane %v2426_v40, 9 }
 0x166   : > { %v2260_v12 = vrot.slane %v2258_v52, 4  ;;  %v3824_v52 = vld [vmem:[%s4554_s3 + $0x228] sm:$0xff]  }
 0x168   : > { %3587 = vmatpush3.bf16.msra.mxu1 %v3804_v57  ;;  %v4396_v57 = vld [vmem:[#allocation2 + $0x24] sm:$0x1] }
 0x169   : > { %3588 = vmatprep.subr.bf16.mxu1 %v3805_v30  ;;  %v2197_v61 = vshll.u32 %v4396_v57, 16 }
 0x16c   : > { %3589 = vmatpush3.bf16.msra.mxu1 %v3805_v30  ;;  %v4398_v30 = vld [vmem:[#allocation2 + $0x2c] sm:$0x1] }
 0x16d   : > { %3590 = vmatprep.subr.bf16.mxu1 %v3806_v62  ;;  %v2211_v56 = vshll.u32 %v4398_v30, 16 }
 0x16f   : > { %v2213_v16 = vrot.slane %v2211_v56, 5  ;;  %v2429_v56 = vld [vmem:[#allocation2 + $0x30] sm:$0xe] }
 0x170   : > { %3591 = vmatpush3.bf16.msra.mxu1 %v3806_v62  ;;  %v2208_v62 = vor.u32 %v2207_v41, %v2204_v46  ;;  %v3210_v46 = vrot.slane %v2425_v28, 9  ;;  %v2451_v41 = vrot.slane %v4368_v55, 5  ;;  %v3214_v1 = vrot.slane %v2429_v56, 9  ;;  %v3842_v28 = vld [vmem:[%s4556_s5 + $0x50] ss:$8 sps:$4 sm:$0xff]  }
 0x171   : > { %3592 = vmatprep.subr.bf16.mxu1 %v3807_v9 }
 0x174   : > { %3593 = vmatpush3.bf16.msra.mxu1 %v3807_v9  ;;  %v2247_v9 = vshll.u32 %v2155_v49, 16 }
 0x175   : > { %3602 = vmatprep.subr.bf16.mxu1 %v3809_v43 }
 0x177   : > { %3595 = vmatmul.mubr.bf16.vlgmr.msra.gmra.mrb[0].mxu1 %v3808_v13  ;;  %v2263_v13 = vrot.slane %v2261_v23, 5  ;;  %v3825_v23 = vld [vmem:[%s4554_s3 + $0x230] sm:$0xff]  }
 0x178   : > { %3598 = vmatprep.mubr.bf16.mxu1 %v3810_v58  ;;  %3603 = vmatpush3.bf16.msra.mxu1 %v3809_v43  ;;  %v2194_v43 = vor.u32 %v2193_v6, %v2190_v47  ;;  %v2249_v58 = vrot.slane %v2247_v9, 5  ;;  %v2456_v47 = vsel %vm4241_vm11, %v3211_v44, %v2455_v17  ;;  %v3822_v6 = vld [vmem:[%s4554_s3 + $0x218] sm:$0xff]   ;;  %v2985_v17 = vld [vmem:[%s4555_s4] ss:$0 sm:$0xff] }
 0x179   : > { %3604 = vmatprep.subr.bf16.mxu1 %v3811_v15  ;;  %v2264_v24 = vor.u32 %v2263_v13, %v2260_v12  ;;  %v3826_v9 = vld [vmem:[%s4554_s3 + $0x238] sm:$0xff]   ;;  %v3212_v12 = vrot.slane %v2427_v10, 9  ;;  %v2459_v13 = vrot.slane %v4396_v57, 5  ;;  %v3827_v57 = vld [vmem:[%s4556_s5] ss:$8 sps:$4 sm:$0xff]  }
 0x17a   : > { %v2195_v14 = vrot.slane %v2194_v43, 4  ;;  %v2250_v25 = vor.u32 %v2249_v58, %v2246_v18  ;;  %v2467_v43 = vrot.slane %v4400_v59, 5  ;;  %v2431_v58 = vld [vmem:[#allocation2 + $0x40] sm:$0xe] }
 0x17b   : > { %v2265_v34 = vrot.slane %v2264_v24, 4  ;;  %v2460_v59 = vsel %vm4241_vm11, %v3212_v12, %v2459_v13  ;;  %v2479_v24 = vrot.slane %v4411_v48, 5 }
 0x17c   : > { %3605 = vmatpush3.bf16.msra.mxu1 %v3811_v15  ;;  %v2209_v15 = vrot.slane %v2208_v62, 4  ;;  %v2251_v50 = vrot.slane %v2250_v25, 4  ;;  %v2428_v62 = vld [vmem:[#allocation2 + $0x28] sm:$0xe]  ;;  %v2468_v18 = vsel %vm4241_vm11, %v3214_v1, %v2467_v43  ;;  %v3838_v25 = vld [vmem:[%s4556_s5 + $0x34] ss:$8 sps:$4 sm:$0xff]  }
 0x17d   : > { %3606 = vmatprep.subr.bf16.mxu1 %v3813_v22  ;;  %v3213_v36 = vrot.slane %v2428_v62, 9 }
 0x17e   : > { %v2214_v60 = vsel %vm4122_vm8, %v2209_v15, %v2213_v16  ;;  %v2432_v16 = vld [vmem:[#allocation2 + $0x48] sm:$0xe] }
 0x17f   : > { %3599 = vmatmul.mubr.bf16.gmra.mrb[4].mxu1 %v3812_v3  ;;  %v4416_v3 = vld [vmem:[#allocation2 + $0x44] sm:$0x1] }
 0x180   : > { %3607 = vmatpush3.bf16.msra.mxu1 %v3813_v22  ;;  %3618 = vmatprep.mubr.bf16.mxu1 %v3198_v42  ;;  %v2237_v22 = vrot.slane %v2236_v11, 4  ;;  %v2199_v42 = vrot.slane %v2197_v61, 5  ;;  %v2253_v4 = vshll.u32 %v4416_v3, 16  ;;  %v2463_v11 = vrot.slane %v4398_v30, 5 }
 0x181   : > { %3608 = vmatprep.subr.bf16.mxu1 %v3814_v53  ;;  %v2471_v61 = vrot.slane %v4403_v63, 5  ;;  %v3829_v63 = vld [vmem:[%s4556_s5 + $0x4] ss:$8 sps:$4 sm:$0xff]  }
 0x182   : > { %v2242_v26 = vsel %vm4122_vm8, %v2237_v22, %v2241_v51  ;;  %v2200_v27 = vsel %vm4122_vm8, %v2195_v14, %v2199_v42  ;;  %v2255_v38 = vrot.slane %v2253_v4, 5  ;;  %v2464_v15 = vsel %vm4241_vm11, %v3213_v36, %v2463_v11  ;;  %v3832_v22 = vld [vmem:[%s4556_s5 + $0x14] ss:$8 sps:$4 sm:$0xff]   ;;  %2755 = vmatprep.subr.bf16.mxu0 %v3829_v63  ;;  %v3835_v42 = vld [vmem:[%s4556_s5 + $0x24] ss:$8 sps:$4 sm:$0xff]  }
 0x183   : > { %v3199_v31 = vcombine.low %v2200_v27, %v2214_v60  ;;  %v3216_v14 = vrot.slane %v2431_v58, 9  ;;  %2756 = vmatpush1.bf16.msra.mxu0 %v3827_v57  ;;  %v3844_v27 = vld [vmem:[%s4556_s5 + $0x54] ss:$8 sps:$4 sm:$0xff]  }
 0x184   : > { %3609 = vmatpush3.bf16.msra.mxu1 %v3814_v53  ;;  %v2267_v53 = vshll.u32 %v4411_v48, 16  ;;  %v2256_v29 = vsel %vm4122_vm8, %v2251_v50, %v2255_v38  ;;  %2757 = vmatprep.subr.bf16.mxu0 %v3832_v22  ;;  %v3833_v48 = vld [vmem:[%s4556_s5 + $0x20] ss:$8 sps:$4 sm:$0xff]  }
 0x185   : > { %3610 = vmatprep.subr.bf16.mxu1 %v3815_v37 }
 0x188   : > { %3611 = vmatpush3.bf16.msra.mxu1 %v3815_v37  ;;  %v2228_v37 = vsel %vm4122_vm8, %v2223_v20, %v2227_v21  ;;  %v3235_v20 = vcombine.low %v2460_v59, %v2464_v15  ;;  %v3217_v21 = vrot.slane %v2432_v16, 9 }
 0x189   : > { %3612 = vmatprep.subr.bf16.mxu1 %v3816_v39  ;;  %v3200_v35 = vcombine.low %v2228_v37, %v2242_v26  ;;  %v3836_v37 = vld [vmem:[%s4556_s5 + $0x30] ss:$8 sps:$4 sm:$0xff]   ;;  %v3839_v26 = vld [vmem:[%s4556_s5 + $0x40] ss:$8 sps:$4 sm:$0xff]  }
 0x18c   : > { %3613 = vmatpush3.bf16.msra.mxu1 %v3816_v39  ;;  %v2269_v39 = vrot.slane %v2267_v53, 5  ;;  %v3830_v53 = vld [vmem:[%s4556_s5 + $0x10] ss:$8 sps:$4 sm:$0xff]  }
 0x18d   : > { %3614 = vmatprep.subr.bf16.mxu1 %v3817_v8  ;;  %2758 = vmatpush1.bf16.msra.mxu0 %v3830_v53 }
 0x18e   : > { %v2270_v49 = vsel %vm4122_vm8, %v2265_v34, %v2269_v39  ;;  %2759 = vmatprep.subr.bf16.mxu0 %v3835_v42  ;;  %v3850_v34 = vld [vmem:[%s4556_s5 + $0x74] ss:$8 sps:$4 sm:$0xff]   ;;  %v2663_v42 = vld [vmem:[%s4557_s6] sm:$0x3] }
 0x18f   : > { %v3201_v55 = vcombine.low %v2256_v29, %v2270_v49 }
 0x190   : > { %3615 = vmatpush3.bf16.msra.mxu1 %v3817_v8  ;;  %v2452_v8 = vsel %vm4241_vm11, %v3210_v46, %v2451_v41 }
 0x191   : > { %3616 = vmatprep.subr.bf16.mxu1 %v3818_v54  ;;  %v3234_v32 = vcombine.low %v2452_v8, %v2456_v47  ;;  %2760 = vmatpush1.bf16.msra.mxu0 %v3833_v48 }
 0x192   : > { %2761 = vmatprep.subr.bf16.mxu0 %v3838_v25 }
 0x194   : > { %3617 = vmatpush3.bf16.msra.mxu1 %v3818_v54  ;;  %v3215_v54 = vrot.slane %v2430_v5, 9 }
 0x195   : > { %3626 = vmatprep.subr.bf16.mxu1 %v3819_v2  ;;  %2762 = vmatpush1.bf16.msra.mxu0 %v3836_v37 }
 0x196   : > { %v2472_v30 = vsel %vm4241_vm11, %v3215_v54, %v2471_v61  ;;  %2763 = vmatprep.subr.bf16.mxu0 %v3841_v7 }
 0x197   : > { %3619 = vmatmul.mubr.bf16.vlgmr.msra.gmra.mrb[0].mxu1 %v3199_v31  ;;  %v3236_v51 = vcombine.low %v2468_v18, %v2472_v30  ;;  %v3845_v31 = vld [vmem:[%s4556_s5 + $0x60] ss:$8 sps:$4 sm:$0xff]  }
 0x198   : > { %3622 = vmatprep.mubr.bf16.mxu1 %v3200_v35  ;;  %3627 = vmatpush3.bf16.msra.mxu1 %v3819_v2  ;;  %v2475_v2 = vrot.slane %v4416_v3, 5  ;;  %v2480_v3 = vsel %vm4241_vm11, %v3217_v21, %v2479_v24  ;;  %v3848_v35 = vld [vmem:[%s4556_s5 + $0x70] ss:$8 sps:$4 sm:$0xff]  }
 0x199   : > { %3628 = vmatprep.subr.bf16.mxu1 %v3820_v33  ;;  %2764 = vmatpush1.bf16.msra.mxu0 %v3839_v26 }
 0x19a   : > { %v2476_v60 = vsel %vm4241_vm11, %v3216_v14, %v2475_v2  ;;  %2765 = vmatprep.subr.bf16.mxu0 %v3844_v27  ;;  %v2665_v2 = vlaneseq }
 0x19b   : > { %v3237_v4 = vcombine.low %v2476_v60, %v2480_v3 }
 0x19c   : > { %3629 = vmatpush3.bf16.msra.mxu1 %v3820_v33  ;;  %v3847_v33 = vld [vmem:[%s4556_s5 + $0x64] ss:$8 sps:$4 sm:$0xff]   ;;  %v2666_v24 = vshrl.u32 %v2665_v2, 7 }
 0x19d   : > { %3630 = vmatprep.subr.bf16.mxu1 %v3821_v45  ;;  %2766 = vmatpush1.bf16.msra.mxu0 %v3842_v28 }
 0x19e   : > { %2767 = vmatprep.subr.bf16.mxu0 %v3847_v33  ;;  %v2667_v53 = vsub.s32 0, %v2666_v24  ;;  %v2671_v60 = vsub.s32 1, %v2666_v24 }
 0x19f   : > { %3623 = vmatmul.mubr.bf16.gmra.mrb[4].mxu1 %v3201_v55 }
 0x1a0   : > { %3631 = vmatpush3.bf16.msra.mxu1 %v3821_v45  ;;  %3642 = vmatprep.mubr.bf16.mxu1 %v3234_v32  ;;  %v2668_v3 = vrot.slane %v2663_v42, %v2667_v53  ;;  %v2672_v48 = vrot.slane %v2663_v42, %v2671_v60 }
 0x1a1   : > { %3632 = vmatprep.subr.bf16.mxu1 %v3822_v6  ;;  %2768 = vmatpush1.bf16.msra.mxu0 %v3845_v31 }
 0x1a2   : > { %2769 = vmatprep.subr.bf16.mxu0 %v3850_v34 }
 0x1a4   : > { %3633 = vmatpush3.bf16.msra.mxu1 %v3822_v6 }
 0x1a5   : > { %3634 = vmatprep.subr.bf16.mxu1 %v3823_v0  ;;  %2770 = vmatpush1.bf16.msra.mxu0 %v3848_v35 }
 0x1a8   : > { %3635 = vmatpush3.bf16.msra.mxu1 %v3823_v0 }
 0x1a9   : > { %3636 = vmatprep.subr.bf16.mxu1 %v3824_v52 }
 0x1ac   : > { %3637 = vmatpush3.bf16.msra.mxu1 %v3824_v52 }
 0x1ad   : > { %3638 = vmatprep.subr.bf16.mxu1 %v3825_v23 }
 0x1b0   : > { %3639 = vmatpush3.bf16.msra.mxu1 %v3825_v23 }
 0x1b1   : > { %3640 = vmatprep.subr.bf16.mxu1 %v3826_v9 }
 0x1b4   : > { %3641 = vmatpush3.bf16.msra.mxu1 %v3826_v9 }
 0x1b7   : > { %3643 = vmatmul.mubr.bf16.vlgmr.msra.gmra.mrb[0].mxu1 %v3235_v20 }
 0x1b8   : > { %3646 = vmatprep.mubr.bf16.mxu1 %v3236_v51 }
 0x1bf   : > { %3647 = vmatmul.mubr.bf16.gmra.mrb[4].mxu1 %v3237_v4 }
 0x228   : > { %v3500_v50 = vpop.f32.mrb[8].mxu0 }
 0x229   : > { %v1271_v38 = vpop.f32.mrb[9].mxu0  ;;  %v3650_v29 = vadd.f32 %v3500_v50, %v2985_v17 }
 0x22a   : > { %v3501_v39 = vpop.f32.mrb[10].mxu0  ;;  %v3652_v49 = vadd.f32 %v2985_v17, %v1271_v38 }
 0x22b   : > { %v1274_v40 = vpop.f32.mrb[11].mxu0  ;;  %v3654_v55 = vadd.f32 %v3501_v39, %v2985_v17 }
 0x22c   : > { %v3656_v32 = vadd.f32 %v2985_v17, %v1274_v40 }
 0x230   : > { %v3504_v46 = vpop.f32.mrb[12].mxu0 }
 0x231   : > { %v1287_v41 = vpop.f32.mrb[13].mxu0  ;;  %v3658_v11 = vadd.f32 %v3504_v46, %v2985_v17 }
 0x232   : > { %v3505_v45 = vpop.f32.mrb[14].mxu0  ;;  %v3660_v43 = vadd.f32 %v2985_v17, %v1287_v41 }
 0x233   : > { %v1290_v44 = vpop.f32.mrb[15].mxu0  ;;  %v3662_v12 = vadd.f32 %v3505_v45, %v2985_v17 }
 0x234   : > { %v3664_v16 = vadd.f32 %v2985_v17, %v1290_v44 }
 0x28a   : > { %v3644_v8 = vpop.f32.mrb[0].mxu1 }
 0x28b   : > { %v3651_v47 = vadd.f32 %v3650_v29, %v3644_v8  ;;  %v2596_v6 = vpop.f32.mrb[1].mxu1 }
 0x28c   : > { %v3653_v0 = vadd.f32 %v3652_v49, %v2596_v6  ;;  %v3645_v52 = vpop.f32.mrb[2].mxu1 }
 0x28d   : > { %v3655_v23 = vadd.f32 %v3654_v55, %v3645_v52  ;;  %v2599_v62 = vpop.f32.mrb[3].mxu1  ;;  %v2637_v5 = vmax.f32 %v3651_v47, 0.0 }
 0x28e   : > { %v3657_v56 = vadd.f32 %v3656_v32, %v2599_v62  ;;  %v2635_v10 = vmax.f32 %v3653_v0, 0.0 }
 0x28f   : > { %v2638_v9 = vmax.f32 %v3655_v23, 0.0 }
 0x290   : > { %v2636_v36 = vmax.f32 %v3657_v56, 0.0 }
 0x291   : > { %v2644_v1 = vpack.c.bf16 %v2638_v9, %v2637_v5 }
 0x292   : > { %v2643_v54 = vpack.c.bf16 %v2636_v36, %v2635_v10  ;;  %v3648_v61 = vpop.f32.mrb[4].mxu1 }
 0x293   : > { %v3659_v13 = vadd.f32 %v3658_v11, %v3648_v61  ;;  %v2612_v15 = vpop.f32.mrb[5].mxu1 }
 0x294   : > { %v3661_v18 = vadd.f32 %v3660_v43, %v2612_v15  ;;  %v3649_v30 = vpop.f32.mrb[6].mxu1  ;;  %2788 = vmatmul.mubr.bf16.vlgmr.msra.gmra.mrb[16].mxu0 %v2643_v54 }
 0x295   : > { %v3663_v58 = vadd.f32 %v3662_v12, %v3649_v30  ;;  %v2615_v59 = vpop.f32.mrb[7].mxu1  ;;  %2797 = vmatprep.mubr.bf16.mxu0 %v3859_v19  ;;  %v2641_v63 = vmax.f32 %v3659_v13, 0.0 }
 0x296   : > { %v3665_v57 = vadd.f32 %v3664_v16, %v2615_v59  ;;  %v2639_v21 = vmax.f32 %v3661_v18, 0.0 }
 0x297   : > { %v2642_v20 = vmax.f32 %v3663_v58, 0.0 }
 0x298   : > { %v2640_v22 = vmax.f32 %v3665_v57, 0.0 }
 0x299   : > { %v2646_v51 = vpack.c.bf16 %v2642_v20, %v2641_v63 }
 0x29a   : > { %v2645_v14 = vpack.c.bf16 %v2640_v22, %v2639_v21 }
 0x29c   : > { %2798 = vmatmul.mubr.bf16.gmra.mrb[20].mxu0 %v2644_v1 }
 0x29d   : > { %2807 = vmatprep.mubr.bf16.mxu0 %v3859_v19 }
 0x2a4   : > { %2808 = vmatmul.mubr.bf16.gmra.mrb[24].mxu0 %v2645_v14 }
 0x2a5   : > { %2817 = vmatprep.mubr.bf16.mxu0 %v3859_v19 }
 0x2ac   : > { %2818 = vmatmul.mubr.bf16.gmra.mrb[28].mxu0 %v2646_v51 }
 0x367   : > { %v2789_v25 = vpop.f32.mrb[16].mxu0 }
 0x368   : > { %v2790_v4 = vadd.f32 %v2789_v25, %v2668_v3  ;;  %v2791_v37 = vpop.f32.mrb[17].mxu0 }
 0x369   : > { %v2792_v7 = vadd.f32 %v2791_v37, %v2672_v48  ;;  %v2793_v26 = vpop.f32.mrb[18].mxu0 }
 0x36a   : > { %v2828_v27 = vmax.f32 %v2790_v4, 0.0  ;;  %v2794_v28 = vadd.f32 %v2793_v26, %v2668_v3  ;;  %v2795_v19 = vpop.f32.mrb[19].mxu0 }
 0x36b   : > { %v2829_v31 = vmax.f32 %v2792_v7, 0.0  ;;  %v2796_v33 = vadd.f32 %v2795_v19, %v2672_v48 }
 0x36c   : > { %v2830_v34 = vmax.f32 %v2794_v28, 0.0 }
 0x36d   : > { %v3282_v35 = vpack.c.bf16 %v2829_v31, %v2828_v27  ;;  %v2831_v50 = vmax.f32 %v2796_v33, 0.0 }
 0x36f   : > { %2892 = vst [vmem:[%s4538_s19] sm:$0xff] %v3282_v35  ;;  %v3283_v38 = vpack.c.bf16 %v2831_v50, %v2830_v34  ;;  %v2799_v39 = vpop.f32.mrb[20].mxu0 }
 0x370   : > { %v2800_v40 = vadd.f32 %v2799_v39, %v2668_v3  ;;  %v2801_v46 = vpop.f32.mrb[21].mxu0 }
 0x371   : > { %2893 = vst [vmem:[%s4538_s19 + $0x8] sm:$0xff] %v3283_v38  ;;  %v2802_v41 = vadd.f32 %v2801_v46, %v2672_v48  ;;  %v2803_v45 = vpop.f32.mrb[22].mxu0 }
 0x372   : > { %v2832_v44 = vmax.f32 %v2800_v40, 0.0  ;;  %v2804_v17 = vadd.f32 %v2803_v45, %v2668_v3  ;;  %v2805_v29 = vpop.f32.mrb[23].mxu0 }
 0x373   : > { %v2833_v49 = vmax.f32 %v2802_v41, 0.0  ;;  %v2806_v8 = vadd.f32 %v2805_v29, %v2672_v48 }
 0x374   : > { %v2834_v55 = vmax.f32 %v2804_v17, 0.0 }
 0x375   : > { %v3284_v47 = vpack.c.bf16 %v2833_v49, %v2832_v44  ;;  %v2835_v6 = vmax.f32 %v2806_v8, 0.0 }
 0x377   : > { %2894 = vst [vmem:[%s4538_s19 + $0x10] sm:$0xff] %v3284_v47  ;;  %v3285_v32 = vpack.c.bf16 %v2835_v6, %v2834_v55  ;;  %v2809_v0 = vpop.f32.mrb[24].mxu0 }
 0x378   : > { %v2810_v52 = vadd.f32 %v2809_v0, %v2668_v3  ;;  %v2811_v23 = vpop.f32.mrb[25].mxu0 }
 0x379   : > { %2895 = vst [vmem:[%s4538_s19 + $0x18] sm:$0xff] %v3285_v32  ;;  %v2812_v62 = vadd.f32 %v2811_v23, %v2672_v48  ;;  %v2813_v56 = vpop.f32.mrb[26].mxu0 }
 0x37a   : > { %v2836_v5 = vmax.f32 %v2810_v52, 0.0  ;;  %v2814_v9 = vadd.f32 %v2813_v56, %v2668_v3  ;;  %v2815_v10 = vpop.f32.mrb[27].mxu0 }
 0x37b   : > { %v2837_v36 = vmax.f32 %v2812_v62, 0.0  ;;  %v2816_v11 = vadd.f32 %v2815_v10, %v2672_v48 }
 0x37c   : > { %v2838_v1 = vmax.f32 %v2814_v9, 0.0 }
 0x37d   : > { %v3286_v43 = vpack.c.bf16 %v2837_v36, %v2836_v5  ;;  %v2839_v54 = vmax.f32 %v2816_v11, 0.0 }
 0x37f   : > { %2896 = vst [vmem:[%s4538_s19 + $0x20] sm:$0xff] %v3286_v43  ;;  %v3287_v61 = vpack.c.bf16 %v2839_v54, %v2838_v1  ;;  %v2819_v12 = vpop.f32.mrb[28].mxu0 }
 0x380   : > { %v2820_v13 = vadd.f32 %v2819_v12, %v2668_v3  ;;  %v2821_v15 = vpop.f32.mrb[29].mxu0 }
 0x381   : > { %2897 = vst [vmem:[%s4538_s19 + $0x28] sm:$0xff] %v3287_v61  ;;  %v2822_v16 = vadd.f32 %v2821_v15, %v2672_v48  ;;  %v2823_v18 = vpop.f32.mrb[30].mxu0 }
 0x382   : > { %v2840_v30 = vmax.f32 %v2820_v13, 0.0  ;;  %v2824_v58 = vadd.f32 %v2823_v18, %v2668_v3  ;;  %v2825_v59 = vpop.f32.mrb[31].mxu0 }
 0x383   : > { %v2841_v57 = vmax.f32 %v2822_v16, 0.0  ;;  %v2826_v63 = vadd.f32 %v2825_v59, %v2672_v48 }
 0x384   : > { %v2842_v20 = vmax.f32 %v2824_v58, 0.0 }
 0x385   : > { %v3288_v21 = vpack.c.bf16 %v2841_v57, %v2840_v30  ;;  %v2843_v22 = vmax.f32 %v2826_v63, 0.0 }
 0x387   : > { %2898 = vst [vmem:[%s4538_s19 + $0x30] sm:$0xff] %v3288_v21  ;;  %v3289_v51 = vpack.c.bf16 %v2843_v22, %v2842_v20 }
 0x389   : > { %2899 = vst [vmem:[%s4538_s19 + $0x38] sm:$0xff] %v3289_v51 }
 0x38a PF: > { %s17_s24 = sadd.s32 1, %s3857_s24  }
 0x38b   : > { %p14_p4 = scmp.ge.s32.totalorder %s17_s24, 4  }
 0x38d   :  { %16 = sbr.rel (!%p14_p4) target bundleno = 1 (0x1), region = 88 }

// kernel: simplenet_forward.5
= control target key start
LH: loop header
LB: loop body
LE: loop exit
PB: predicated region body
PF: predicated region fallthrough
CT: control target
= control target key end

     0   :  { %14 = vsyncpa [#allocation4], 0  ;;  %s4897_s0 = inlined_call_operand.vmem [shape: bf16[2,4,4,256], index: 0, kind: input, shape index: {}]   ;;  %s4898_s1 = inlined_call_operand.vmem [shape: bf16[256,128], index: 1, kind: input, shape index: {}]   ;;  %s4899_s2 = inlined_call_operand.vmem [shape: f32[1,128], index: 2, kind: input, shape index: {}]   ;;  %s4900_s3 = inlined_call_operand.vmem [shape: bf16[9,128,128], index: 3, kind: input, shape index: {}]   ;;  %s4901_s4 = inlined_call_operand.vmem [shape: f32[1,128], index: 4, kind: input, shape index: {}]   ;;  %s4902_s5 = inlined_call_operand.vmem [shape: bf16[128,512], index: 5, kind: input, shape index: {}]   ;;  %s4903_s6 = inlined_call_operand.vmem [shape: f32[1,512], index: 6, kind: input, shape index: {}]   ;;  %s4904_s7 = inlined_call_operand.vmem [shape: bf16[512,128], index: 7, kind: input, shape index: {}]   ;;  %s4905_s8 = inlined_call_operand.vmem [shape: f32[1,128], index: 8, kind: input, shape index: {}]   ;;  %s4906_s9 = inlined_call_operand.hbm [shape: f32[2,1,128], index: 9, kind: output, shape index: {}]  }
   0x1   :  { %16 = vsyncpa [#allocation4 + $0x1], 0  ;;  %s4061_s30 = smov 0   ;;  %s4063_s10 = smov 0  }
   0x2   :  { %s4065_s11 = smov 0   ;;  %s4067_s12 = smov 0  }
   0x3 LB: > { %s4082_s13 = sadd.s32 4294967295, %s4004_s12   ;;  %s3027_s14 = sadd.s32 4294967294, %s4004_s12   ;;  %s4004_s12 = sphi %s4067_s12, %s4924_s12   ;;  %s4000_s11 = sphi %s4065_s11, %s4923_s11   ;;  %s3996_s10 = sphi %s4063_s10, %s4922_s10   ;;  %s3992_s30 = sphi %s4061_s30, %s4921_s30  }
   0x4   : > { %s4086_s15 = sadd.s32 1, %s4004_s12   ;;  %s223_s16 = sadd.s32 1, %s4000_s11 }
   0x5   : > { %s220_s17 = ssub.s32 %s4004_s12, %s4086_s15  ;;  %p233_p0 = scmp.ne.s32.totalorder %s4000_s11, %s3996_s10 }
   0x6   : > { %p221_p1 = scmp.eq.s32.totalorder %s220_s17, 0  ;;  %p234_p2 = scmp.eq.s32.totalorder %s4082_s13, 1 }
   0x7   : > { %p239_p3 = scmp.ne.s32.totalorder %s3996_s10, %s3992_s30  ;;  %p240_p4 = scmp.eq.s32.totalorder %s3027_s14, 1 }
   0x8   : > { %s4097_s18 = scalar_select %p221_p1, %s4000_s11, %s223_s16  }
   0x9   : > { %p4099_p5 = por %p234_p2, %p233_p0  ;;  %p4103_p6 = por %p240_p4, %p239_p3 }
   0xa   : > { %4907 = sst [smem:[#allocation6_spill]] %s4097_s18  ;;  %p3030_p7 = scmp.ge.s32.totalorder %s4004_s12, 1 }
   0xb   : > { %p290_p8 = scmp.lt.s32.totalorder %s4004_s12, 3 }
   0xd   : > { %p291_p9 = pnand %p3030_p7, %p290_p8 }
   0xe   : > { %v3758_v0 = vld [vmem:[%s4898_s1 + $0x40] sm:$0xff] (!%p291_p9)   ;;  %v3760_v2 = vld [vmem:[%s4898_s1 + $0x48] sm:$0xff] (!%p291_p9)   ;;  %v3762_v4 = vld [vmem:[%s4898_s1 + $0x50] sm:$0xff] (!%p291_p9)   ;;  %p325_p10 = scmp.lt.s32.totalorder (!%p291_p9), %s4082_s13, 1  ;;  %v383_v9 = vlaneseq (!%p291_p9)  ;;  %v4006_v17 = vmov (!%p291_p9), 1983009808  }
   0xf   : > { %294 = sbr.rel (%p291_p9) target bundleno = 1217 (0x4c1), region = 56  ;;  %v3759_v1 = vld [vmem:[%s4898_s1] sm:$0xff] (!%p291_p9)   ;;  %3356 = vmatprep.subr.bf16.mxu0 (!%p291_p9), %v3758_v0  ;;  %v3761_v3 = vld [vmem:[%s4898_s1 + $0x8] sm:$0xff] (!%p291_p9)   ;;  %v3763_v5 = vld [vmem:[%s4898_s1 + $0x10] sm:$0xff] (!%p291_p9)   ;;  %v381_v18 = vunpack.c.l.s4 (!%p291_p9), %v4006_v17  ;;  %v4007_v27 = vmov (!%p291_p9), 0.0   ;;  %v4008_v29 = vmov (!%p291_p9), 0  }
  0x10   : > { %3357 = vmatpush3.bf16.msra.mxu0 (!%p291_p9), %v3759_v1  ;;  %v3764_v6 = vld [vmem:[%s4898_s1 + $0x58] sm:$0xff] (!%p291_p9)   ;;  %v3766_v8 = vld [vmem:[%s4898_s1 + $0x60] sm:$0xff] (!%p291_p9)   ;;  %v3768_v11 = vld [vmem:[%s4898_s1 + $0x68] sm:$0xff] (!%p291_p9)   ;;  %v4150_v13 = vshrl.u32 (!%p291_p9), %v383_v9, 7  ;;  %3543 = vmatprep.subr.bf16.mxu1 (!%p291_p9), %v4007_v27  ;;  %539 = vst [vmem:[#allocation2 + $0x4] sm:$0x7] (!%p291_p9), %v4008_v29 }
  0x11   : > { %3358 = vmatprep.subr.bf16.mxu0 (!%p291_p9), %v3760_v2  ;;  %v3765_v7 = vld [vmem:[%s4898_s1 + $0x18] sm:$0xff] (!%p291_p9)   ;;  %v3767_v10 = vld [vmem:[%s4898_s1 + $0x20] sm:$0xff] (!%p291_p9)   ;;  %v3769_v12 = vld [vmem:[%s4898_s1 + $0x28] sm:$0xff] (!%p291_p9)   ;;  %v382_v19 = vunpack.c.0.s8 (!%p291_p9), %v381_v18  ;;  %540 = vst [vmem:[#allocation2 + $0x8] sm:$0x7] (!%p291_p9), %v4008_v29  ;;  %vm4009_vm0 = vmmov (!%p291_p9), 0  }
  0x12   : > { %v3770_v14 = vld [vmem:[%s4898_s1 + $0x70] sm:$0xff] (!%p291_p9)   ;;  %v3772_v21 = vld [vmem:[%s4898_s1 + $0x78] sm:$0xff] (!%p291_p9)   ;;  %v3776_v26 = vld [vmem:[%s4900_s3] sm:$0xff] (!%p291_p9)   ;;  %541 = vst [vmem:[#allocation2 + $0xc] sm:$0x7] (!%p291_p9), %v4008_v29  ;;  %3559 = vmatprep.mubr.msk.bf16.mxu1 (!%p291_p9), %vm4009_vm0, %v4007_v27  ;;  %vm623_vm1 = vcmask (!%p291_p9), 1042432  }
  0x13   : > { %v3771_v20 = vld [vmem:[%s4898_s1 + $0x30] sm:$0xff] (!%p291_p9)   ;;  %v4162_v22 = vsub.s32 (!%p291_p9), %v382_v19, %v4150_v13  ;;  %v3773_v23 = vld [vmem:[%s4898_s1 + $0x38] sm:$0xff] (!%p291_p9)   ;;  %v3777_v28 = vld [vmem:[%s4900_s3 + $0x8] sm:$0xff] (!%p291_p9)   ;;  %542 = vst [vmem:[#allocation2 + $0x10] sm:$0x7] (!%p291_p9), %v4008_v29  ;;  %vm1048_vm3 = vcmask (!%p291_p9), 1040384  }
  0x14   : > { %3359 = vmatpush3.bf16.msra.mxu0 (!%p291_p9), %v3761_v3  ;;  %538 = vst [vmem:[#allocation2] sm:$0x7] (!%p291_p9), %v4008_v29  ;;  %543 = vst [vmem:[#allocation2 + $0x14] sm:$0x7] (!%p291_p9), %v4008_v29  ;;  %v3778_v30 = vld [vmem:[%s4900_s3 + $0x80] sm:$0xff] (!%p291_p9)   ;;  %v3779_v31 = vld [vmem:[%s4900_s3 + $0x10] sm:$0xff] (!%p291_p9)  }
  0x15   : > { %3360 = vmatprep.subr.bf16.mxu0 (!%p291_p9), %v3762_v4  ;;  %3544 = vmatpush3.bf16.msra.mxu1 (!%p291_p9), %v3778_v30  ;;  %v3780_v32 = vld [vmem:[%s4900_s3 + $0x88] sm:$0xff] (!%p291_p9)   ;;  %v3781_v33 = vld [vmem:[%s4900_s3 + $0x18] sm:$0xff] (!%p291_p9)   ;;  %v3782_v34 = vld [vmem:[%s4900_s3 + $0x90] sm:$0xff] (!%p291_p9)   ;;  %vm624_vm2 = vsmask.f32 (!%p291_p9), 2306  ;;  %vm1049_vm5 = vcmask (!%p291_p9), 1042434  }
  0x16   : > { %s326_s23 = scalar_select %p325_p10, %s4082_s13, 1  ;;  %3545 = vmatprep.subr.bf16.mxu1 %v4007_v27  ;;  %v3783_v35 = vld [vmem:[%s4900_s3 + $0x20] sm:$0xff]   ;;  %v3784_v36 = vld [vmem:[%s4900_s3 + $0x98] sm:$0xff]   ;;  %v3785_v37 = vld [vmem:[%s4900_s3 + $0x28] sm:$0xff]   ;;  %vm1051_vm7 = vcmask 1044484   ;;  %vm1053_vm9 = vcmask 1046534  }
  0x17   : > { %v3786_v38 = vld [vmem:[%s4900_s3 + $0xa0] sm:$0xff]   ;;  %v3787_v39 = vld [vmem:[%s4900_s3 + $0x30] sm:$0xff]   ;;  %v3788_v40 = vld [vmem:[%s4900_s3 + $0xa8] sm:$0xff]   ;;  %vm819_vm11 = vsmask.f32 1280  ;;  %s4010_s22 = smov [#allocation3]  }
  0x18   : > { %3361 = vmatpush3.bf16.msra.mxu0 %v3763_v5  ;;  %s3355_s28 = sshll.u32 %s326_s23, 4  ;;  %v3789_v41 = vld [vmem:[%s4900_s3 + $0x38] sm:$0xff]   ;;  %v3790_v42 = vld [vmem:[%s4900_s3 + $0xb0] sm:$0xff]   ;;  %v3033_v45 = vld [vmem:[%s4899_s2] ss:$0 sm:$0xff]  ;;  %s323_s23 = sand.u32 1, %s3996_s10  }
  0x19   : > { %3362 = vmatprep.subr.bf16.mxu0 %v3764_v6  ;;  %s329_s24 = scalar_lea.vmem %s4897_s0, %s3355_s28  ;;  %3546 = vmatpush3.bf16.msra.mxu1 %v3780_v32  ;;  %v3794_v43 = vld [vmem:[%s4900_s3 + $0xb8] sm:$0xff]   ;;  %vm4253_vm4 = vmand %vm623_vm1, %vm624_vm2  ;;  %v629_v18 = vld [vmem:[#allocation2 + $0x8] sm:$0x7]  ;;  %vm820_vm12 = vsmask.f32 3336  ;;  %s3352_s28 = sshll.u32 %s4082_s13, 4 }
  0x1a   : > { %v3934_v15 = vld.sshfl [vmem:[%s329_s24] sm:$0xff pattern:$0x76325410]  ;;  %v3935_v16 = vld.sshfl [vmem:[%s329_s24 + $0x8] sm:$0xff pattern:$0x76325410]  ;;  %3547 = vmatprep.subr.bf16.mxu1 %v4007_v27  ;;  %vm1050_vm6 = vmor %vm1048_vm3, %vm1049_vm5  ;;  %s4855_s17 = scalar_lea.hbm %s4906_s9, %s3352_s28 }
  0x1b   : > { %v395_v24 = vcombine.high %v3934_v15, %v3935_v16  ;;  %v394_v25 = vcombine.low %v3934_v15, %v3935_v16  ;;  %vm1052_vm8 = vmor %vm1050_vm6, %vm1051_vm7  ;;  %vm822_vm13 = vsmask.f32 5392  ;;  %vm824_vm14 = vsmask.f32 7448  ;;  %s324_s29 = scalar_lea.vmem [#allocation3], %s323_s23  ;;  %s2960_s21 = scalar_lea.sflag [#allocation4], %s323_s23 }
  0x1c   : > { %3363 = vmatpush3.bf16.msra.mxu0 %v3765_v7  ;;  %v626_v7 = vld [vmem:[#allocation2 + $0x4] sm:$0x7]  ;;  %vm4271_vm10 = vmor %vm1052_vm8, %vm1053_vm9  ;;  %s2972_s18 = sshll.u32 %s324_s29, 4  ;;  %s3946_s24 = sshll.u32 %s4010_s22, 4  ;;  %s4857_s18 = int_to_ptr.vmem [resolvable:$true] %s2972_s18  ;;  %s3947_s24 = int_to_ptr.vmem [resolvable:$false] %s3946_s24 }
  0x1d   : > { %3364 = vmatprep.subr.bf16.mxu0 %v3766_v8  ;;  %526 = vmatprep.mubr.bf16.mxu0 %v395_v24  ;;  %vm4324_vm15 = vmor %vm819_vm11, %vm820_vm12  ;;  %s3942_s13 = scalar_lea.vmem %s4857_s18, 16  ;;  %s3948_s25 = scalar_lea.vmem %s3947_s24, 32 }
  0x1e   : > { %3548 = vmatpush3.bf16.msra.mxu1 %v3782_v34  ;;  %vm4339_vm1 = vmor %vm4324_vm15, %vm822_vm13  ;;  %p3943_p11 = scmp.ne.s32.totalorder %s4857_s18, %s3942_s13  ;;  %p3949_p0 = scmp.lt.s32.totalorder %s4857_s18, %s3947_s24 }
  0x1f   : > { %3549 = vmatprep.subr.bf16.mxu1 %v4007_v27  ;;  %vm4352_vm2 = vmor %vm4339_vm1, %vm824_vm14  ;;  %p3950_p1 = scmp.lt.s32.totalorder %s3948_s25, %s3942_s13 }
  0x20   : > { %3365 = vmatpush3.bf16.msra.mxu0 %v3767_v10  ;;  %p3944_p12 = pnand %p3943_p11, %p4099_p5 }
  0x21   : > { %3366 = vmatprep.subr.bf16.mxu0 %v3768_v11  ;;  %p3951_p2 = por %p3950_p1, %p3949_p0 }
  0x22   : > { %3550 = vmatpush3.bf16.msra.mxu1 %v3784_v36  ;;  %p3945_p13 = pneg %p3944_p12 }
  0x23   : > { %3551 = vmatprep.subr.bf16.mxu1 %v4007_v27 }
  0x24   : > { %3367 = vmatpush3.bf16.msra.mxu0 %v3769_v12  ;;  %v632_v12 = vld [vmem:[#allocation2 + $0xc] sm:$0x7]  ;;  %p3952_p3 = pnand %p3951_p2, %p3945_p13 }
  0x25   : > { %3368 = vmatprep.subr.bf16.mxu0 %v3770_v14 }
  0x26   : > { %3552 = vmatpush3.bf16.msra.mxu1 %v3786_v38 }
  0x27   : > { %3553 = vmatprep.subr.bf16.mxu1 %v4007_v27 }
  0x28   : > { %3369 = vmatpush3.bf16.msra.mxu0 %v3771_v20  ;;  %v635_v20 = vld [vmem:[#allocation2 + $0x10] sm:$0x7] }
  0x29   : > { %3370 = vmatprep.subr.bf16.mxu0 %v3772_v21  ;;  %v3088_v21 = vld.sshfl [vmem:[#allocation2] sm:$0x12 pattern:$0x76325410] }
  0x2a   : > { %3554 = vmatpush3.bf16.msra.mxu1 %v3788_v40  ;;  %v1023_v32 = vcombine.high %v3088_v21, %v3088_v21  ;;  %v3092_v36 = vrot.slane %v3088_v21, 9  ;;  %v3797_v21 = vld [vmem:[%s4900_s3 + $0x50] sm:$0xff]  }
  0x2b   : > { %3555 = vmatprep.subr.bf16.mxu1 %v4007_v27 }
  0x2c   : > { %3371 = vmatpush3.bf16.msra.mxu0 %v3773_v23 }
  0x2d   : > { %3503 = vmatprep.subr.bf16.mxu0 %v4007_v27 }
  0x2e   : > { %3556 = vmatpush3.bf16.msra.mxu1 %v3790_v42 }
  0x2f   : > { %527 = vmatmul.mubr.bf16.vlgmr.msra.gmra.mrb[0].mxu0 %v394_v25  ;;  %3557 = vmatprep.subr.bf16.mxu1 %v4007_v27 }
  0x30   : > { %3504 = vmatpush3.bf16.msra.mxu0 %v3776_v26  ;;  %3519 = vmatprep.mubr.msk.bf16.mxu0 %vm4009_vm0, %v4007_v27  ;;  %v4259_v26 = vld.sshfl [vmem:[#allocation2] sm:$0x13 pattern:$0x76325410] }
  0x31   : > { %3505 = vmatprep.subr.bf16.mxu0 %v4007_v27  ;;  %v830_v34 = vshll.u32 %v4259_v26, 16 }
  0x32   : > { %3558 = vmatpush3.bf16.msra.mxu1 %v3794_v43 }
  0x33   : > { %3563 = vmatprep.subr.bf16.mxu1 %v4007_v27  ;;  %v4277_v40 = vrot.slane %v830_v34, 7 }
  0x34   : > { %3506 = vmatpush3.bf16.msra.mxu0 %v3777_v28 }
  0x35   : > { %3507 = vmatprep.subr.bf16.mxu0 %v4007_v27 }
  0x38   : > { %3508 = vmatpush3.bf16.msra.mxu0 %v3779_v31 }
  0x39   : > { %3509 = vmatprep.subr.bf16.mxu0 %v4007_v27 }
  0x3c   : > { %3510 = vmatpush3.bf16.msra.mxu0 %v3781_v33  ;;  %v827_v33 = vshrl.u32 %v4259_v26, 16 }
  0x3d   : > { %3511 = vmatprep.subr.bf16.mxu0 %v4007_v27 }
  0x40   : > { %3512 = vmatpush3.bf16.msra.mxu0 %v3783_v35  ;;  %v3231_v35 = vld.sshfl [vmem:[#allocation2 + $0x14] sm:$0x13 pattern:$0x76325410] }
  0x41   : > { %3513 = vmatprep.subr.bf16.mxu0 %v4007_v27  ;;  %v1956_v42 = vshll.u32 %v3231_v35, 16 }
  0x44   : > { %3514 = vmatpush3.bf16.msra.mxu0 %v3785_v37  ;;  %v1057_v37 = vrot.slane %v1023_v32, 7 }
  0x45   : > { %3515 = vmatprep.subr.bf16.mxu0 %v4007_v27 }
  0x48   : > { %3516 = vmatpush3.bf16.msra.mxu0 %v3787_v39  ;;  %v4275_v39 = vrot.slane %v827_v33, 6 }
  0x49   : > { %3517 = vmatprep.subr.bf16.mxu0 %v4007_v27 }
  0x4c   : > { %3518 = vmatpush3.bf16.msra.mxu0 %v3789_v41  ;;  %v1953_v41 = vshrl.u32 %v3231_v35, 16 }
  0x4d   : > { %3523 = vmatprep.subr.bf16.mxu0 %v4007_v27 }
 0x102   : > { %v3372_v44 = vpop.f32.mrb[0].mxu0 }
 0x103   : > { %v3373_v46 = vpop.f32.mrb[1].mxu0 }
 0x104   : > { %v3374_v47 = vadd.f32 %v3373_v46, %v3372_v44  ;;  %v3375_v48 = vpop.f32.mrb[2].mxu0 }
 0x105   : > { %v3376_v49 = vpop.f32.mrb[3].mxu0 }
 0x106   : > { %v529_v50 = vadd.f32 %v3374_v47, %v3033_v45  ;;  %v3377_v51 = vadd.f32 %v3376_v49, %v3375_v48  ;;  %v4279_v47 = vld.sshfl [vmem:[#allocation2 + $0x14] sm:$0x12 pattern:$0x76325410]  ;;  %v1058_v49 = vsel %vm4271_vm10, %v3092_v36, %v1057_v37 }
 0x108   : > { %v532_v52 = vadd.f32 %v3377_v51, %v3033_v45  ;;  %v535_v53 = vmax.f32 %v529_v50, 0.0  ;;  %v794_v50 = vcombine.high %v4259_v26, %v4259_v26 }
 0x10a   : > { %v536_v54 = vmax.f32 %v532_v52, 0.0 }
 0x10c   : > { %v537_v55 = vpack.c.bf16 %v536_v54, %v535_v53  ;;  %v3050_v56 = vpack.c.bf16 %v536_v54, %v536_v54 }
 0x10e   : > { %v552_v57 = vrot.slane %v537_v55, %v4162_v22  ;;  %v559_v58 = vrot.slane %v3050_v56, %v4162_v22  ;;  %v3793_v55 = vld [vmem:[%s4900_s3 + $0x40] sm:$0xff]  }
 0x110   : > { %v560_v59 = vcombine.high %v552_v57, %v552_v57  ;;  %v561_v60 = vcombine.high %v559_v58, %v559_v58  ;;  %v568_v61 = vrot.slane %v552_v57, %v4162_v22  ;;  %v582_v62 = vrot.slane %v559_v58, %v4162_v22 }
 0x111   : > { %v1909_v57 = vcombine.high %v3231_v35, %v3231_v35  ;;  %v1955_v58 = vrot.slane %v1953_v41, 6 }
 0x112   : > { %v575_v63 = vrot.slane %v560_v59, %v4162_v22  ;;  %v589_v0 = vrot.slane %v561_v60, %v4162_v22  ;;  %v591_v1 = vshrl.u32 %v568_v61, 16  ;;  %v605_v2 = vshrl.u32 %v582_v62, 16 }
 0x113   : > { %v594_v4 = vshll.u32 %v568_v61, 16  ;;  %v608_v10 = vshll.u32 %v582_v62, 16  ;;  %v1958_v59 = vrot.slane %v1956_v42, 7 }
 0x114   : > { %v593_v3 = vrot.slane %v591_v1, 7  ;;  %v598_v5 = vshrl.u32 %v575_v63, 16  ;;  %v612_v6 = vshrl.u32 %v589_v0, 16  ;;  %v601_v8 = vshll.u32 %v575_v63, 16  ;;  %v3795_v1 = vld [vmem:[%s4900_s3 + $0x48] sm:$0xff]  }
 0x115   : > { %v607_v9 = vrot.slane %v605_v2, 7  ;;  %v615_v17 = vshll.u32 %v589_v0, 16 }
 0x116   : > { %v596_v14 = vor.u32 %v594_v4, %v593_v3  ;;  %v600_v15 = vrot.slane %v598_v5, 7  ;;  %v614_v16 = vrot.slane %v612_v6, 7  ;;  %v833_v5 = vor.u32 %v4277_v40, %v4275_v39 }
 0x117   : > { %v610_v19 = vor.u32 %v608_v10, %v607_v9  ;;  %v2131_v6 = vcombine.high %v4279_v47, %v4279_v47 }
 0x118   : > { %v603_v23 = vor.u32 %v601_v8, %v600_v15  ;;  %v617_v24 = vor.u32 %v615_v17, %v614_v16  ;;  %v627_v25 = vsel %vm4253_vm4, %v596_v14, %v626_v7  ;;  %v1959_v14 = vor.u32 %v1958_v59, %v1955_v58  ;;  %v3798_v58 = vld [vmem:[%s4900_s3 + $0xc8] sm:$0xff]   ;;  %v3799_v59 = vld [vmem:[%s4900_s3 + $0x58] sm:$0xff]  }
 0x119   : > { %628 = vst [vmem:[#allocation2 + $0x4] sm:$0x7] %v627_v25  ;;  %v633_v28 = vsel %vm4253_vm4, %v610_v19, %v632_v12  ;;  %v3263_v15 = vrot.slane %v4279_v47, 9  ;;  %v1962_v19 = vshll.u32 %v1909_v57, 16 }
 0x11a   : > { %v630_v30 = vsel %vm4253_vm4, %v603_v23, %v629_v18  ;;  %634 = vst [vmem:[#allocation2 + $0xc] sm:$0x7] %v633_v28  ;;  %v636_v31 = vsel %vm4253_vm4, %v617_v24, %v635_v20  ;;  %v3796_v20 = vld [vmem:[%s4900_s3 + $0xc0] sm:$0xff]  }
 0x11b   : > { %631 = vst [vmem:[#allocation2 + $0x8] sm:$0x7] %v630_v30  ;;  %637 = vst [vmem:[#allocation2 + $0x10] sm:$0x7] %v636_v31  ;;  %v2146_v30 = vrot.slane %v2131_v6, 7 }
 0x120   : > { %v3936_v43 = vld.sshfl [vmem:[#allocation2] sm:$0xf pattern:$0x76325410] }
 0x121   : > { %v3089_v44 = vld.sshfl [vmem:[#allocation2 + $0x4] sm:$0x12 pattern:$0x76325410] }
 0x122   : > { %v3937_v45 = vld.sshfl [vmem:[#allocation2 + $0x8] sm:$0xf pattern:$0x76325410]  ;;  %v1031_v46 = vcombine.high %v3089_v44, %v3089_v44  ;;  %v3093_v53 = vrot.slane %v3089_v44, 9  ;;  %v3805_v44 = vld [vmem:[%s4900_s3 + $0x70] sm:$0xff]  }
 0x123   : > { %v3090_v48 = vld.sshfl [vmem:[#allocation2 + $0x8] sm:$0x12 pattern:$0x76325410]  ;;  %v686_v60 = vcombine.low %v3936_v43, %v3937_v45 }
 0x124   : > { %v3091_v51 = vld.sshfl [vmem:[#allocation2 + $0xc] sm:$0x12 pattern:$0x76325410]  ;;  %v1039_v52 = vcombine.high %v3090_v48, %v3090_v48  ;;  %v1061_v54 = vrot.slane %v1031_v46, 7  ;;  %v3094_v62 = vrot.slane %v3090_v48, 9 }
 0x125   : > { %v1047_v56 = vcombine.high %v3091_v51, %v3091_v51  ;;  %v3062_v0 = vld.sshfl [vmem:[#allocation2 + $0x8] sm:$0x13 pattern:$0x76325410]  ;;  %v3095_v2 = vrot.slane %v3091_v51, 9  ;;  %3520 = vmatmul.mubr.bf16.vlgmr.msra.gmra.mrb[4].mxu0 %v686_v60  ;;  %v1960_v48 = vrot.slane %v1959_v14, 2  ;;  %v2147_v14 = vsel %vm4271_vm10, %v3263_v15, %v2146_v30 }
 0x126   : > { %v4290_v61 = vsel %vm4271_vm10, %v3093_v53, %v1061_v54  ;;  %v1065_v63 = vrot.slane %v1039_v52, 7  ;;  %v3063_v4 = vld.sshfl [vmem:[#allocation2 + $0xc] sm:$0x13 pattern:$0x76325410]  ;;  %v810_v9 = vcombine.high %v3062_v0, %v3062_v0  ;;  %3524 = vmatpush3.bf16.msra.mxu0 %v3793_v55  ;;  %3539 = vmatprep.mubr.msk.bf16.mxu0 %vm4009_vm0, %v4007_v27  ;;  %v855_v12 = vshrl.u32 %v3062_v0, 16 }
 0x127   : > { %v1069_v3 = vrot.slane %v1047_v56, 7  ;;  %v1088_v8 = vcombine.low %v1058_v49, %v4290_v61  ;;  %v4310_v11 = vld.sshfl [vmem:[#allocation2 + $0x4] sm:$0x13 pattern:$0x76325410]  ;;  %3525 = vmatprep.subr.bf16.mxu0 %v4007_v27  ;;  %v818_v17 = vcombine.high %v3063_v4, %v3063_v4  ;;  %v858_v18 = vshll.u32 %v3062_v0, 16 }
 0x128   : > { %v4301_v7 = vsel %vm4271_vm10, %v3094_v62, %v1065_v63  ;;  %v857_v24 = vrot.slane %v855_v12, 6  ;;  %v869_v25 = vshrl.u32 %v3063_v4, 16  ;;  %v872_v28 = vshll.u32 %v3063_v4, 16  ;;  %v3801_v15 = vld [vmem:[%s4900_s3 + $0x60] sm:$0xff]   ;;  %v3813_v60 = vld [vmem:[%s4900_s3 + $0x108] sm:$0xff]  }
 0x129   : > { %v4306_v10 = vsel %vm4271_vm10, %v3095_v2, %v1069_v3  ;;  %v1096_v31 = vrot.slane %v1088_v8, %v4162_v22  ;;  %v860_v33 = vrot.slane %v858_v18, 7  ;;  %v864_v34 = vshll.u32 %v810_v9, 16  ;;  %v3147_v35 = vld.sshfl [vmem:[#allocation2 + $0x10] sm:$0x13 pattern:$0x76325410] }
 0x12a   : > { %v1089_v16 = vcombine.low %v4301_v7, %v4306_v10  ;;  %3526 = vmatpush3.bf16.msra.mxu0 %v3795_v1  ;;  %v841_v36 = vshrl.u32 %v4310_v11, 16  ;;  %v844_v37 = vshll.u32 %v4310_v11, 16  ;;  %v871_v41 = vrot.slane %v869_v25, 6 }
 0x12b   : > { %v874_v42 = vrot.slane %v872_v28, 7  ;;  %3527 = vmatprep.subr.bf16.mxu0 %v4007_v27  ;;  %v861_v45 = vor.u32 %v860_v33, %v857_v24  ;;  %v878_v46 = vshll.u32 %v818_v17, 16  ;;  %v3175_v47 = vld.sshfl [vmem:[#allocation2 + $0x10] sm:$0x12 pattern:$0x76325410]  ;;  %v1370_v51 = vcombine.high %v3147_v35, %v3147_v35 }
 0x12c   : > { %v4330_v32 = vrot.slane %v1089_v16, %v4162_v22  ;;  %v1414_v52 = vshrl.u32 %v3147_v35, 16  ;;  %v1964_v53 = vrot.slane %v1962_v19, 7  ;;  %v866_v55 = vrot.slane %v864_v34, 7  ;;  %v3803_v33 = vld [vmem:[%s4900_s3 + $0x68] sm:$0xff]  }
 0x12d   : > { %v875_v49 = vor.u32 %v874_v42, %v871_v41  ;;  %v862_v54 = vrot.slane %v861_v45, 2  ;;  %v1417_v56 = vshll.u32 %v3147_v35, 16  ;;  %v1592_v57 = vcombine.high %v3175_v47, %v3175_v47 }
 0x12e   : > { %v1104_v43 = vcombine.low %v1096_v31, %v4330_v32  ;;  %3528 = vmatpush3.bf16.msra.mxu0 %v3797_v21  ;;  %v843_v62 = vrot.slane %v841_v36, 6  ;;  %v846_v63 = vrot.slane %v844_v37, 7  ;;  %v1416_v1 = vrot.slane %v1414_v52, 6 }
 0x12f   : > { %v876_v0 = vrot.slane %v875_v49, 2  ;;  %3529 = vmatprep.subr.bf16.mxu0 %v4007_v27  ;;  %v4360_v2 = vsel %vm4352_vm2, %v862_v54, %v866_v55  ;;  %v880_v3 = vrot.slane %v878_v46, 7  ;;  %v1419_v4 = vrot.slane %v1417_v56, 7  ;;  %v3806_v49 = vld [vmem:[%s4900_s3 + $0xe8] sm:$0xff]  }
 0x130   : > { %3560 = vmatmul.mubr.bf16.vlgmr.msra.gmra.mrb[0].mxu1 %v1104_v43  ;;  %v1423_v6 = vshll.u32 %v1370_v51, 16  ;;  %v802_v8 = vcombine.high %v4310_v11, %v4310_v11  ;;  %v3179_v9 = vrot.slane %v3175_v47, 9  ;;  %v1607_v12 = vrot.slane %v1592_v57, 7  ;;  %v3800_v11 = vld [vmem:[%s4900_s3 + $0xd0] sm:$0xff]   ;;  %v3804_v43 = vld [vmem:[%s4900_s3 + $0xe0] sm:$0xff]   ;;  %v3807_v51 = vld [vmem:[%s4900_s3 + $0x78] sm:$0xff]  }
 0x131   : > { %3564 = vmatpush3.bf16.msra.mxu1 %v3796_v20  ;;  %3579 = vmatprep.mubr.msk.bf16.mxu1 %vm4009_vm0, %v4007_v27  ;;  %v4370_v16 = vsel %vm4352_vm2, %v876_v0, %v880_v3  ;;  %v1420_v17 = vor.u32 %v1419_v4, %v1416_v1  ;;  %v1626_v18 = vcombine.low %v4290_v61, %v4301_v7  ;;  %v836_v20 = vshll.u32 %v794_v50, 16  ;;  %v3938_v55 = vld.sshfl [vmem:[#allocation2 + $0x4] sm:$0xf pattern:$0x76325410]  ;;  %v3809_v57 = vld [vmem:[%s4900_s3 + $0xf8] sm:$0xff]  }
 0x132   : > { %3565 = vmatprep.subr.bf16.mxu1 %v4007_v27  ;;  %v1965_v19 = vsel %vm4352_vm2, %v1960_v48, %v1964_v53  ;;  %3530 = vmatpush3.bf16.msra.mxu0 %v3799_v59  ;;  %v847_v21 = vor.u32 %v846_v63, %v843_v62  ;;  %v900_v61 = vcombine.low %v4360_v2, %v4370_v16  ;;  %v1425_v24 = vrot.slane %v1423_v6, 7  ;;  %v3808_v53 = vld [vmem:[%s4900_s3 + $0xf0] sm:$0xff]   ;;  %v3815_v63 = vld [vmem:[%s4900_s3 + $0x118] sm:$0xff]   ;;  %v3816_v0 = vld [vmem:[%s4900_s3 + $0x120] sm:$0xff]  }
 0x133   : > { %v1608_v7 = vsel %vm4271_vm10, %v3179_v9, %v1607_v12  ;;  %3531 = vmatprep.subr.bf16.mxu0 %v4007_v27  ;;  %v1421_v23 = vrot.slane %v1420_v17, 2  ;;  %v4393_v28 = vrot.slane %v1626_v18, %v4162_v22  ;;  %v850_v26 = vshll.u32 %v802_v8, 16  ;;  %v3939_v56 = vld.sshfl [vmem:[#allocation2 + $0xc] sm:$0xf pattern:$0x76325410] }
 0x134   : > { %v1627_v25 = vcombine.low %v4306_v10, %v1608_v7  ;;  %v2166_v50 = vcombine.low %v1608_v7, %v2147_v14  ;;  %v834_v30 = vrot.slane %v833_v5, 2  ;;  %v3802_v10 = vld [vmem:[%s4900_s3 + $0xd8] sm:$0xff]   ;;  %v838_v34 = vrot.slane %v836_v20, 7  ;;  %v3814_v62 = vld [vmem:[%s4900_s3 + $0x110] sm:$0xff]   ;;  %v3817_v1 = vld [vmem:[%s4900_s3 + $0x128] sm:$0xff]  }
 0x135   : > { %3566 = vmatpush3.bf16.msra.mxu1 %v3798_v58  ;;  %v4400_v38 = vsel %vm4352_vm2, %v1421_v23, %v1425_v24  ;;  %v848_v39 = vrot.slane %v847_v21, 2  ;;  %v4412_v40 = vrot.slane %v900_v61, %v4162_v22  ;;  %v852_v37 = vrot.slane %v850_v26, 7  ;;  %v3812_v58 = vld [vmem:[%s4900_s3 + $0x100] sm:$0xff]   ;;  %v3818_v3 = vld [vmem:[%s4900_s3 + $0x130] sm:$0xff]   ;;  %v3819_v8 = vld [vmem:[%s4900_s3 + $0x138] sm:$0xff]  }
 0x136   : > { %3567 = vmatprep.subr.bf16.mxu1 %v4007_v27  ;;  %v4403_v31 = vrot.slane %v1627_v25, %v4162_v22  ;;  %3532 = vmatpush3.bf16.msra.mxu0 %v3801_v15  ;;  %v1984_v5 = vcombine.low %v4400_v38, %v1965_v19  ;;  %v4420_v36 = vrot.slane %v2166_v50, %v4162_v22  ;;  %v3820_v14 = vld [vmem:[%s4900_s3 + $0x140] sm:$0xff]   ;;  %v3823_v17 = vld [vmem:[%s4900_s3 + $0x158] sm:$0xff]   ;;  %v3825_v19 = vld [vmem:[%s4900_s3 + $0x168] sm:$0xff]  }
 0x137   : > { %3533 = vmatprep.subr.bf16.mxu0 %v4007_v27  ;;  %v839_v45 = vsel %vm4352_vm2, %v834_v30, %v838_v34  ;;  %v853_v46 = vsel %vm4352_vm2, %v848_v39, %v852_v37  ;;  %v1238_v59 = vcombine.low %v3938_v55, %v3939_v56  ;;  %v1445_v6 = vcombine.low %v4370_v16, %v4400_v38  ;;  %v3821_v16 = vld [vmem:[%s4900_s3 + $0x148] sm:$0xff]   ;;  %v3824_v18 = vld [vmem:[%s4900_s3 + $0x160] sm:$0xff]   ;;  %v3827_v15 = vld [vmem:[%s4900_s3 + $0x178] sm:$0xff]  }
 0x138   : > { %v1642_v35 = vcombine.low %v4393_v28, %v4403_v31  ;;  %v4423_v41 = vrot.slane %v1984_v5, %v4162_v22  ;;  %v2181_v42 = vcombine.low %v4330_v32, %v4420_v36  ;;  %v899_v48 = vcombine.low %v839_v45, %v853_v46  ;;  %v3828_v20 = vld [vmem:[%s4900_s3 + $0x180] sm:$0xff]   ;;  %v3829_v21 = vld [vmem:[%s4900_s3 + $0x188] sm:$0xff]   ;;  %v3830_v61 = vld [vmem:[%s4900_s3 + $0x190] sm:$0xff]  }
 0x139   : > { %3568 = vmatpush3.bf16.msra.mxu1 %v3800_v11  ;;  %v1444_v4 = vcombine.low %v853_v46, %v4360_v2  ;;  %v1459_v12 = vrot.slane %v1445_v6, %v4162_v22  ;;  %v3826_v11 = vld [vmem:[%s4900_s3 + $0x170] sm:$0xff]   ;;  %v3831_v7 = vld [vmem:[%s4900_s3 + $0x198] sm:$0xff]   ;;  %v3832_v23 = vld [vmem:[%s4900_s3 + $0x1a0] sm:$0xff]  }
 0x13a   : > { %3569 = vmatprep.subr.bf16.mxu1 %v4007_v27  ;;  %3534 = vmatpush3.bf16.msra.mxu0 %v3803_v33  ;;  %v1999_v47 = vcombine.low %v4412_v40, %v4423_v41  ;;  %v907_v52 = vrot.slane %v899_v48, %v4162_v22  ;;  %v3854_v24 = vld [vmem:[%s4902_s5] ss:$16 sps:$4 sm:$0xff]   ;;  %v3856_v25 = vld [vmem:[%s4902_s5 + $0x4] ss:$16 sps:$4 sm:$0xff]   ;;  %v3833_v26 = vld [vmem:[%s4900_s3 + $0x1a8] sm:$0xff]  }
 0x13b   : > { %3535 = vmatprep.subr.bf16.mxu0 %v4007_v27  ;;  %v1452_v9 = vrot.slane %v1444_v4, %v4162_v22  ;;  %v3822_v22 = vld [vmem:[%s4900_s3 + $0x150] sm:$0xff]   ;;  %v3835_v39 = vld [vmem:[%s4900_s3 + $0x1b8] sm:$0xff]   ;;  %v3838_v37 = vld [vmem:[%s4900_s3 + $0x1c0] sm:$0xff]  }
 0x13c   : > { %v915_v54 = vcombine.low %v907_v52, %v4412_v40  ;;  %v3859_v28 = vld [vmem:[%s4902_s5 + $0x24] ss:$16 sps:$4 sm:$0xff]   ;;  %v3857_v50 = vld [vmem:[%s4902_s5 + $0x20] ss:$16 sps:$4 sm:$0xff]   ;;  %v3839_v46 = vld [vmem:[%s4900_s3 + $0x1c8] sm:$0xff]  }
 0x13d   : > { %3570 = vmatpush3.bf16.msra.mxu1 %v3802_v10  ;;  %v1460_v2 = vcombine.low %v1452_v9, %v1459_v12  ;;  %v3862_v30 = vld [vmem:[%s4902_s5 + $0x44] ss:$16 sps:$4 sm:$0xff]   ;;  %v3860_v31 = vld [vmem:[%s4902_s5 + $0x40] ss:$16 sps:$4 sm:$0xff]   ;;  %v3845_v55 = vld [vmem:[%s4900_s3 + $0x1f8] sm:$0xff]  }
 0x13e   : > { %3571 = vmatprep.subr.bf16.mxu1 %v4007_v27  ;;  %3536 = vmatpush3.bf16.msra.mxu0 %v3805_v44  ;;  %v3834_v38 = vld [vmem:[%s4900_s3 + $0x1b0] sm:$0xff]   ;;  %v3940_v10 = vld.sshfl [vmem:[#allocation2 + $0x8] sm:$0xf pattern:$0x76325410]  ;;  %v3842_v52 = vld [vmem:[%s4900_s3 + $0x1e0] sm:$0xff]  }
 0x13f   : > { %3537 = vmatprep.subr.bf16.mxu0 %v4007_v27  ;;  %v3941_v33 = vld.sshfl [vmem:[#allocation2 + $0x10] sm:$0xf pattern:$0x76325410]  ;;  %v3846_v56 = vld [vmem:[%s4900_s3 + $0x200] sm:$0xff]   ;;  %v3849_v40 = vld [vmem:[%s4900_s3 + $0x218] sm:$0xff]  }
 0x140   : > { %v3865_v34 = vld [vmem:[%s4902_s5 + $0x64] ss:$16 sps:$4 sm:$0xff]   ;;  %v3863_v5 = vld [vmem:[%s4902_s5 + $0x60] ss:$16 sps:$4 sm:$0xff]   ;;  %v3880_v36 = vld [vmem:[%s4902_s5 + $0xc] ss:$16 sps:$4 sm:$0xff]  }
 0x141   : > { %3572 = vmatpush3.bf16.msra.mxu1 %v3804_v43  ;;  %v1777_v43 = vcombine.low %v3940_v10, %v3941_v33  ;;  %v3866_v44 = vld [vmem:[%s4902_s5 + $0x80] ss:$16 sps:$4 sm:$0xff]   ;;  %v3871_v45 = vld [vmem:[%s4902_s5 + $0xa4] ss:$16 sps:$4 sm:$0xff]   ;;  %v3904_v33 = vld [vmem:[%s4904_s7 + $0x48] sm:$0xff]  }
 0x142   : > { %3573 = vmatprep.subr.bf16.mxu1 %v4007_v27  ;;  %3538 = vmatpush3.bf16.msra.mxu0 %v3807_v51  ;;  %v3869_v48 = vld [vmem:[%s4902_s5 + $0xa0] ss:$16 sps:$4 sm:$0xff]   ;;  %v3841_v51 = vld [vmem:[%s4900_s3 + $0x1d8] sm:$0xff]   ;;  %v3874_v4 = vld [vmem:[%s4902_s5 + $0xc4] ss:$16 sps:$4 sm:$0xff]  }
 0x143   : > { %2491 = vmatprep.subr.bf16.mxu0 %v3856_v25  ;;  %v3850_v41 = vld [vmem:[%s4900_s3 + $0x220] sm:$0xff]   ;;  %v3895_v25 = vld [vmem:[%s4902_s5 + $0xac] ss:$16 sps:$4 sm:$0xff]  }
 0x144   : > { %v3877_v32 = vld [vmem:[%s4902_s5 + $0xe4] ss:$16 sps:$4 sm:$0xff]  }
 0x145   : > { %3574 = vmatpush3.bf16.msra.mxu1 %v3806_v49  ;;  %3540 = vmatmul.mubr.bf16.vlgmr.msra.gmra.mrb[4].mxu0 %v915_v54  ;;  %v3840_v49 = vld [vmem:[%s4900_s3 + $0x1d0] sm:$0xff]   ;;  %v3903_v10 = vld [vmem:[%s4904_s7] sm:$0xff]  }
 0x146   : > { %3575 = vmatprep.subr.bf16.mxu1 %v4007_v27  ;;  %2523 = vmatprep.mubr.bf16.mxu0 %v4008_v29  ;;  %v3844_v54 = vld [vmem:[%s4900_s3 + $0x1f0] sm:$0xff]  }
 0x147   : > { %2492 = vmatpush1.bf16.msra.mxu0 %v3854_v24  ;;  %v3890_v24 = vld [vmem:[%s4902_s5 + $0x88] ss:$16 sps:$4 sm:$0xff]  }
 0x148   : > { %2493 = vmatprep.subr.bf16.mxu0 %v3859_v28  ;;  %v3893_v28 = vld [vmem:[%s4902_s5 + $0xa8] ss:$16 sps:$4 sm:$0xff]  }
 0x149   : > { %3576 = vmatpush3.bf16.msra.mxu1 %v3808_v53  ;;  %v3843_v53 = vld [vmem:[%s4900_s3 + $0x1e8] sm:$0xff]  }
 0x14a   : > { %3577 = vmatprep.subr.bf16.mxu1 %v4007_v27 }
 0x14b   : > { %2494 = vmatpush1.bf16.msra.mxu0 %v3857_v50  ;;  %v3896_v50 = vld [vmem:[%s4902_s5 + $0xc8] ss:$16 sps:$4 sm:$0xff]  }
 0x14c   : > { %2495 = vmatprep.subr.bf16.mxu0 %v3862_v30  ;;  %v3901_v30 = vld [vmem:[%s4902_s5 + $0xec] ss:$16 sps:$4 sm:$0xff]  }
 0x14d   : > { %3578 = vmatpush3.bf16.msra.mxu1 %v3809_v57  ;;  %v3847_v57 = vld [vmem:[%s4900_s3 + $0x208] sm:$0xff]  }
 0x14e   : > { %3583 = vmatprep.subr.bf16.mxu1 %v4007_v27 }
 0x14f   : > { %2496 = vmatpush1.bf16.msra.mxu0 %v3860_v31  ;;  %v3902_v31 = vld [vmem:[%s4904_s7 + $0x40] sm:$0xff]  }
 0x150   : > { %3580 = vmatmul.mubr.bf16.vlgmr.msra.gmra.mrb[0].mxu1 %v1238_v59  ;;  %2497 = vmatprep.subr.bf16.mxu0 %v3865_v34  ;;  %v3852_v59 = vld [vmem:[%s4900_s3 + $0x230] sm:$0xff]   ;;  %v3905_v34 = vld [vmem:[%s4904_s7 + $0x8] sm:$0xff]  }
 0x151   : > { %3584 = vmatpush3.bf16.msra.mxu1 %v3812_v58  ;;  %3599 = vmatprep.mubr.msk.bf16.mxu1 %vm4009_vm0, %v4007_v27  ;;  %v3848_v58 = vld [vmem:[%s4900_s3 + $0x210] sm:$0xff]  }
 0x152   : > { %3585 = vmatprep.subr.bf16.mxu1 %v4007_v27 }
 0x153   : > { %2498 = vmatpush1.bf16.msra.mxu0 %v3863_v5  ;;  %v3907_v5 = vld [vmem:[%s4904_s7 + $0x10] sm:$0xff]  }
 0x155   : > { %3586 = vmatpush3.bf16.msra.mxu1 %v3813_v60  ;;  %v3853_v60 = vld [vmem:[%s4900_s3 + $0x238] sm:$0xff]  }
 0x156   : > { %3587 = vmatprep.subr.bf16.mxu1 %v4007_v27 }
 0x159   : > { %3588 = vmatpush3.bf16.msra.mxu1 %v3814_v62 }
 0x15a   : > { %3589 = vmatprep.subr.bf16.mxu1 %v4007_v27 }
 0x15d   : > { %3590 = vmatpush3.bf16.msra.mxu1 %v3815_v63 }
 0x15e   : > { %3591 = vmatprep.subr.bf16.mxu1 %v4007_v27 }
 0x161   : > { %3592 = vmatpush3.bf16.msra.mxu1 %v3816_v0 }
 0x162   : > { %3593 = vmatprep.subr.bf16.mxu1 %v4007_v27 }
 0x165   : > { %3594 = vmatpush3.bf16.msra.mxu1 %v3817_v1 }
 0x166   : > { %3595 = vmatprep.subr.bf16.mxu1 %v4007_v27 }
 0x169   : > { %3596 = vmatpush3.bf16.msra.mxu1 %v3818_v3  ;;  %v3872_v3 = vld [vmem:[%s4902_s5 + $0xc0] ss:$16 sps:$4 sm:$0xff]  }
 0x16a   : > { %3597 = vmatprep.subr.bf16.mxu1 %v4007_v27 }
 0x16d   : > { %3598 = vmatpush3.bf16.msra.mxu1 %v3819_v8 }
 0x16e   : > { %3603 = vmatprep.subr.bf16.mxu1 %v4007_v27 }
 0x170   : > { %3600 = vmatmul.mubr.bf16.vlgmr.msra.gmra.mrb[0].mxu1 %v1460_v2 }
 0x171   : > { %3604 = vmatpush3.bf16.msra.mxu1 %v3820_v14  ;;  %3619 = vmatprep.mubr.msk.bf16.mxu1 %vm4009_vm0, %v4007_v27 }
 0x172   : > { %3605 = vmatprep.subr.bf16.mxu1 %v4007_v27 }
 0x175   : > { %3606 = vmatpush3.bf16.msra.mxu1 %v3821_v16 }
 0x176   : > { %3607 = vmatprep.subr.bf16.mxu1 %v4007_v27 }
 0x179   : > { %3608 = vmatpush3.bf16.msra.mxu1 %v3822_v22 }
 0x17a   : > { %3609 = vmatprep.subr.bf16.mxu1 %v4007_v27 }
 0x17d   : > { %3610 = vmatpush3.bf16.msra.mxu1 %v3823_v17 }
 0x17e   : > { %3611 = vmatprep.subr.bf16.mxu1 %v4007_v27 }
 0x181   : > { %3612 = vmatpush3.bf16.msra.mxu1 %v3824_v18 }
 0x182   : > { %3613 = vmatprep.subr.bf16.mxu1 %v4007_v27 }
 0x185   : > { %3614 = vmatpush3.bf16.msra.mxu1 %v3825_v19  ;;  %v3878_v19 = vld [vmem:[%s4902_s5 + $0x8] ss:$16 sps:$4 sm:$0xff]  }
 0x186   : > { %3615 = vmatprep.subr.bf16.mxu1 %v4007_v27 }
 0x189   : > { %3616 = vmatpush3.bf16.msra.mxu1 %v3826_v11 }
 0x18a   : > { %3617 = vmatprep.subr.bf16.mxu1 %v4007_v27 }
 0x18d   : > { %3618 = vmatpush3.bf16.msra.mxu1 %v3827_v15  ;;  %v3883_v15 = vld [vmem:[%s4902_s5 + $0x2c] ss:$16 sps:$4 sm:$0xff]  }
 0x18e   : > { %3623 = vmatprep.subr.bf16.mxu1 %v4007_v27 }
 0x190   : > { %3620 = vmatmul.mubr.bf16.vlgmr.msra.gmra.mrb[0].mxu1 %v1642_v35  ;;  %v3868_v35 = vld [vmem:[%s4902_s5 + $0x84] ss:$16 sps:$4 sm:$0xff]  }
 0x191   : > { %3624 = vmatpush3.bf16.msra.mxu1 %v3828_v20  ;;  %3639 = vmatprep.mubr.msk.bf16.mxu1 %vm4009_vm0, %v4007_v27  ;;  %v3881_v20 = vld [vmem:[%s4902_s5 + $0x28] ss:$16 sps:$4 sm:$0xff]  }
 0x192   : > { %3625 = vmatprep.subr.bf16.mxu1 %v4007_v27  ;;  %2499 = vmatprep.subr.bf16.mxu0 %v3868_v35  ;;  %v3908_v35 = vld [vmem:[%s4904_s7 + $0x58] sm:$0xff]  }
 0x193   : > { %2500 = vmatpush1.bf16.msra.mxu0 %v3866_v44  ;;  %v3911_v44 = vld [vmem:[%s4904_s7 + $0x20] sm:$0xff]  }
 0x194   : > { %2501 = vmatprep.subr.bf16.mxu0 %v3871_v45  ;;  %v3912_v45 = vld [vmem:[%s4904_s7 + $0x68] sm:$0xff]  }
 0x195   : > { %3626 = vmatpush3.bf16.msra.mxu1 %v3829_v21  ;;  %v3886_v21 = vld [vmem:[%s4902_s5 + $0x4c] ss:$16 sps:$4 sm:$0xff]  }
 0x196   : > { %3627 = vmatprep.subr.bf16.mxu1 %v4007_v27 }
 0x197   : > { %2502 = vmatpush1.bf16.msra.mxu0 %v3869_v48  ;;  %v3914_v48 = vld [vmem:[%s4904_s7 + $0x70] sm:$0xff]  }
 0x198   : > { %2503 = vmatprep.subr.bf16.mxu0 %v3874_v4 }
 0x199   : > { %3628 = vmatpush3.bf16.msra.mxu1 %v3830_v61  ;;  %v3884_v61 = vld [vmem:[%s4902_s5 + $0x48] ss:$16 sps:$4 sm:$0xff]  }
 0x19a   : > { %3629 = vmatprep.subr.bf16.mxu1 %v4007_v27 }
 0x19b   : > { %2504 = vmatpush1.bf16.msra.mxu0 %v3872_v3 }
 0x19c   : > { %2505 = vmatprep.subr.bf16.mxu0 %v3877_v32 }
 0x19d   : > { %3630 = vmatpush3.bf16.msra.mxu1 %v3831_v7  ;;  %v3889_v7 = vld [vmem:[%s4902_s5 + $0x6c] ss:$16 sps:$4 sm:$0xff]  }
 0x19e   : > { %3631 = vmatprep.subr.bf16.mxu1 %v4007_v27 }
 0x1a1   : > { %3632 = vmatpush3.bf16.msra.mxu1 %v3832_v23  ;;  %v3892_v23 = vld [vmem:[%s4902_s5 + $0x8c] ss:$16 sps:$4 sm:$0xff]  }
 0x1a2   : > { %3633 = vmatprep.subr.bf16.mxu1 %v4007_v27 }
 0x1a5   : > { %3634 = vmatpush3.bf16.msra.mxu1 %v3833_v26  ;;  %v3898_v26 = vld [vmem:[%s4902_s5 + $0xcc] ss:$16 sps:$4 sm:$0xff]  }
 0x1a6   : > { %3635 = vmatprep.subr.bf16.mxu1 %v4007_v27 }
 0x1a9   : > { %3636 = vmatpush3.bf16.msra.mxu1 %v3834_v38  ;;  %v3899_v38 = vld [vmem:[%s4902_s5 + $0xe8] ss:$16 sps:$4 sm:$0xff]  }
 0x1aa   : > { %3637 = vmatprep.subr.bf16.mxu1 %v4007_v27 }
 0x1ad   : > { %3638 = vmatpush3.bf16.msra.mxu1 %v3835_v39  ;;  %v3906_v39 = vld [vmem:[%s4904_s7 + $0x50] sm:$0xff]  }
 0x1ae   : > { %3643 = vmatprep.subr.bf16.mxu1 %v4007_v27 }
 0x1b0   : > { %3640 = vmatmul.mubr.bf16.vlgmr.msra.gmra.mrb[0].mxu1 %v1777_v43  ;;  %v3910_v43 = vld [vmem:[%s4904_s7 + $0x60] sm:$0xff]  }
 0x1b1   : > { %3644 = vmatpush3.bf16.msra.mxu1 %v3838_v37  ;;  %3659 = vmatprep.mubr.msk.bf16.mxu1 %vm4009_vm0, %v4007_v27  ;;  %v3909_v37 = vld [vmem:[%s4904_s7 + $0x18] sm:$0xff]  }
 0x1b2   : > { %3645 = vmatprep.subr.bf16.mxu1 %v4007_v27 }
 0x1b5   : > { %3646 = vmatpush3.bf16.msra.mxu1 %v3839_v46  ;;  %v3913_v46 = vld [vmem:[%s4904_s7 + $0x28] sm:$0xff]  }
 0x1b6   : > { %3647 = vmatprep.subr.bf16.mxu1 %v4007_v27 }
 0x1b9   : > { %3648 = vmatpush3.bf16.msra.mxu1 %v3840_v49  ;;  %v3915_v49 = vld [vmem:[%s4904_s7 + $0x30] sm:$0xff]  }
 0x1ba   : > { %3649 = vmatprep.subr.bf16.mxu1 %v4007_v27 }
 0x1bd   : > { %3650 = vmatpush3.bf16.msra.mxu1 %v3841_v51  ;;  %v3916_v51 = vld [vmem:[%s4904_s7 + $0x78] sm:$0xff]  }
 0x1be   : > { %3651 = vmatprep.subr.bf16.mxu1 %v4007_v27 }
 0x1c1   : > { %3652 = vmatpush3.bf16.msra.mxu1 %v3842_v52  ;;  %v3917_v52 = vld [vmem:[%s4904_s7 + $0x38] sm:$0xff]  }
 0x1c2   : > { %3653 = vmatprep.subr.bf16.mxu1 %v4007_v27 }
 0x1c5   : > { %3654 = vmatpush3.bf16.msra.mxu1 %v3843_v53  ;;  %v3918_v53 = vld [vmem:[%s4904_s7 + $0xc0] sm:$0xff]  }
 0x1c6   : > { %3655 = vmatprep.subr.bf16.mxu1 %v4007_v27 }
 0x1c9   : > { %3656 = vmatpush3.bf16.msra.mxu1 %v3844_v54  ;;  %v2313_v54 = vsub.s32 0, %v4150_v13 }
 0x1ca   : > { %3657 = vmatprep.subr.bf16.mxu1 %v4007_v27 }
 0x1cd   : > { %3658 = vmatpush3.bf16.msra.mxu1 %v3845_v55  ;;  %v2309_v55 = vld [vmem:[%s4903_s6] sm:$0xf] }
 0x1ce   : > { %3663 = vmatprep.subr.bf16.mxu1 %v4007_v27 }
 0x1d0   : > { %3660 = vmatmul.mubr.bf16.vlgmr.msra.gmra.mrb[0].mxu1 %v1999_v47  ;;  %v3851_v47 = vld [vmem:[%s4900_s3 + $0x228] sm:$0xff]  }
 0x1d1   : > { %3664 = vmatpush3.bf16.msra.mxu1 %v3846_v56  ;;  %3679 = vmatprep.mubr.msk.bf16.mxu1 %vm4009_vm0, %v4007_v27  ;;  %v2317_v56 = vsub.s32 1, %v4150_v13 }
 0x1d2   : > { %3665 = vmatprep.subr.bf16.mxu1 %v4007_v27 }
 0x1d5   : > { %3666 = vmatpush3.bf16.msra.mxu1 %v3847_v57  ;;  %v2314_v57 = vrot.slane %v2309_v55, %v2313_v54 }
 0x1d6   : > { %3667 = vmatprep.subr.bf16.mxu1 %v4007_v27 }
 0x1d9   : > { %3668 = vmatpush3.bf16.msra.mxu1 %v3848_v58  ;;  %v2318_v58 = vrot.slane %v2309_v55, %v2317_v56 }
 0x1da   : > { %3669 = vmatprep.subr.bf16.mxu1 %v4007_v27 }
 0x1dd   : > { %3670 = vmatpush3.bf16.msra.mxu1 %v3849_v40 }
 0x1de   : > { %3671 = vmatprep.subr.bf16.mxu1 %v4007_v27 }
 0x1e1   : > { %3672 = vmatpush3.bf16.msra.mxu1 %v3850_v41 }
 0x1e2   : > { %3673 = vmatprep.subr.bf16.mxu1 %v4007_v27 }
 0x1e5   : > { %3674 = vmatpush3.bf16.msra.mxu1 %v3851_v47 }
 0x1e6   : > { %3675 = vmatprep.subr.bf16.mxu1 %v4007_v27 }
 0x1e9   : > { %3676 = vmatpush3.bf16.msra.mxu1 %v3852_v59 }
 0x1ea   : > { %3677 = vmatprep.subr.bf16.mxu1 %v4007_v27  ;;  %v3875_v27 = vld [vmem:[%s4902_s5 + $0xe0] ss:$16 sps:$4 sm:$0xff]  }
 0x1eb   : > { %2506 = vmatpush1.bf16.msra.mxu0 %v3875_v27 }
 0x1ec   : > { %2534 = vmatprep.subr.bf16.mxu0 %v3880_v36 }
 0x1ed   : > { %3678 = vmatpush3.bf16.msra.mxu1 %v3853_v60 }
 0x1f0   : > { %3680 = vmatmul.mubr.bf16.vlgmr.msra.gmra.mrb[0].mxu1 %v2181_v42  ;;  %v3051_v42 = vld [vmem:[%s4901_s4] ss:$0 sm:$0xff] }
 0x218   : > { %v999_v62 = vpop.f32.mrb[4].mxu0 }
 0x219   : > { %v3541_v63 = vpop.f32.mrb[5].mxu0  ;;  %v3683_v6 = vadd.f32 %v3051_v42, %v999_v62 }
 0x21a   : > { %v1002_v0 = vpop.f32.mrb[6].mxu0 }
 0x21b   : > { %v3542_v1 = vpop.f32.mrb[7].mxu0  ;;  %v3685_v9 = vadd.f32 %v3051_v42, %v1002_v0 }
 0x2c3   : > { %v2265_v8 = vpop.f32.mrb[0].mxu1 }
 0x2c4   : > { %v3684_v12 = vadd.f32 %v3683_v6, %v2265_v8  ;;  %v3681_v14 = vpop.f32.mrb[1].mxu1 }
 0x2c5   : > { %v2268_v2 = vpop.f32.mrb[2].mxu1 }
 0x2c6   : > { %v3686_v16 = vadd.f32 %v3685_v9, %v2268_v2  ;;  %v3682_v22 = vpop.f32.mrb[3].mxu1  ;;  %v2274_v17 = vmax.f32 %v3684_v12, 0.0 }
 0x2c8   : > { %v2275_v18 = vmax.f32 %v3686_v16, 0.0 }
 0x2ca   : > { %v2276_v11 = vpack.c.bf16 %v2275_v18, %v2274_v17 }
 0x2cc   : > { %2524 = vmatmul.mubr.bf16.vlgmr.msra.gmra.mrb[8].mxu0 %v2276_v11 }
 0x2cd   : > { %2535 = vmatpush1.bf16.msra.mxu0 %v3878_v19  ;;  %2566 = vmatprep.mubr.bf16.mxu0 %v4008_v29  ;;  %v3887_v29 = vld [vmem:[%s4902_s5 + $0x68] ss:$16 sps:$4 sm:$0xff]  }
 0x2ce   : > { %2536 = vmatprep.subr.bf16.mxu0 %v3883_v15 }
 0x2d1   : > { %2537 = vmatpush1.bf16.msra.mxu0 %v3881_v20 }
 0x2d2   : > { %2538 = vmatprep.subr.bf16.mxu0 %v3886_v21  ;;  %v3919_v21 = vld [vmem:[%s4904_s7 + $0x80] sm:$0xff]  }
 0x2d5   : > { %2539 = vmatpush1.bf16.msra.mxu0 %v3884_v61 }
 0x2d6   : > { %2540 = vmatprep.subr.bf16.mxu0 %v3889_v7  ;;  %v3920_v7 = vld [vmem:[%s4904_s7 + $0xc8] sm:$0xff]  }
 0x2d9   : > { %2541 = vmatpush1.bf16.msra.mxu0 %v3887_v29  ;;  %v2321_v29 = vsub.s32 2, %v4150_v13 }
 0x2da   : > { %2542 = vmatprep.subr.bf16.mxu0 %v3892_v23  ;;  %v2325_v23 = vsub.s32 3, %v4150_v13 }
 0x2dd   : > { %2543 = vmatpush1.bf16.msra.mxu0 %v3890_v24  ;;  %v3921_v24 = vld [vmem:[%s4904_s7 + $0x88] sm:$0xff]  }
 0x2de   : > { %2544 = vmatprep.subr.bf16.mxu0 %v3895_v25  ;;  %v2322_v25 = vrot.slane %v2309_v55, %v2321_v29 }
 0x2e1   : > { %2545 = vmatpush1.bf16.msra.mxu0 %v3893_v28  ;;  %v3922_v28 = vld [vmem:[%s4904_s7 + $0xd0] sm:$0xff]  }
 0x2e2   : > { %2546 = vmatprep.subr.bf16.mxu0 %v3898_v26  ;;  %v2326_v26 = vrot.slane %v2309_v55, %v2325_v23 }
 0x2e5   : > { %2547 = vmatpush1.bf16.msra.mxu0 %v3896_v50 }
 0x2e6   : > { %2548 = vmatprep.subr.bf16.mxu0 %v3901_v30  ;;  %v3923_v30 = vld [vmem:[%s4904_s7 + $0x90] sm:$0xff]  }
 0x2e9   : > { %2549 = vmatpush1.bf16.msra.mxu0 %v3899_v38 }
 0x2ea   : > { %3459 = vmatprep.subr.bf16.mxu0 %v3902_v31  ;;  %v3924_v31 = vld [vmem:[%s4904_s7 + $0xd8] sm:$0xff]  }
 0x2ec   : > { %2567 = vmatmul.mubr.bf16.vlgmr.msra.gmra.mrb[12].mxu0 %v2276_v11 }
 0x2ed   : > { %3460 = vmatpush3.bf16.msra.mxu0 %v3903_v10 }
 0x2ee   : > { %3461 = vmatprep.subr.bf16.mxu0 %v3904_v33 }
 0x2f1   : > { %3462 = vmatpush3.bf16.msra.mxu0 %v3905_v34 }
 0x2f2   : > { %3463 = vmatprep.subr.bf16.mxu0 %v3906_v39 }
 0x2f5   : > { %3464 = vmatpush3.bf16.msra.mxu0 %v3907_v5 }
 0x2f6   : > { %3465 = vmatprep.subr.bf16.mxu0 %v3908_v35  ;;  %v3925_v35 = vld [vmem:[%s4904_s7 + $0x98] sm:$0xff]  }
 0x2f9   : > { %3466 = vmatpush3.bf16.msra.mxu0 %v3909_v37 }
 0x2fa   : > { %3467 = vmatprep.subr.bf16.mxu0 %v3910_v43 }
 0x2fd   : > { %3468 = vmatpush3.bf16.msra.mxu0 %v3911_v44  ;;  %v3926_v44 = vld [vmem:[%s4904_s7 + $0xe0] sm:$0xff]  }
 0x2fe   : > { %3469 = vmatprep.subr.bf16.mxu0 %v3912_v45 }
 0x301   : > { %3470 = vmatpush3.bf16.msra.mxu0 %v3913_v46 }
 0x302   : > { %3471 = vmatprep.subr.bf16.mxu0 %v3914_v48 }
 0x305   : > { %3472 = vmatpush3.bf16.msra.mxu0 %v3915_v49 }
 0x306   : > { %3473 = vmatprep.subr.bf16.mxu0 %v3916_v51  ;;  %v3927_v51 = vld [vmem:[%s4904_s7 + $0xa0] sm:$0xff]  }
 0x309   : > { %3474 = vmatpush3.bf16.msra.mxu0 %v3917_v52 }
 0x30a   : > { %3481 = vmatprep.subr.bf16.mxu0 %v3918_v53  ;;  %v3928_v53 = vld [vmem:[%s4904_s7 + $0xe8] sm:$0xff]  }
 0x39f   : > { %v2525_v40 = vpop.f32.mrb[8].mxu0 }
 0x3a0   : > { %v2526_v41 = vadd.f32 %v2525_v40, %v2314_v57  ;;  %v2527_v47 = vpop.f32.mrb[9].mxu0  ;;  %v3930_v40 = vld [vmem:[%s4904_s7 + $0xf0] sm:$0xff]  }
 0x3a1   : > { %v2528_v59 = vadd.f32 %v2527_v47, %v2318_v58  ;;  %v2529_v60 = vpop.f32.mrb[10].mxu0 }
 0x3a2   : > { %v2530_v62 = vadd.f32 %v2529_v60, %v2314_v57  ;;  %v2531_v63 = vpop.f32.mrb[11].mxu0  ;;  %v2577_v1 = vmax.f32 %v2526_v41, 0.0  ;;  %v3929_v57 = vld [vmem:[%s4904_s7 + $0xa8] sm:$0xff]  }
 0x3a3   : > { %v2532_v0 = vadd.f32 %v2531_v63, %v2318_v58  ;;  %v2578_v4 = vmax.f32 %v2528_v59, 0.0  ;;  %v3931_v59 = vld [vmem:[%s4904_s7 + $0xb0] sm:$0xff]   ;;  %v3932_v63 = vld [vmem:[%s4904_s7 + $0xf8] sm:$0xff]  }
 0x3a4   : > { %v2581_v3 = vmax.f32 %v2530_v62, 0.0 }
 0x3a5   : > { %v2582_v27 = vmax.f32 %v2532_v0, 0.0 }
 0x3a6   : > { %v2585_v32 = vadd.f32 %v2581_v3, %v2577_v1  ;;  %v3933_v3 = vld [vmem:[%s4904_s7 + $0xb8] sm:$0xff]  }
 0x3a7   : > { %v2592_v36 = vadd.f32 %v2582_v27, %v2578_v4 }
 0x3a8   : > { %v2586_v42 = vrot.slane %v2585_v32, 4 }
 0x3a9   : > { %v2593_v6 = vrot.slane %v2592_v36, 4 }
 0x3aa   : > { %v2587_v8 = vadd.f32 %v2586_v42, %v2585_v32 }
 0x3ab   : > { %v2594_v9 = vadd.f32 %v2593_v6, %v2592_v36 }
 0x3ac   : > { %v2588_v12 = vrot.slane %v2587_v8, 2 }
 0x3ad   : > { %v2595_v14 = vrot.slane %v2594_v9, 2 }
 0x3ae   : > { %v2589_v2 = vadd.f32 %v2588_v12, %v2587_v8 }
 0x3af   : > { %v2596_v16 = vadd.f32 %v2595_v14, %v2594_v9 }
 0x3b0   : > { %v2590_v22 = vrot.slane %v2589_v2, 1 }
 0x3b1   : > { %v2597_v17 = vrot.slane %v2596_v16, 1 }
 0x3b2   : > { %v2591_v18 = vadd.f32 %v2590_v22, %v2589_v2  ;;  %v2685_v2 = vld [vmem:[%s4905_s8] sm:$0x1] }
 0x3b3   : > { %v2598_v19 = vadd.f32 %v2597_v17, %v2596_v16 }
 0x3b4   : > { %v2613_v11 = vmul.f32 0.0625, %v2591_v18 }
 0x3b5   : > { %v2614_v15 = vmul.f32 0.0625, %v2598_v19 }
 0x3b6   : > { %v2617_v61 = vpack.c.bf16 %v2613_v11, %v2613_v11 }
 0x3b7   : > { %v2618_v20 = vpack.c.bf16 %v2614_v15, %v2614_v15 }
 0x3b9   : > { %2910 = vmatprep.mubr.bf16.mxu0 %v2618_v20 }
 0x3ba   : > { %2911 = vmatmul.mubr.bf16.vlgmr.msra.gmra.mrb[16].mxu0 %v2617_v61 }
 0x3bb   : > { %3482 = vmatpush3.bf16.msra.mxu0 %v3919_v21 }
 0x3bc   : > { %3483 = vmatprep.subr.bf16.mxu0 %v3920_v7 }
 0x3bf   : > { %v2568_v50 = vpop.f32.mrb[12].mxu0  ;;  %3484 = vmatpush3.bf16.msra.mxu0 %v3921_v24 }
 0x3c0   : > { %v2569_v13 = vadd.f32 %v2568_v50, %v2322_v25  ;;  %v2570_v38 = vpop.f32.mrb[13].mxu0  ;;  %3485 = vmatprep.subr.bf16.mxu0 %v3922_v28 }
 0x3c1   : > { %v2571_v10 = vadd.f32 %v2570_v38, %v2326_v26  ;;  %v2572_v33 = vpop.f32.mrb[14].mxu0 }
 0x3c2   : > { %v2573_v34 = vadd.f32 %v2572_v33, %v2322_v25  ;;  %v2574_v39 = vpop.f32.mrb[15].mxu0  ;;  %v2579_v37 = vmax.f32 %v2569_v13, 0.0 }
 0x3c3   : > { %v2575_v5 = vadd.f32 %v2574_v39, %v2326_v26  ;;  %3486 = vmatpush3.bf16.msra.mxu0 %v3923_v30  ;;  %v2580_v45 = vmax.f32 %v2571_v10, 0.0 }
 0x3c4   : > { %v2583_v43 = vmax.f32 %v2573_v34, 0.0  ;;  %3487 = vmatprep.subr.bf16.mxu0 %v3924_v31 }
 0x3c5   : > { %v2584_v46 = vmax.f32 %v2575_v5, 0.0 }
 0x3c6   : > { %v2599_v48 = vadd.f32 %v2583_v43, %v2579_v37 }
 0x3c7   : > { %v2606_v49 = vadd.f32 %v2584_v46, %v2580_v45  ;;  %3488 = vmatpush3.bf16.msra.mxu0 %v3925_v35 }
 0x3c8   : > { %v2600_v52 = vrot.slane %v2599_v48, 4  ;;  %3489 = vmatprep.subr.bf16.mxu0 %v3926_v44 }
 0x3c9   : > { %v2607_v54 = vrot.slane %v2606_v49, 4 }
 0x3ca   : > { %v2601_v55 = vadd.f32 %v2600_v52, %v2599_v48 }
 0x3cb   : > { %v2608_v56 = vadd.f32 %v2607_v54, %v2606_v49  ;;  %3490 = vmatpush3.bf16.msra.mxu0 %v3927_v51 }
 0x3cc   : > { %v2602_v58 = vrot.slane %v2601_v55, 2  ;;  %3491 = vmatprep.subr.bf16.mxu0 %v3928_v53 }
 0x3cd   : > { %v2609_v41 = vrot.slane %v2608_v56, 2 }
 0x3ce   : > { %v2603_v47 = vadd.f32 %v2602_v58, %v2601_v55 }
 0x3cf   : > { %3492 = vmatpush3.bf16.msra.mxu0 %v3929_v57  ;;  %v2610_v60 = vadd.f32 %v2609_v41, %v2608_v56 }
 0x3d0   : > { %v2604_v62 = vrot.slane %v2603_v47, 1  ;;  %3493 = vmatprep.subr.bf16.mxu0 %v3930_v40 }
 0x3d1   : > { %v2611_v0 = vrot.slane %v2610_v60, 1 }
 0x3d2   : > { %v2605_v1 = vadd.f32 %v2604_v62, %v2603_v47 }
 0x3d3   : > { %3494 = vmatpush3.bf16.msra.mxu0 %v3931_v59  ;;  %v2612_v4 = vadd.f32 %v2611_v0, %v2610_v60 }
 0x3d4   : > { %3495 = vmatprep.subr.bf16.mxu0 %v3932_v63  ;;  %v2615_v27 = vmul.f32 0.0625, %v2605_v1 }
 0x3d5   : > { %v2616_v32 = vmul.f32 0.0625, %v2612_v4 }
 0x3d6   : > { %v2619_v42 = vpack.c.bf16 %v2615_v27, %v2615_v27 }
 0x3d7   : > { %3496 = vmatpush3.bf16.msra.mxu0 %v3933_v3  ;;  %v2620_v36 = vpack.c.bf16 %v2616_v32, %v2616_v32 }
 0x3d9   : > { %2950 = vmatprep.mubr.bf16.mxu0 %v2620_v36 }
 0x3da   : > { %2951 = vmatmul.mubr.bf16.vlgmr.msra.gmra.mrb[20].mxu0 %v2619_v42 }
 0x48d   : > { %v3475_v6 = vpop.f32.mrb[16].mxu0 }
 0x48e   : > { %v3476_v8 = vpop.f32.mrb[17].mxu0 }
 0x48f   : > { %v3477_v9 = vadd.f32 %v3476_v8, %v3475_v6  ;;  %v3478_v12 = vpop.f32.mrb[18].mxu0 }
 0x490   : > { %v3479_v14 = vpop.f32.mrb[19].mxu0 }
 0x491   : > { %v2913_v17 = vadd.f32 %v3477_v9, %v2685_v2 }
 0x4ad   : > { %v3497_v16 = vpop.f32.mrb[20].mxu0 }
 0x4ae   : > { %v3498_v22 = vpop.f32.mrb[21].mxu0 }
 0x4af   : > { %v3499_v18 = vadd.f32 %v3498_v22, %v3497_v16  ;;  %v3500_v19 = vpop.f32.mrb[22].mxu0 }
 0x4b0   : > { %v3501_v11 = vpop.f32.mrb[23].mxu0 }
 0x4b1   : > { %v2953_v15 = vadd.f32 %v3499_v18, %v2913_v17 }
 0x4b3   : > { %2958 = vst [vmem:[%s324_s29] sm:$0x1] %v2953_v15 }
 0x4b4   : > { %3955 = shalt.err (!%p3952_p3)
}
 0x4b5   : > { %s3956_s23 = scalar_lea.hbm %s4855_s17, 16  ;;  %s3960_s28 = scalar_lea.hbm %s4906_s9, 32 }
 0x4b6   : > { %p3957_p4 = scmp.ne.s32.totalorder %s4855_s17, %s3956_s23  ;;  %p3961_p9 = scmp.lt.u32.totalorder %s4855_s17, %s4906_s9 }
 0x4b7   : > { %p3962_p10 = scmp.lt.u32.totalorder %s3960_s28, %s3956_s23  ;;  %p3964_p12 = scmp.lt.u32.totalorder %s3956_s23, %s4855_s17 }
 0x4b8   : > { %p3958_p7 = pnand %p3957_p4, %p4099_p5 }
 0x4b9   : > { %p3963_p11 = por %p3962_p10, %p3961_p9 }
 0x4ba   : > { %p3959_p8 = pneg %p3958_p7 }
 0x4bb   : > { %p3965_p13 = por %p3964_p12, %p3963_p11 }
 0x4bd   : > { %p3966_p0 = pnand %p3965_p13, %p3959_p8 }
 0x4bf   : > { %3969 = shalt.err (!%p3966_p0)
}
 0x4c0   : > { %3715 = dma.vmem_to_hbm [thread:$0]  (%p4099_p5), %s4857_s18, 16, %s4855_s17, %s2960_s21  }
 0x4c1 PF: > { %p3721_p1 = scmp.ge.s32.totalorder %s4004_s12, 2  ;;  %s2984_s16 = sand.u32 1, %s3992_s30  }
 0x4c2   : > { %s2985_s13 = scalar_lea.sflag [#allocation4], %s2984_s16 }
 0x4c3   : > { %p3718_p2 = pnand %p3721_p1, %p4103_p6 }
 0x4c5   : > { %3987 = dma.done.wait (!%p3718_p2), %s2985_s13, 16  }
 0x4c6   : > { %3989 = vsyncadd (!%p3718_p2), %s2985_s13, 4294967280  ;;  %s4920_s22 = sld [smem:[#allocation6_spill]]  ;;  %p19_p3 = scmp.ge.s32.totalorder %s4086_s15, 4  }
 0x4c7   : > { %s4921_s30 = smov %s3996_s10  ;;  %s4922_s10 = smov %s4000_s11 }
 0x4c8   : > { %s4924_s12 = smov %s4086_s15  ;;  %21 = sbr.rel (!%p19_p3) target bundleno = 3 (0x3), region = 101 }
 0x4cc   : > { %s4923_s11 = smov %s4920_s22 }
 0x4cf   :  { %2989 = vsyncpa [#allocation4], 1 }
 0x4d0   :  { %2991 = vsyncpa [#allocation4 + $0x1], 1 }

</bundles_post_ra>
